<compile_context>
chip_gen: v5e
topology: v5e:2x2
jax: 0.10.0
libtpu: 0.0.40
codegen_flags: <defaults>
</compile_context>

<pallas_src>
import functools

import jax
import jax.numpy as jnp
from jax.experimental import pallas as pl
from jax.experimental.pallas import tpu as pltpu


def _bottleneck_kernel(x_ref, mask_ref, w1_ref, b1_ref, w2_ref, b2_ref,
                       w3_ref, b3_ref, o_ref, h1_ref, *, guard, n_lanes,
                       w_pad):
    """One group of NB images per grid step; spatial+batch flat in lanes."""
    # Zero the guard regions once; the data region is fully rewritten below
    # every step, so the guards stay zero for the whole grid.
    @pl.when(pl.program_id(0) == 0)
    def _():
        h1_ref[...] = jnp.zeros_like(h1_ref)

    x = x_ref[0]              # (cin, n_lanes) f32, zero on the 1-pixel border
    mask = mask_ref[...]      # (1, n_lanes): 1.0 interior, 0.0 border/pad

    # conv1 (1x1) + folded BN1 + ReLU; re-zero the border so it acts as the
    # zero padding of the following 3x3 conv.
    h1 = jnp.dot(w1_ref[...], x, preferred_element_type=jnp.float32,
                 precision=jax.lax.Precision.HIGHEST)
    h1 = jnp.maximum(h1 + b1_ref[...], 0.0) * mask        # (width, n_lanes)

    # Stage h1 in a guard-padded flat scratch (lane-aligned store) so every
    # tap read below is a static, in-bounds slice — no pad/reshape in-kernel.
    h1_ref[:, guard:guard + n_lanes] = h1

    # conv2 (3x3, padding=1, stride=1) + folded BN2 + ReLU as 9 shifted 1x1
    # matmuls: out[m] = sum_taps W2[tap] @ h1_flat[m + (ky-1)*Wp + (kx-1)].
    acc = jnp.zeros_like(h1)
    for ky in range(3):
        for kx in range(3):
            off = (ky - 1) * w_pad + (kx - 1)
            tap = h1_ref[:, guard + off:guard + off + n_lanes]
            acc = acc + jnp.dot(w2_ref[ky * 3 + kx], tap,
                                preferred_element_type=jnp.float32,
                                precision=jax.lax.Precision.HIGHEST)
    h2 = jnp.maximum(acc + b2_ref[...], 0.0)               # (width, n_lanes)

    # conv3 (1x1) + folded BN3, residual add (identity = x), final ReLU.
    # Border/pad lanes hold garbage but are cropped in the wrapper (1x1 convs
    # do not mix spatial positions, so garbage never reaches the interior).
    h3 = jnp.dot(w3_ref[...], h2, preferred_element_type=jnp.float32,
                 precision=jax.lax.Precision.HIGHEST)
    out = jnp.maximum(h3 + b3_ref[...] + x, 0.0)
    o_ref[0] = out.astype(o_ref.dtype)


def _fold_bn(w, gamma, beta, mean, var, eps):
    """Fold eval-mode BatchNorm into conv weight (OIHW) + per-channel bias."""
    s = gamma / jnp.sqrt(var + eps)
    return w * s[:, None, None, None], beta - mean * s


def bottleneck_pallas(x, params, eps=1e-5):
    B, cin, H, W = x.shape

    w1f, b1 = _fold_bn(params["w1"], *params["bn1"], eps)  # (width, cin, 1, 1)
    w2f, b2 = _fold_bn(params["w2"], *params["bn2"], eps)  # (width, width, 3, 3)
    w3f, b3 = _fold_bn(params["w3"], *params["bn3"], eps)  # (cout, width, 1, 1)
    width = w1f.shape[0]
    cout = w3f.shape[0]
    assert cout == cin, "downsample=None requires inplanes == planes*expansion"

    hp, wp = H + 2, W + 2
    n_pix = hp * wp
    n_flat = ((n_pix + 127) // 128) * 128       # lane-dense per-image width
    guard = ((wp + 1 + 127) // 128) * 128       # aligned, >= max |tap offset|

    # Pack NB images per grid step (largest divisor of B keeping the lane
    # width moderate) so the matmul N dim is wide and per-step overhead is
    # amortized; grid steps stay available for megacore "parallel" sharding.
    nb = 1
    for cand in range(1, B + 1):
        if B % cand == 0 and cand * n_flat <= max(n_flat, 1024):
            nb = cand
    g = B // nb
    n_lanes = nb * n_flat

    # Wrapper-side layout plumbing (XLA handles pure relayout well):
    # zero-pad spatially, flatten spatial into lanes, pad lanes to 128-mult,
    # fold NB images into the lane axis (channel-major per group).
    x_pad = jnp.pad(x, ((0, 0), (0, 0), (1, 1), (1, 1))).reshape(B, cin, n_pix)
    x_pad = jnp.pad(x_pad, ((0, 0), (0, 0), (0, n_flat - n_pix)))
    x_cm = (x_pad.reshape(g, nb, cin, n_flat)
            .transpose(0, 2, 1, 3)
            .reshape(g, cin, n_lanes))

    mask1 = jnp.zeros((hp, wp), jnp.float32).at[1:H + 1, 1:W + 1].set(1.0)
    mask1 = jnp.pad(mask1.reshape(n_pix), (0, n_flat - n_pix))
    mask = jnp.tile(mask1, nb).reshape(1, n_lanes)

    w1_mat = w1f.reshape(width, cin).astype(jnp.float32)
    w2_taps = jnp.transpose(w2f, (2, 3, 0, 1)).reshape(9, width, width)
    w2_taps = w2_taps.astype(jnp.float32)
    w3_mat = w3f.reshape(cout, width).astype(jnp.float32)
    b1c = b1.reshape(width, 1).astype(jnp.float32)
    b2c = b2.reshape(width, 1).astype(jnp.float32)
    b3c = b3.reshape(cout, 1).astype(jnp.float32)

    kernel = functools.partial(_bottleneck_kernel,
                               guard=guard, n_lanes=n_lanes, w_pad=wp)

    flops = 2 * B * n_flat * (cin * width + 9 * width * width + width * cout)
    bytes_accessed = 4 * int(x_cm.size + g * cout * n_lanes + mask.size
                             + w1_mat.size + w2_taps.size + w3_mat.size
                             + b1c.size + b2c.size + b3c.size)

    out_flat = pl.pallas_call(
        kernel,
        out_shape=jax.ShapeDtypeStruct((g, cout, n_lanes), jnp.float32),
        grid=(g,),
        in_specs=[
            pl.BlockSpec((1, cin, n_lanes), lambda i: (i, 0, 0)),   # x (group)
            pl.BlockSpec((1, n_lanes), lambda i: (0, 0)),           # mask
            pl.BlockSpec((width, cin), lambda i: (0, 0)),           # w1 folded
            pl.BlockSpec((width, 1), lambda i: (0, 0)),             # b1
            pl.BlockSpec((9, width, width), lambda i: (0, 0, 0)),   # w2 taps
            pl.BlockSpec((width, 1), lambda i: (0, 0)),             # b2
            pl.BlockSpec((cout, width), lambda i: (0, 0)),          # w3 folded
            pl.BlockSpec((cout, 1), lambda i: (0, 0)),              # b3
        ],
        out_specs=pl.BlockSpec((1, cout, n_lanes), lambda i: (i, 0, 0)),
        scratch_shapes=[pltpu.VMEM((width, n_lanes + 2 * guard), jnp.float32)],
        compiler_params=pltpu.CompilerParams(
            dimension_semantics=("parallel",)),
        cost_estimate=pl.CostEstimate(flops=flops, transcendentals=0,
                                      bytes_accessed=bytes_accessed),
    )(x_cm, mask, w1_mat, b1c, w2_taps, b2c, w3_mat, b3c)

    # Unfold batch from lanes, strip lane padding and the 1-pixel border.
    out = (out_flat.reshape(g, cout, nb, n_flat)
           .transpose(0, 2, 1, 3)
           .reshape(B, cout, n_flat))
    out = out[:, :, :n_pix].reshape(B, cout, hp, wp)[:, :, 1:H + 1, 1:W + 1]
    return out


def bottleneck_ref(x, params, eps=1e-5):
    """Pure-JAX reference (eval-mode BatchNorm), same math as the kernel."""
    def conv(xx, w, padding=0):
        return jax.lax.conv_general_dilated(
            xx, w, window_strides=(1, 1),
            padding=[(padding, padding), (padding, padding)],
            dimension_numbers=("NCHW", "OIHW", "NCHW"),
            precision=jax.lax.Precision.HIGHEST)

    def bn(y, gamma, beta, mean, var):
        inv = 1.0 / jnp.sqrt(var + eps)
        return ((y - mean[None, :, None, None]) * inv[None, :, None, None]
                * gamma[None, :, None, None] + beta[None, :, None, None])

    out = jax.nn.relu(bn(conv(x, params["w1"]), *params["bn1"]))
    out = jax.nn.relu(bn(conv(out, params["w2"], padding=1), *params["bn2"]))
    out = bn(conv(out, params["w3"]), *params["bn3"])
    return jax.nn.relu(out + x)


if __name__ == "__main__":
    key = jax.random.PRNGKey(0)
    B, H, W = 2, 16, 16
    planes, expansion, base_width, groups = 8, 4, 64, 1
    width = int(planes * (base_width / 64.0)) * groups     # = 8
    inplanes = planes * expansion                           # = 32 (no downsample)
    cout = planes * expansion                               # = 32

    ks = jax.random.split(key, 16)

    def bn_params(k, c):
        k1, k2, k3, k4 = jax.random.split(k, 4)
        gamma = 0.5 + jax.random.uniform(k1, (c,), jnp.float32)
        beta = 0.1 * jax.random.normal(k2, (c,), jnp.float32)
        mean = 0.1 * jax.random.normal(k3, (c,), jnp.float32)
        var = 0.5 + jax.random.uniform(k4, (c,), jnp.float32)
        return gamma, beta, mean, var

    params = {
        "w1": 0.1 * jax.random.normal(ks[0], (width, inplanes, 1, 1), jnp.float32),
        "w2": 0.1 * jax.random.normal(ks[1], (width, width, 3, 3), jnp.float32),
        "w3": 0.1 * jax.random.normal(ks[2], (cout, width, 1, 1), jnp.float32),
        "bn1": bn_params(ks[3], width),
        "bn2": bn_params(ks[4], width),
        "bn3": bn_params(ks[5], cout),
    }
    x = jax.random.normal(ks[6], (B, inplanes, H, W), jnp.float32)

    out = jax.block_until_ready(bottleneck_pallas(x, params))
    ref = jax.block_until_ready(bottleneck_ref(x, params))

    assert out.shape == (B, cout, H, W), out.shape
    err = float(jnp.max(jnp.abs(out - ref)))
    assert err < 1e-3, f"Bottleneck mismatch: max abs err {err}"
    print("KERNEL_OK")
</pallas_src>

<mosaic_0001>
module attributes {stable_mosaic.version = 11 : i64} {
  func.func @_bottleneck_kernel(%arg0: i32, %arg1: memref<1x32x768xf32, #tpu.memory_space<vmem>>, %arg2: memref<1x768xf32, #tpu.memory_space<vmem>>, %arg3: memref<8x32xf32, #tpu.memory_space<vmem>>, %arg4: memref<8x1xf32, #tpu.memory_space<vmem>>, %arg5: memref<9x8x8xf32, #tpu.memory_space<vmem>>, %arg6: memref<8x1xf32, #tpu.memory_space<vmem>>, %arg7: memref<32x8xf32, #tpu.memory_space<vmem>>, %arg8: memref<32x1xf32, #tpu.memory_space<vmem>>, %arg9: memref<1x32x768xf32, #tpu.memory_space<vmem>>, %arg10: memref<8x1024xf32, #tpu.memory_space<vmem>>) attributes {dimension_semantics = [#tpu.dimension_semantics<parallel>], iteration_bounds = array<i64: 1>, scalar_prefetch = 0 : i64, scratch_operands = 1 : i64, tpu.core_type = #tpu.core_type<tc>, window_params = [{transform_indices = @transform_0, window_bounds = array<i64: 1, 32, 768>}, {pipeline_mode = #tpu.pipeline_mode<synchronous>, transform_indices = @transform_1, window_bounds = array<i64: 1, 768>}, {pipeline_mode = #tpu.pipeline_mode<synchronous>, transform_indices = @transform_2, window_bounds = array<i64: 8, 32>}, {pipeline_mode = #tpu.pipeline_mode<synchronous>, transform_indices = @transform_3, window_bounds = array<i64: 8, 1>}, {pipeline_mode = #tpu.pipeline_mode<synchronous>, transform_indices = @transform_4, window_bounds = array<i64: 9, 8, 8>}, {pipeline_mode = #tpu.pipeline_mode<synchronous>, transform_indices = @transform_5, window_bounds = array<i64: 8, 1>}, {pipeline_mode = #tpu.pipeline_mode<synchronous>, transform_indices = @transform_6, window_bounds = array<i64: 32, 8>}, {pipeline_mode = #tpu.pipeline_mode<synchronous>, transform_indices = @transform_7, window_bounds = array<i64: 32, 1>}, {transform_indices = @transform_8, window_bounds = array<i64: 1, 32, 768>}]} {
    %c0_i32 = arith.constant 0 : i32
    %0 = arith.cmpi eq, %arg0, %c0_i32 : i32
    %1 = arith.extui %0 : i1 to i32
    %c0_i32_0 = arith.constant 0 : i32
    %2 = arith.cmpi ne, %1, %c0_i32_0 : i32
    scf.if %2 {
      %cst_62 = arith.constant 0.000000e+00 : f32
      %78 = vector.broadcast %cst_62 : f32 to vector<8x1024xf32>
      %c0_63 = arith.constant 0 : index
      %c0_64 = arith.constant 0 : index
      %79 = vector.load %arg10[%c0_63, %c0_64] : memref<8x1024xf32, #tpu.memory_space<vmem>>, vector<8x1024xf32>
      tpu.vector_store %arg10[%c0_63, %c0_64], %78 {strides = array<i32>} : memref<8x1024xf32, #tpu.memory_space<vmem>>, vector<8x1024xf32>,
    } else {
    }
    %c0 = arith.constant 0 : index
    %c0_1 = arith.constant 0 : index
    %c0_2 = arith.constant 0 : index
    %3 = vector.load %arg1[%c0, %c0_1, %c0_2] : memref<1x32x768xf32, #tpu.memory_space<vmem>>, vector<1x32x768xf32>
    %4 = vector.shape_cast %3 : vector<1x32x768xf32> to vector<32x768xf32>
    %c0_3 = arith.constant 0 : index
    %c0_4 = arith.constant 0 : index
    %5 = vector.load %arg2[%c0_3, %c0_4] : memref<1x768xf32, #tpu.memory_space<vmem>>, vector<1x768xf32>
    %c0_5 = arith.constant 0 : index
    %c0_6 = arith.constant 0 : index
    %6 = vector.load %arg3[%c0_5, %c0_6] : memref<8x32xf32, #tpu.memory_space<vmem>>, vector<8x32xf32>
    %cst = arith.constant dense<0.000000e+00> : vector<8x768xf32>
    %7 = tpu.matmul %6, %4, %cst {dimension_numbers = #tpu.dot_dimension_numbers<[1], [0], [0], [1], [0, 0, 1, 1], [], []>, precision = #tpu.contract_precision<fp32>} : vector<8x32xf32>, vector<32x768xf32>, vector<8x768xf32> -> vector<8x768xf32>
    %c0_7 = arith.constant 0 : index
    %c0_8 = arith.constant 0 : index
    %8 = vector.load %arg4[%c0_7, %c0_8] : memref<8x1xf32, #tpu.memory_space<vmem>>, vector<8x1xf32>
    %9 = vector.broadcast %8 : vector<8x1xf32> to vector<8x768xf32>
    %10 = arith.addf %7, %9 : vector<8x768xf32>
    %cst_9 = arith.constant 0.000000e+00 : f32
    %11 = vector.broadcast %cst_9 : f32 to vector<8x768xf32>
    %12 = arith.maximumf %10, %11 : vector<8x768xf32>
    %13 = vector.broadcast %5 : vector<1x768xf32> to vector<8x768xf32>
    %14 = arith.mulf %12, %13 : vector<8x768xf32>
    %c0_10 = arith.constant 0 : index
    %c128 = arith.constant 128 : index
    %15 = vector.load %arg10[%c0_10, %c128] : memref<8x1024xf32, #tpu.memory_space<vmem>>, vector<8x768xf32>
    tpu.vector_store %arg10[%c0_10, %c128], %14 {strides = array<i32>} : memref<8x1024xf32, #tpu.memory_space<vmem>>, vector<8x768xf32>,
    %cst_11 = arith.constant 0.000000e+00 : f32
    %16 = vector.broadcast %cst_11 : f32 to vector<8x768xf32>
    %c0_12 = arith.constant 0 : index
    %c109 = arith.constant 109 : index
    %17 = vector.load %arg10[%c0_12, %c109] : memref<8x1024xf32, #tpu.memory_space<vmem>>, vector<8x768xf32>
    %c0_13 = arith.constant 0 : index
    %c0_14 = arith.constant 0 : index
    %c0_15 = arith.constant 0 : index
    %18 = vector.load %arg5[%c0_13, %c0_14, %c0_15] : memref<9x8x8xf32, #tpu.memory_space<vmem>>, vector<1x8x8xf32>
    %19 = vector.shape_cast %18 : vector<1x8x8xf32> to vector<8x8xf32>
    %cst_16 = arith.constant dense<0.000000e+00> : vector<8x768xf32>
    %20 = tpu.matmul %19, %17, %cst_16 {dimension_numbers = #tpu.dot_dimension_numbers<[1], [0], [0], [1], [0, 0, 1, 1], [], []>, precision = #tpu.contract_precision<fp32>} : vector<8x8xf32>, vector<8x768xf32>, vector<8x768xf32> -> vector<8x768xf32>
    %21 = arith.addf %16, %20 : vector<8x768xf32>
    %c0_17 = arith.constant 0 : index
    %c110 = arith.constant 110 : index
    %22 = vector.load %arg10[%c0_17, %c110] : memref<8x1024xf32, #tpu.memory_space<vmem>>, vector<8x768xf32>
    %c1 = arith.constant 1 : index
    %c0_18 = arith.constant 0 : index
    %c0_19 = arith.constant 0 : index
    %23 = vector.load %arg5[%c1, %c0_18, %c0_19] : memref<9x8x8xf32, #tpu.memory_space<vmem>>, vector<1x8x8xf32>
    %24 = vector.shape_cast %23 : vector<1x8x8xf32> to vector<8x8xf32>
    %cst_20 = arith.constant dense<0.000000e+00> : vector<8x768xf32>
    %25 = tpu.matmul %24, %22, %cst_20 {dimension_numbers = #tpu.dot_dimension_numbers<[1], [0], [0], [1], [0, 0, 1, 1], [], []>, precision = #tpu.contract_precision<fp32>} : vector<8x8xf32>, vector<8x768xf32>, vector<8x768xf32> -> vector<8x768xf32>
    %26 = arith.addf %21, %25 : vector<8x768xf32>
    %c0_21 = arith.constant 0 : index
    %c111 = arith.constant 111 : index
    %27 = vector.load %arg10[%c0_21, %c111] : memref<8x1024xf32, #tpu.memory_space<vmem>>, vector<8x768xf32>
    %c2 = arith.constant 2 : index
    %c0_22 = arith.constant 0 : index
    %c0_23 = arith.constant 0 : index
    %28 = vector.load %arg5[%c2, %c0_22, %c0_23] : memref<9x8x8xf32, #tpu.memory_space<vmem>>, vector<1x8x8xf32>
    %29 = vector.shape_cast %28 : vector<1x8x8xf32> to vector<8x8xf32>
    %cst_24 = arith.constant dense<0.000000e+00> : vector<8x768xf32>
    %30 = tpu.matmul %29, %27, %cst_24 {dimension_numbers = #tpu.dot_dimension_numbers<[1], [0], [0], [1], [0, 0, 1, 1], [], []>, precision = #tpu.contract_precision<fp32>} : vector<8x8xf32>, vector<8x768xf32>, vector<8x768xf32> -> vector<8x768xf32>
    %31 = arith.addf %26, %30 : vector<8x768xf32>
    %c0_25 = arith.constant 0 : index
    %c127 = arith.constant 127 : index
    %32 = vector.load %arg10[%c0_25, %c127] : memref<8x1024xf32, #tpu.memory_space<vmem>>, vector<8x768xf32>
    %c3 = arith.constant 3 : index
    %c0_26 = arith.constant 0 : index
    %c0_27 = arith.constant 0 : index
    %33 = vector.load %arg5[%c3, %c0_26, %c0_27] : memref<9x8x8xf32, #tpu.memory_space<vmem>>, vector<1x8x8xf32>
    %34 = vector.shape_cast %33 : vector<1x8x8xf32> to vector<8x8xf32>
    %cst_28 = arith.constant dense<0.000000e+00> : vector<8x768xf32>
    %35 = tpu.matmul %34, %32, %cst_28 {dimension_numbers = #tpu.dot_dimension_numbers<[1], [0], [0], [1], [0, 0, 1, 1], [], []>, precision = #tpu.contract_precision<fp32>} : vector<8x8xf32>, vector<8x768xf32>, vector<8x768xf32> -> vector<8x768xf32>
    %36 = arith.addf %31, %35 : vector<8x768xf32>
    %c0_29 = arith.constant 0 : index
    %c128_30 = arith.constant 128 : index
    %37 = vector.load %arg10[%c0_29, %c128_30] : memref<8x1024xf32, #tpu.memory_space<vmem>>, vector<8x768xf32>
    %c4 = arith.constant 4 : index
    %c0_31 = arith.constant 0 : index
    %c0_32 = arith.constant 0 : index
    %38 = vector.load %arg5[%c4, %c0_31, %c0_32] : memref<9x8x8xf32, #tpu.memory_space<vmem>>, vector<1x8x8xf32>
    %39 = vector.shape_cast %38 : vector<1x8x8xf32> to vector<8x8xf32>
    %cst_33 = arith.constant dense<0.000000e+00> : vector<8x768xf32>
    %40 = tpu.matmul %39, %37, %cst_33 {dimension_numbers = #tpu.dot_dimension_numbers<[1], [0], [0], [1], [0, 0, 1, 1], [], []>, precision = #tpu.contract_precision<fp32>} : vector<8x8xf32>, vector<8x768xf32>, vector<8x768xf32> -> vector<8x768xf32>
    %41 = arith.addf %36, %40 : vector<8x768xf32>
    %c0_34 = arith.constant 0 : index
    %c129 = arith.constant 129 : index
    %42 = vector.load %arg10[%c0_34, %c129] : memref<8x1024xf32, #tpu.memory_space<vmem>>, vector<8x768xf32>
    %c5 = arith.constant 5 : index
    %c0_35 = arith.constant 0 : index
    %c0_36 = arith.constant 0 : index
    %43 = vector.load %arg5[%c5, %c0_35, %c0_36] : memref<9x8x8xf32, #tpu.memory_space<vmem>>, vector<1x8x8xf32>
    %44 = vector.shape_cast %43 : vector<1x8x8xf32> to vector<8x8xf32>
    %cst_37 = arith.constant dense<0.000000e+00> : vector<8x768xf32>
    %45 = tpu.matmul %44, %42, %cst_37 {dimension_numbers = #tpu.dot_dimension_numbers<[1], [0], [0], [1], [0, 0, 1, 1], [], []>, precision = #tpu.contract_precision<fp32>} : vector<8x8xf32>, vector<8x768xf32>, vector<8x768xf32> -> vector<8x768xf32>
    %46 = arith.addf %41, %45 : vector<8x768xf32>
    %c0_38 = arith.constant 0 : index
    %c145 = arith.constant 145 : index
    %47 = vector.load %arg10[%c0_38, %c145] : memref<8x1024xf32, #tpu.memory_space<vmem>>, vector<8x768xf32>
    %c6 = arith.constant 6 : index
    %c0_39 = arith.constant 0 : index
    %c0_40 = arith.constant 0 : index
    %48 = vector.load %arg5[%c6, %c0_39, %c0_40] : memref<9x8x8xf32, #tpu.memory_space<vmem>>, vector<1x8x8xf32>
    %49 = vector.shape_cast %48 : vector<1x8x8xf32> to vector<8x8xf32>
    %cst_41 = arith.constant dense<0.000000e+00> : vector<8x768xf32>
    %50 = tpu.matmul %49, %47, %cst_41 {dimension_numbers = #tpu.dot_dimension_numbers<[1], [0], [0], [1], [0, 0, 1, 1], [], []>, precision = #tpu.contract_precision<fp32>} : vector<8x8xf32>, vector<8x768xf32>, vector<8x768xf32> -> vector<8x768xf32>
    %51 = arith.addf %46, %50 : vector<8x768xf32>
    %c0_42 = arith.constant 0 : index
    %c146 = arith.constant 146 : index
    %52 = vector.load %arg10[%c0_42, %c146] : memref<8x1024xf32, #tpu.memory_space<vmem>>, vector<8x768xf32>
    %c7 = arith.constant 7 : index
    %c0_43 = arith.constant 0 : index
    %c0_44 = arith.constant 0 : index
    %53 = vector.load %arg5[%c7, %c0_43, %c0_44] : memref<9x8x8xf32, #tpu.memory_space<vmem>>, vector<1x8x8xf32>
    %54 = vector.shape_cast %53 : vector<1x8x8xf32> to vector<8x8xf32>
    %cst_45 = arith.constant dense<0.000000e+00> : vector<8x768xf32>
    %55 = tpu.matmul %54, %52, %cst_45 {dimension_numbers = #tpu.dot_dimension_numbers<[1], [0], [0], [1], [0, 0, 1, 1], [], []>, precision = #tpu.contract_precision<fp32>} : vector<8x8xf32>, vector<8x768xf32>, vector<8x768xf32> -> vector<8x768xf32>
    %56 = arith.addf %51, %55 : vector<8x768xf32>
    %c0_46 = arith.constant 0 : index
    %c147 = arith.constant 147 : index
    %57 = vector.load %arg10[%c0_46, %c147] : memref<8x1024xf32, #tpu.memory_space<vmem>>, vector<8x768xf32>
    %c8 = arith.constant 8 : index
    %c0_47 = arith.constant 0 : index
    %c0_48 = arith.constant 0 : index
    %58 = vector.load %arg5[%c8, %c0_47, %c0_48] : memref<9x8x8xf32, #tpu.memory_space<vmem>>, vector<1x8x8xf32>
    %59 = vector.shape_cast %58 : vector<1x8x8xf32> to vector<8x8xf32>
    %cst_49 = arith.constant dense<0.000000e+00> : vector<8x768xf32>
    %60 = tpu.matmul %59, %57, %cst_49 {dimension_numbers = #tpu.dot_dimension_numbers<[1], [0], [0], [1], [0, 0, 1, 1], [], []>, precision = #tpu.contract_precision<fp32>} : vector<8x8xf32>, vector<8x768xf32>, vector<8x768xf32> -> vector<8x768xf32>
    %61 = arith.addf %56, %60 : vector<8x768xf32>
    %c0_50 = arith.constant 0 : index
    %c0_51 = arith.constant 0 : index
    %62 = vector.load %arg6[%c0_50, %c0_51] : memref<8x1xf32, #tpu.memory_space<vmem>>, vector<8x1xf32>
    %63 = vector.broadcast %62 : vector<8x1xf32> to vector<8x768xf32>
    %64 = arith.addf %61, %63 : vector<8x768xf32>
    %cst_52 = arith.constant 0.000000e+00 : f32
    %65 = vector.broadcast %cst_52 : f32 to vector<8x768xf32>
    %66 = arith.maximumf %64, %65 : vector<8x768xf32>
    %c0_53 = arith.constant 0 : index
    %c0_54 = arith.constant 0 : index
    %67 = vector.load %arg7[%c0_53, %c0_54] : memref<32x8xf32, #tpu.memory_space<vmem>>, vector<32x8xf32>
    %cst_55 = arith.constant dense<0.000000e+00> : vector<32x768xf32>
    %68 = tpu.matmul %67, %66, %cst_55 {dimension_numbers = #tpu.dot_dimension_numbers<[1], [0], [0], [1], [0, 0, 1, 1], [], []>, precision = #tpu.contract_precision<fp32>} : vector<32x8xf32>, vector<8x768xf32>, vector<32x768xf32> -> vector<32x768xf32>
    %c0_56 = arith.constant 0 : index
    %c0_57 = arith.constant 0 : index
    %69 = vector.load %arg8[%c0_56, %c0_57] : memref<32x1xf32, #tpu.memory_space<vmem>>, vector<32x1xf32>
    %70 = vector.broadcast %69 : vector<32x1xf32> to vector<32x768xf32>
    %71 = arith.addf %68, %70 : vector<32x768xf32>
    %72 = arith.addf %71, %4 : vector<32x768xf32>
    %cst_58 = arith.constant 0.000000e+00 : f32
    %73 = vector.broadcast %cst_58 : f32 to vector<32x768xf32>
    %74 = arith.maximumf %72, %73 : vector<32x768xf32>
    %c0_59 = arith.constant 0 : index
    %c0_60 = arith.constant 0 : index
    %c0_61 = arith.constant 0 : index
    %75 = vector.load %arg9[%c0_59, %c0_60, %c0_61] : memref<1x32x768xf32, #tpu.memory_space<vmem>>, vector<1x32x768xf32>
    %76 = vector.shape_cast %75 : vector<1x32x768xf32> to vector<32x768xf32>
    %77 = vector.shape_cast %74 : vector<32x768xf32> to vector<1x32x768xf32>
    tpu.vector_store %arg9[%c0_59, %c0_60, %c0_61], %77 {strides = array<i32>} : memref<1x32x768xf32, #tpu.memory_space<vmem>>, vector<1x32x768xf32>,
    return
  }
  func.func @transform_0(%arg0: i32) -> (i32, i32, i32) {
    %c0_i32 = arith.constant 0 : i32
    %c0_i32_0 = arith.constant 0 : i32
    %c0_i32_1 = arith.constant 0 : i32
    return %arg0, %c0_i32, %c0_i32_0 : i32, i32, i32
  }
  func.func @transform_1(%arg0: i32) -> (i32, i32) {
    %c0_i32 = arith.constant 0 : i32
    %c0_i32_0 = arith.constant 0 : i32
    %c0_i32_1 = arith.constant 0 : i32
    return %c0_i32, %c0_i32_0 : i32, i32
  }
  func.func @transform_2(%arg0: i32) -> (i32, i32) {
    %c0_i32 = arith.constant 0 : i32
    %c0_i32_0 = arith.constant 0 : i32
    %c0_i32_1 = arith.constant 0 : i32
    return %c0_i32, %c0_i32_0 : i32, i32
  }
  func.func @transform_3(%arg0: i32) -> (i32, i32) {
    %c0_i32 = arith.constant 0 : i32
    %c0_i32_0 = arith.constant 0 : i32
    %c0_i32_1 = arith.constant 0 : i32
    return %c0_i32, %c0_i32_0 : i32, i32
  }
  func.func @transform_4(%arg0: i32) -> (i32, i32, i32) {
    %c0_i32 = arith.constant 0 : i32
    %c0_i32_0 = arith.constant 0 : i32
    %c0_i32_1 = arith.constant 0 : i32
    %c0_i32_2 = arith.constant 0 : i32
    return %c0_i32, %c0_i32_0, %c0_i32_1 : i32, i32, i32
  }
  func.func @transform_5(%arg0: i32) -> (i32, i32) {
    %c0_i32 = arith.constant 0 : i32
    %c0_i32_0 = arith.constant 0 : i32
    %c0_i32_1 = arith.constant 0 : i32
    return %c0_i32, %c0_i32_0 : i32, i32
  }
  func.func @transform_6(%arg0: i32) -> (i32, i32) {
    %c0_i32 = arith.constant 0 : i32
    %c0_i32_0 = arith.constant 0 : i32
    %c0_i32_1 = arith.constant 0 : i32
    return %c0_i32, %c0_i32_0 : i32, i32
  }
  func.func @transform_7(%arg0: i32) -> (i32, i32) {
    %c0_i32 = arith.constant 0 : i32
    %c0_i32_0 = arith.constant 0 : i32
    %c0_i32_1 = arith.constant 0 : i32
    return %c0_i32, %c0_i32_0 : i32, i32
  }
  func.func @transform_8(%arg0: i32) -> (i32, i32, i32) {
    %c0_i32 = arith.constant 0 : i32
    %c0_i32_0 = arith.constant 0 : i32
    %c0_i32_1 = arith.constant 0 : i32
    return %arg0, %c0_i32, %c0_i32_0 : i32, i32, i32
  }
}

</mosaic_0001>

<bundles_post_ra>
// kernel: tpu_custom_call.1
= control target key start
LH: loop header
LB: loop body
LE: loop exit
PB: predicated region body
PF: predicated region fallthrough
CT: control target
= control target key end

     0   :  { %vm74_vm0 = vcmask 261120   ;;  %v11090_v9 = vmov 0   ;;  %s13094_s0 = inlined_call_operand.vmem [shape: f32[1,32,768], index: 0, kind: input, shape index: {}]   ;;  %s13095_s1 = inlined_call_operand.vmem [shape: f32[1,768], index: 1, kind: input, shape index: {}]   ;;  %s13096_s2 = inlined_call_operand.vmem [shape: f32[8,32], index: 2, kind: input, shape index: {}]   ;;  %s13097_s3 = inlined_call_operand.vmem [shape: f32[8,1], index: 3, kind: input, shape index: {}]   ;;  %s13098_s4 = inlined_call_operand.vmem [shape: f32[9,8,8], index: 4, kind: input, shape index: {}]   ;;  %s13099_s5 = inlined_call_operand.vmem [shape: f32[8,1], index: 5, kind: input, shape index: {}]   ;;  %s13100_s6 = inlined_call_operand.vmem [shape: f32[32,8], index: 6, kind: input, shape index: {}]   ;;  %s13101_s7 = inlined_call_operand.vmem [shape: f32[32,1], index: 7, kind: input, shape index: {}]   ;;  %s13102_s8 = inlined_call_operand.hbm [shape: f32[1,32,768], index: 8, kind: output, shape index: {}]  }
   0x1   :  { %v60_v0 = vld [vmem:[%s13094_s0 + $0x90] sm:$0xff]  ;;  %v54_v1 = vld [vmem:[%s13094_s0 + $0x60] sm:$0xff]  ;;  %v61_v8 = vld [vmem:[%s13094_s0 + $0x98] sm:$0xff]  ;;  %11037 = vset.pattern.permute.xlu0 %v11090_v9  ;;  %11038 = vset.pattern.permute.xlu1 %v11090_v9 }
   0x2   :  { %v48_v2 = vld [vmem:[%s13094_s0 + $0x30] sm:$0xff]  ;;  %v11157_v3 = vand.u32 4294901760, %v60_v0  ;;  %v11159_v4 = vand.u32 4294901760, %v54_v1  ;;  %v42_v6 = vld [vmem:[%s13094_s0] sm:$0xff]  ;;  %v11174_v12 = vand.u32 4294901760, %v61_v8  ;;  %v55_v13 = vld [vmem:[%s13094_s0 + $0x68] sm:$0xff]  ;;  %11039 = vset.pattern.permute.xlu2 %v11090_v9 }
   0x3   :  { %v11161_v5 = vand.u32 4294901760, %v48_v2  ;;  %v67_v7 = vld [vmem:[%s13096_s2] sm:$0xff]  ;;  %v11172_v10 = vand.u32 4294901760, %v42_v6  ;;  %v49_v14 = vld [vmem:[%s13094_s0 + $0x38] sm:$0xff]  ;;  %v43_v19 = vld [vmem:[%s13094_s0 + $0x8] sm:$0xff]  ;;  %v11198_v22 = vand.u32 4294901760, %v55_v13 }
   0x4   :  { %v76_v11 = vsel %vm74_vm0, %v67_v7, 0  ;;  %91 = vmatpush.msra.mxu0 %v11157_v3  ;;  %v120_v15 = vsub.f32 %v60_v0, %v11157_v3  ;;  %v126_v16 = vsub.f32 %v54_v1, %v11159_v4  ;;  %191 = vmatpush.msra.mxu3 %v11157_v3  ;;  %v68_v20 = vld [vmem:[%s13097_s3] sm:$0xff]  ;;  %v11201_v23 = vsub.f32 %v61_v8, %v11174_v12 }
   0x5   :  { %v132_v17 = vsub.f32 %v48_v2, %v11161_v5  ;;  %v11187_v18 = vand.u32 4294901760, %v76_v11  ;;  %v11196_v21 = vsub.f32 %v42_v6, %v11172_v10  ;;  %v11203_v24 = vand.u32 4294901760, %v49_v14  ;;  %71 = vperm.xlu0 %11037, %v68_v20  }
   0x6   :  { %162 = vmatpush.msra.mxu2 %v120_v15  ;;  %93 = vmatpush.msra.mxu0 %v11159_v4  ;;  %v121_v25 = vand.u32 4294901760, %v120_v15  ;;  %v127_v27 = vand.u32 4294901760, %v126_v16 }
   0x7   :  { %v11207_v26 = vsub.f32 %v76_v11, %v11187_v18  ;;  %v133_v28 = vand.u32 4294901760, %v132_v17 }
   0x8   :  { %13 = vsyncpa [#allocation4], 0  ;;  %193 = vmatpush.msra.mxu3 %v11159_v4  ;;  %v306_v29 = vand.u32 4294901760, %v11201_v23  ;;  %v139_v30 = vand.u32 4294901760, %v11196_v21  ;;  %v11213_v31 = vsub.f32 %v55_v13, %v11198_v22  ;;  %v11215_v32 = vand.u32 4294901760, %v43_v19  ;;  %165 = vmatpush.msra.mxu2 %v126_v16  ;;  %v62_v56 = vld [vmem:[%s13094_s0 + $0xa0] sm:$0xff] }
   0x9   :  { %95 = vmatpush.msra.mxu0 %v11161_v5  ;;  %v122_v33 = vsub.f32 %v120_v15, %v121_v25  ;;  %v11219_v34 = vand.u32 4294901760, %v11207_v26  ;;  %v128_v35 = vsub.f32 %v126_v16, %v127_v27  ;;  %v134_v36 = vsub.f32 %v132_v17, %v133_v28  ;;  %v56_v59 = vld [vmem:[%s13094_s0 + $0x70] sm:$0xff]  ;;  %v50_v60 = vld [vmem:[%s13094_s0 + $0x40] sm:$0xff]  ;;  %v63_v0 = vld [vmem:[%s13094_s0 + $0xa8] sm:$0xff]  ;;  %s11092_s9 = smov 18   ;;  %s11094_s12 = smov 17  }
   0xa   :  { %195 = vmatpush.msra.mxu3 %v11161_v5  ;;  %v307_v37 = vsub.f32 %v11201_v23, %v306_v29  ;;  %v312_v38 = vand.u32 4294901760, %v11213_v31  ;;  %v11227_v39 = vsub.f32 %v49_v14, %v11203_v24  ;;  %168 = vmatpush.msra.mxu2 %v132_v17  ;;  %v140_v43 = vsub.f32 %v11196_v21, %v139_v30  ;;  %v44_v63 = vld [vmem:[%s13094_s0 + $0x10] sm:$0xff]  ;;  %v57_v2 = vld [vmem:[%s13094_s0 + $0x78] sm:$0xff]  ;;  %v51_v7 = vld [vmem:[%s13094_s0 + $0x48] sm:$0xff]  ;;  %s11095_s15 = smov 1   ;;  %s11096_s16 = smov 127  }
   0xb   :  { %97 = vmatpush.msra.mxu0 %v11172_v10  ;;  %v123_v40 = vand.u32 4294901760, %v122_v33  ;;  %v101_v41 = vsub.f32 %v11207_v26, %v11219_v34  ;;  %v129_v42 = vand.u32 4294901760, %v128_v35  ;;  %v135_v47 = vand.u32 4294901760, %v134_v36  ;;  %s11097_s17 = smov 111   ;;  %s11098_s18 = smov 110  }
   0xc   :  { %197 = vmatpush.msra.mxu3 %v11172_v10  ;;  %v313_v44 = vsub.f32 %v11213_v31, %v312_v38  ;;  %v318_v45 = vand.u32 4294901760, %v11227_v39  ;;  %171 = vmatpush.msra.mxu2 %v11196_v21  ;;  %v308_v48 = vand.u32 4294901760, %v307_v37  ;;  %v323_v49 = vsub.f32 %v43_v19, %v11215_v32  ;;  %s11099_s19 = smov 109   ;;  %s11101_s21 = smov 768  }
   0xd   :  { %220 = vmatpush.msrb.mxu0 %v121_v25  ;;  %124 = vmatpush.msra.mxu1 %v123_v40  ;;  %v11237_v46 = vand.u32 4294901760, %v101_v41  ;;  %v141_v51 = vand.u32 4294901760, %v140_v43  ;;  %v11252_v58 = vand.u32 4294901760, %v62_v56  ;;  %v11264_v61 = vand.u32 4294901760, %v56_v59  ;;  %v64_v43 = vld [vmem:[%s13094_s0 + $0xb0] sm:$0xff] }
   0xe   :  { %174 = vmatmul.f32.vlgmr.msra.gmra.mxu2 %v11207_v26  ;;  %201 = vmatmul.f32.vlgmr.msra.gmra.mxu3 %v11219_v34  ;;  %v319_v50 = vsub.f32 %v11227_v39, %v318_v45  ;;  %v314_v52 = vand.u32 4294901760, %v313_v44  ;;  %v324_v53 = vand.u32 4294901760, %v323_v49  ;;  %v11280_v1 = vand.u32 4294901760, %v50_v60 }
   0xf   :  { %103 = vmatmul.f32.vlgmr.msra.gmra.mxu0 %v11237_v46  ;;  %130 = vmatpush.msra.mxu1 %v129_v42  ;;  %v11270_v62 = vsub.f32 %v62_v56, %v11252_v58  ;;  %v11293_v6 = vand.u32 4294901760, %v63_v0  ;;  %v11305_v9 = vand.u32 4294901760, %v57_v2  ;;  %v11319_v15 = vand.u32 4294901760, %v51_v7 }
  0x10   :  { %276 = vmatpush.msrb.mxu2 %v11174_v12  ;;  %224 = vmatpush.msrb.mxu0 %v127_v27  ;;  %v325_v54 = vsub.f32 %v323_v49, %v324_v53  ;;  %v320_v55 = vand.u32 4294901760, %v319_v50  ;;  %v11303_v8 = vsub.f32 %v50_v60, %v11280_v1  ;;  %v65_v50 = vld [vmem:[%s13094_s0 + $0xb8] sm:$0xff]  ;;  %vm1263_vm1 = vcmask 64512  }
  0x11   :  { %136 = vmatpush.msra.mxu1 %v135_v47  ;;  %309 = vmatpush.msrb.mxu3 %v308_v48  ;;  %v11317_v14 = vsub.f32 %v63_v0, %v11293_v6  ;;  %v11328_v17 = vsub.f32 %v57_v2, %v11305_v9  ;;  %v58_v47 = vld [vmem:[%s13094_s0 + $0x80] sm:$0xff]  ;;  %v52_v48 = vld [vmem:[%s13094_s0 + $0x50] sm:$0xff]  ;;  %v53_v60 = vld [vmem:[%s13094_s0 + $0x58] sm:$0xff]  ;;  %vm1250_vm2 = vcmask 146432   ;;  %vm2157_vm3 = vcmask 154624  }
  0x12   :  { %278 = vmatpush.msrb.mxu2 %v11198_v22  ;;  %228 = vmatpush.msrb.mxu0 %v133_v28  ;;  %v326_v57 = vand.u32 4294901760, %v325_v54  ;;  %v503_v16 = vand.u32 4294901760, %v11303_v8  ;;  %v59_v54 = vld [vmem:[%s13094_s0 + $0x88] sm:$0xff]  ;;  %v11451_v2 = vand.u32 4294901760, %v53_v60  ;;  %vm3065_vm4 = vcmask 138240  }
  0x13   :  { %142 = vmatpush.msra.mxu1 %v141_v51  ;;  %315 = vmatpush.msrb.mxu3 %v314_v52  ;;  %v676_v21 = vand.u32 4294901760, %v11317_v14  ;;  %v682_v27 = vand.u32 4294901760, %v11328_v17  ;;  %v46_v52 = vld [vmem:[%s13094_s0 + $0x20] sm:$0xff]  ;;  %vm3979_vm5 = vcmask 7168   ;;  %vm5794_vm6 = vcmask 1039360  }
  0x14   :  { %280 = vmatpush.msrb.mxu2 %v11203_v24  ;;  %144 = vmatmul.f32.vlgmr.msra.gmra.mxu1 %v11187_v18  ;;  %vm6708_vm7 = vcmask 908288   ;;  %vm7622_vm8 = vcmask 900096   ;;  %vm8536_vm9 = vcmask 891904  }
  0x15   :  { %232 = vmatpush.msrb.mxu0 %v139_v30  ;;  %251 = vmatpush.msrb.mxu1 %v11157_v3  ;;  %v11289_v3 = vsub.f32 %v56_v59, %v11264_v61  ;;  %v677_v30 = vsub.f32 %v11317_v14, %v676_v21  ;;  %v683_v35 = vsub.f32 %v11328_v17, %v682_v27  ;;  %v11426_v59 = vand.u32 4294901760, %v59_v54 }
  0x16   :  { %282 = vmatpush.msrb.mxu2 %v11215_v32  ;;  %321 = vmatpush.msrb.mxu3 %v320_v55  ;;  %v11415_v55 = vand.u32 4294901760, %v65_v50 }
  0x17   :  { %234 = vmatmul.f32.vlgmr.msrb.gmra.mxu0 %v11187_v18  ;;  %288 = vmatmul.f32.vlgmr.msrb.gmra.mxu2 %v11237_v46  ;;  %v497_v13 = vand.u32 4294901760, %v11289_v3  ;;  %v678_v37 = vand.u32 4294901760, %v677_v30  ;;  %v684_v40 = vand.u32 4294901760, %v683_v35 }
  0x18   :  { %253 = vmatpush.msrb.mxu1 %v11159_v4  ;;  %327 = vmatpush.msrb.mxu3 %v326_v57  ;;  %v11291_v4 = vand.u32 4294901760, %v44_v63  ;;  %v11422_v57 = vand.u32 4294901760, %v46_v52 }
  0x19   :  { %347 = vmatpush.msra.mxu0 %v11201_v23  ;;  %405 = vmatpush.msra.mxu2 %v306_v29  ;;  %v498_v20 = vsub.f32 %v11289_v3, %v497_v13  ;;  %v11340_v23 = vsub.f32 %v51_v7, %v11319_v15 }
  0x1a   :  { %329 = vmatmul.f32.vlgmr.msrb.gmra.mxu3 %v11187_v18  ;;  %255 = vmatpush.msrb.mxu1 %v11161_v5  ;;  %v491_v5 = vand.u32 4294901760, %v11270_v62  ;;  %v11313_v11 = vsub.f32 %v44_v63, %v11291_v4  ;;  %v47_v63 = vld [vmem:[%s13094_s0 + $0x28] sm:$0xff]  ;;  %v11448_v0 = vsub.f32 %v46_v52, %v11422_v57 }
  0x1b   :  { %350 = vmatpush.msra.mxu0 %v11213_v31  ;;  %409 = vmatpush.msra.mxu2 %v312_v38  ;;  %v499_v29 = vand.u32 4294901760, %v498_v20 }
  0x1c   :  { %436 = vmatpush.msra.mxu3 %v11174_v12  ;;  %257 = vmatpush.msrb.mxu1 %v11172_v10  ;;  %v45_v10 = vld [vmem:[%s13094_s0 + $0x18] sm:$0xff] }
  0x1d   :  { %353 = vmatpush.msra.mxu0 %v11227_v39  ;;  %413 = vmatpush.msra.mxu2 %v318_v45  ;;  %v11330_v19 = vand.u32 4294901760, %v45_v10  ;;  %v11381_v45 = vand.u32 4294901760, %v64_v43 }
  0x1e   :  { %438 = vmatpush.msra.mxu3 %v11198_v22  ;;  %259 = vmatmul.f32.vlgmr.msrb.gmra.mxu1 %v11187_v18 }
  0x1f   :  { %356 = vmatpush.msra.mxu0 %v323_v49  ;;  %376 = vmatpush.msra.mxu1 %v11174_v12  ;;  %v492_v12 = vsub.f32 %v11270_v62, %v491_v5  ;;  %v11349_v28 = vsub.f32 %v45_v10, %v11330_v19  ;;  %v11393_v49 = vand.u32 4294901760, %v58_v47  ;;  %v11402_v51 = vsub.f32 %v64_v43, %v11381_v45 }
  0x20   :  { %417 = vmatpush.msra.mxu2 %v324_v53  ;;  %440 = vmatpush.msra.mxu3 %v11203_v24  ;;  %v11409_v53 = vand.u32 4294901760, %v52_v48  ;;  %v11474_v10 = vsub.f32 %v53_v60, %v11451_v2 }
  0x21   :  { %359 = vmatmul.f32.vlgmr.msra.gmra.mxu0 %v11207_v26  ;;  %419 = vmatmul.f32.vlgmr.msra.gmra.mxu2 %v11187_v18  ;;  %v493_v25 = vand.u32 4294901760, %v492_v12  ;;  %v694_v36 = vand.u32 4294901760, %v11349_v28  ;;  %v11420_v56 = vsub.f32 %v58_v47, %v11393_v49 }
  0x22   :  { %378 = vmatpush.msra.mxu1 %v11198_v22  ;;  %442 = vmatpush.msra.mxu3 %v11215_v32  ;;  %v509_v22 = vand.u32 4294901760, %v11313_v11 }
  0x23   :  { %461 = vmatpush.msrb.mxu0 %v11252_v58  ;;  %532 = vmatpush.msrb.mxu2 %v11270_v62  ;;  %v695_v41 = vsub.f32 %v11349_v28, %v694_v36  ;;  %v11439_v62 = vsub.f32 %v65_v50, %v11415_v55 }
  0x24   :  { %444 = vmatmul.f32.vlgmr.msra.gmra.mxu3 %v11187_v18  ;;  %380 = vmatpush.msra.mxu1 %v11203_v24  ;;  %v504_v24 = vsub.f32 %v11303_v8, %v503_v16  ;;  %v510_v31 = vsub.f32 %v11313_v11, %v509_v22 }
  0x25   :  { %463 = vmatpush.msrb.mxu0 %v11264_v61  ;;  %535 = vmatpush.msrb.mxu2 %v11289_v3  ;;  %v696_v44 = vand.u32 4294901760, %v695_v41  ;;  %v1046_v7 = vand.u32 4294901760, %v11439_v62 }
  0x26   :  { %561 = vmatpush.msrb.mxu3 %v11252_v58  ;;  %382 = vmatpush.msra.mxu1 %v11215_v32  ;;  %v688_v32 = vand.u32 4294901760, %v11340_v23  ;;  %v505_v33 = vand.u32 4294901760, %v504_v24  ;;  %v511_v38 = vand.u32 4294901760, %v510_v31 }
  0x27   :  { %465 = vmatpush.msrb.mxu0 %v11280_v1  ;;  %538 = vmatpush.msrb.mxu2 %v11303_v8  ;;  %v1047_v12 = vsub.f32 %v11439_v62, %v1046_v7 }
  0x28   :  { %563 = vmatpush.msrb.mxu3 %v11264_v61  ;;  %386 = vmatmul.f32.vlgmr.msra.gmra.mxu1 %v11219_v34  ;;  %v689_v39 = vsub.f32 %v11340_v23, %v688_v32 }
  0x29   :  { %467 = vmatpush.msrb.mxu0 %v11291_v4  ;;  %494 = vmatpush.msrb.mxu1 %v493_v25 }
  0x2a   :  { %541 = vmatpush.msrb.mxu2 %v11313_v11  ;;  %565 = vmatpush.msrb.mxu3 %v11280_v1  ;;  %v690_v42 = vand.u32 4294901760, %v689_v39 }
  0x2b   :  { %473 = vmatmul.f32.vlgmr.msrb.gmra.mxu0 %v11237_v46  ;;  %544 = vmatmul.f32.vlgmr.msrb.gmra.mxu2 %v11207_v26 }
  0x2c   :  { %500 = vmatpush.msrb.mxu1 %v499_v29  ;;  %567 = vmatpush.msrb.mxu3 %v11291_v4 }
  0x2d   :  { %590 = vmatpush.msra.mxu0 %v491_v5  ;;  %646 = vmatpush.msra.mxu2 %v11293_v6  ;;  %v11464_v5 = vand.u32 4294901760, %v47_v63 }
  0x2e   :  { %571 = vmatmul.f32.vlgmr.msrb.gmra.mxu3 %v11219_v34  ;;  %506 = vmatpush.msrb.mxu1 %v505_v33 }
  0x2f   :  { %594 = vmatpush.msra.mxu0 %v497_v13  ;;  %648 = vmatpush.msra.mxu2 %v11305_v9 }
  0x30   :  { %679 = vmatpush.msra.mxu3 %v678_v37  ;;  %512 = vmatpush.msrb.mxu1 %v511_v38 }
  0x31   :  { %598 = vmatpush.msra.mxu0 %v503_v16  ;;  %650 = vmatpush.msra.mxu2 %v11319_v15 }
  0x32   :  { %685 = vmatpush.msra.mxu3 %v684_v40  ;;  %514 = vmatmul.f32.vlgmr.msrb.gmra.mxu1 %v11187_v18 }
  0x33   :  { %602 = vmatpush.msra.mxu0 %v509_v22  ;;  %621 = vmatpush.msra.mxu1 %v11252_v58  ;;  %v861_v58 = vand.u32 4294901760, %v11402_v51 }
  0x34   :  { %652 = vmatpush.msra.mxu2 %v11330_v19  ;;  %691 = vmatpush.msra.mxu3 %v690_v42 }
  0x35   :  { %604 = vmatmul.f32.vlgmr.msra.gmra.mxu0 %v11187_v18  ;;  %658 = vmatmul.f32.vlgmr.msra.gmra.mxu2 %v11237_v46  ;;  %v862_v3 = vsub.f32 %v11402_v51, %v861_v58 }
  0x36   :  { %623 = vmatpush.msra.mxu1 %v11264_v61  ;;  %697 = vmatpush.msra.mxu3 %v696_v44  ;;  %v11434_v61 = vsub.f32 %v52_v48, %v11409_v53 }
  0x37   :  { %717 = vmatpush.msrb.mxu0 %v11317_v14  ;;  %775 = vmatpush.msrb.mxu2 %v676_v21  ;;  %v863_v11 = vand.u32 4294901760, %v862_v3 }
  0x38   :  { %699 = vmatmul.f32.vlgmr.msra.gmra.mxu3 %v11187_v18  ;;  %625 = vmatpush.msra.mxu1 %v11280_v1  ;;  %v867_v1 = vand.u32 4294901760, %v11420_v56 }
  0x39   :  { %720 = vmatpush.msrb.mxu0 %v11328_v17  ;;  %779 = vmatpush.msrb.mxu2 %v682_v27 }
  0x3a   :  { %806 = vmatpush.msrb.mxu3 %v11293_v6  ;;  %627 = vmatpush.msra.mxu1 %v11291_v4  ;;  %v11459_v4 = vsub.f32 %v59_v54, %v11426_v59  ;;  %v868_v8 = vsub.f32 %v11420_v56, %v867_v1 }
  0x3b   :  { %723 = vmatpush.msrb.mxu0 %v11340_v23  ;;  %783 = vmatpush.msrb.mxu2 %v688_v32  ;;  %v1048_v23 = vand.u32 4294901760, %v1047_v12 }
  0x3c   :  { %808 = vmatpush.msrb.mxu3 %v11305_v9  ;;  %629 = vmatmul.f32.vlgmr.msra.gmra.mxu1 %v11187_v18  ;;  %v1052_v13 = vand.u32 4294901760, %v11459_v4  ;;  %v869_v16 = vand.u32 4294901760, %v868_v8 }
  0x3d   :  { %726 = vmatpush.msrb.mxu0 %v11349_v28  ;;  %746 = vmatpush.msrb.mxu1 %v11293_v6  ;;  %v873_v6 = vand.u32 4294901760, %v11434_v61 }
  0x3e   :  { %787 = vmatpush.msrb.mxu2 %v694_v36  ;;  %810 = vmatpush.msrb.mxu3 %v11319_v15  ;;  %v1053_v20 = vsub.f32 %v11459_v4, %v1052_v13 }
  0x3f   :  { %729 = vmatmul.f32.vlgmr.msrb.gmra.mxu0 %v11207_v26  ;;  %789 = vmatmul.f32.vlgmr.msrb.gmra.mxu2 %v11187_v18  ;;  %v874_v14 = vsub.f32 %v11434_v61, %v873_v6 }
  0x40   :  { %748 = vmatpush.msrb.mxu1 %v11305_v9  ;;  %812 = vmatpush.msrb.mxu3 %v11330_v19  ;;  %v879_v9 = vand.u32 4294901760, %v11448_v0  ;;  %v1054_v27 = vand.u32 4294901760, %v1053_v20 }
  0x41   :  { %831 = vmatpush.msra.mxu0 %v11381_v45  ;;  %902 = vmatpush.msra.mxu2 %v11402_v51  ;;  %v875_v21 = vand.u32 4294901760, %v874_v14 }
  0x42   :  { %814 = vmatmul.f32.vlgmr.msrb.gmra.mxu3 %v11187_v18  ;;  %750 = vmatpush.msrb.mxu1 %v11319_v15  ;;  %v11483_v15 = vsub.f32 %v47_v63, %v11464_v5  ;;  %v880_v17 = vsub.f32 %v11448_v0, %v879_v9 }
  0x43   :  { %833 = vmatpush.msra.mxu0 %v11393_v49  ;;  %905 = vmatpush.msra.mxu2 %v11420_v56 }
  0x44   :  { %931 = vmatpush.msra.mxu3 %v11381_v45  ;;  %752 = vmatpush.msrb.mxu1 %v11330_v19  ;;  %v1058_v19 = vand.u32 4294901760, %v11474_v10  ;;  %v1064_v22 = vand.u32 4294901760, %v11483_v15  ;;  %v881_v25 = vand.u32 4294901760, %v880_v17 }
  0x45   :  { %835 = vmatpush.msra.mxu0 %v11409_v53  ;;  %908 = vmatpush.msra.mxu2 %v11434_v61 }
  0x46   :  { %933 = vmatpush.msra.mxu3 %v11393_v49  ;;  %756 = vmatmul.f32.vlgmr.msrb.gmra.mxu1 %v11219_v34  ;;  %v1059_v24 = vsub.f32 %v11474_v10, %v1058_v19  ;;  %v1065_v28 = vsub.f32 %v11483_v15, %v1064_v22 }
  0x47   :  { %837 = vmatpush.msra.mxu0 %v11422_v57  ;;  %864 = vmatpush.msra.mxu1 %v863_v11 }
  0x48   :  { %911 = vmatpush.msra.mxu2 %v11448_v0  ;;  %935 = vmatpush.msra.mxu3 %v11409_v53  ;;  %v1060_v29 = vand.u32 4294901760, %v1059_v24  ;;  %v1066_v30 = vand.u32 4294901760, %v1065_v28 }
  0x49   :  { %843 = vmatmul.f32.vlgmr.msra.gmra.mxu0 %v11237_v46  ;;  %914 = vmatmul.f32.vlgmr.msra.gmra.mxu2 %v11207_v26 }
  0x4a   :  { %870 = vmatpush.msra.mxu1 %v869_v16  ;;  %937 = vmatpush.msra.mxu3 %v11422_v57 }
  0x4b   :  { %1016 = vmatpush.msrb.mxu2 %v11415_v55  ;;  %941 = vmatmul.f32.vlgmr.msra.gmra.mxu3 %v11219_v34 }
  0x4c   :  { %876 = vmatpush.msra.mxu1 %v875_v21  ;;  %960 = vmatpush.msrb.mxu0 %v861_v58 }
  0x4d   :  { %1018 = vmatpush.msrb.mxu2 %v11426_v59  ;;  %1049 = vmatpush.msrb.mxu3 %v1048_v23 }
  0x4e   :  { %882 = vmatpush.msra.mxu1 %v881_v25  ;;  %964 = vmatpush.msrb.mxu0 %v867_v1 }
  0x4f   :  { %1020 = vmatpush.msrb.mxu2 %v11451_v2  ;;  %1055 = vmatpush.msrb.mxu3 %v1054_v27 }
  0x50   :  { %884 = vmatmul.f32.vlgmr.msra.gmra.mxu1 %v11187_v18  ;;  %968 = vmatpush.msrb.mxu0 %v873_v6 }
  0x51   :  { %991 = vmatpush.msrb.mxu1 %v11381_v45  ;;  %1022 = vmatpush.msrb.mxu2 %v11464_v5 }
  0x52   :  { %1061 = vmatpush.msrb.mxu3 %v1060_v29  ;;  %1028 = vmatmul.f32.vlgmr.msrb.gmra.mxu2 %v11237_v46  ;;  %v11091_v46 = vmov 0.0  }
  0x53   :  { %972 = vmatpush.msrb.mxu0 %v879_v9  ;;  %993 = vmatpush.msrb.mxu1 %v11393_v49 }
  0x54   :  { %1067 = vmatpush.msrb.mxu3 %v1066_v30  ;;  %974 = vmatmul.f32.vlgmr.msrb.gmra.mxu0 %v11187_v18 }
  0x55   :  { %1069 = vmatmul.f32.vlgmr.msrb.gmra.mxu3 %v11187_v18  ;;  %995 = vmatpush.msrb.mxu1 %v11409_v53 }
  0x56   :  { %1087 = vmatpush.msra.mxu0 %v11439_v62  ;;  %1145 = vmatpush.msra.mxu2 %v1046_v7 }
  0x57   :  { %997 = vmatpush.msrb.mxu1 %v11422_v57  ;;  %1176 = vmatpush.msra.mxu3 %v11415_v55 }
  0x58   :  { %1090 = vmatpush.msra.mxu0 %v11459_v4  ;;  %1149 = vmatpush.msra.mxu2 %v1052_v13 }
  0x59   :  { %999 = vmatmul.f32.vlgmr.msrb.gmra.mxu1 %v11187_v18  ;;  %1178 = vmatpush.msra.mxu3 %v11426_v59 }
  0x5a   :  { %1093 = vmatpush.msra.mxu0 %v11474_v10  ;;  %1116 = vmatpush.msra.mxu1 %v11415_v55 }
  0x5b   :  { %1153 = vmatpush.msra.mxu2 %v1058_v19  ;;  %1180 = vmatpush.msra.mxu3 %v11451_v2 }
  0x5c   :  { %1096 = vmatpush.msra.mxu0 %v11483_v15  ;;  %1118 = vmatpush.msra.mxu1 %v11426_v59 }
  0x5d   :  { %1157 = vmatpush.msra.mxu2 %v1064_v22  ;;  %1099 = vmatmul.f32.vlgmr.msra.gmra.mxu0 %v11207_v26 }
  0x5e   :  { %1159 = vmatmul.f32.vlgmr.msra.gmra.mxu2 %v11187_v18  ;;  %1120 = vmatpush.msra.mxu1 %v11451_v2 }
  0x5f   :  { %1182 = vmatpush.msra.mxu3 %v11464_v5  ;;  %1236 = vrot.lane.b32.xlu0 %v11091_v46, %s11092_s9 }
  0x60   :  { %1184 = vmatmul.f32.vlgmr.msra.gmra.mxu3 %v11187_v18  ;;  %1122 = vmatpush.msra.mxu1 %v11464_v5 }
  0x61   :  { %1126 = vmatmul.f32.vlgmr.msra.gmra.mxu1 %v11219_v34  ;;  %v11542_v34 = vld [vmem:[%s13095_s1] sm:$0x3f]  ;;  %s11093_s1 = smov 19  }
  0x62   :  { %v1195_v44 = vperm.slane %v11542_v34, 0  ;;  %v1196_v59 = vperm.slane %v11542_v34, 1  ;;  %v1197_v11 = vperm.slane %v11542_v34, 2  ;;  %v1198_v27 = vperm.slane %v11542_v34, 3 }
  0x77   :  { %v11536_v31 = vpop.permute.xlu0 %71 }
  0x8c   :  { %v104_v26 = vpop.f32.mrf.mxu0 }
  0x8d   :  { %v105_v32 = vadd.f32 %v104_v26, %v11536_v31 }
  0x91   :  { %v145_v33 = vpop.f32.mrf.mxu1  ;;  %v175_v35 = vpop.f32.mrf.mxu2 }
  0x92   :  { %v146_v36 = vadd.f32 %v145_v33, %v105_v32  ;;  %v202_v37 = vpop.f32.mrf.mxu3 }
  0x94   :  { %v176_v38 = vadd.f32 %v175_v35, %v146_v36  ;;  %v235_v39 = vpop.f32.mrf.mxu0 }
  0x96   :  { %v203_v18 = vadd.f32 %v202_v37, %v176_v38 }
  0x98   :  { %v236_v40 = vadd.f32 %v235_v39, %v203_v18 }
  0x9a   :  { %v289_v41 = vpop.f32.mrf.mxu2 }
  0x9b   :  { %v260_v42 = vpop.f32.mrf.mxu1  ;;  %v290_v45 = vadd.f32 %v289_v41, %v11536_v31 }
  0x9c   :  { %v261_v43 = vadd.f32 %v260_v42, %v236_v40 }
  0x9d   :  { %v330_v47 = vpop.f32.mrf.mxu3 }
  0x9e   :  { %v1188_v48 = vmax.f32 %v261_v43, 0.0  ;;  %v331_v50 = vadd.f32 %v330_v47, %v290_v45  ;;  %v360_v51 = vpop.f32.mrf.mxu0 }
  0xa0   :  { %v11546_v49 = vmul.f32 %v1195_v44, %v1188_v48  ;;  %v361_v52 = vadd.f32 %v360_v51, %v331_v50  ;;  %v1199_v44 = vperm.slane %v11542_v34, 4 }
  0xa2   :  { %1238 = vrot.lane.b32.xlu1 %v11546_v49, %s11092_s9 }
  0xa4   :  { %v420_v53 = vpop.f32.mrf.mxu2 }
  0xa5   :  { %v387_v54 = vpop.f32.mrf.mxu1 }
  0xa6   :  { %v388_v55 = vadd.f32 %v387_v54, %v361_v52 }
  0xa7   :  { %v445_v56 = vpop.f32.mrf.mxu3 }
  0xa8   :  { %v421_v57 = vadd.f32 %v420_v53, %v388_v55  ;;  %v474_v60 = vpop.f32.mrf.mxu0 }
  0xa9   :  { %v475_v63 = vadd.f32 %v474_v60, %v11536_v31 }
  0xaa   :  { %v446_v58 = vadd.f32 %v445_v56, %v421_v57 }
  0xac   :  { %v1189_v61 = vmax.f32 %v446_v58, 0.0  ;;  %v1200_v58 = vperm.slane %v11542_v34, 5  ;;  %v11016_v34 = vld [vmem:[%s13098_s4 + $0x8] sm:$0xff] }
  0xae   :  { %v11551_v62 = vmul.f32 %v1196_v59, %v1189_v61  ;;  %v545_v0 = vpop.f32.mrf.mxu2  ;;  %v1265_v61 = vsel %vm1263_vm1, %v11016_v34, 0 }
  0xaf   :  { %v515_v1 = vpop.f32.mrf.mxu1 }
  0xb0   :  { %v516_v2 = vadd.f32 %v515_v1, %v475_v63  ;;  %1240 = vrot.lane.b32.xlu1 %v11551_v62, %s11092_s9  ;;  %v11605_v63 = vand.u32 4294901760, %v1265_v61 }
  0xb1   :  { %v572_v3 = vpop.f32.mrf.mxu3 }
  0xb2   :  { %v546_v4 = vadd.f32 %v545_v0, %v516_v2  ;;  %v605_v5 = vpop.f32.mrf.mxu0  ;;  %v11608_v0 = vsub.f32 %v1265_v61, %v11605_v63 }
  0xb4   :  { %v573_v6 = vadd.f32 %v572_v3, %v546_v4  ;;  %v11616_v1 = vand.u32 4294901760, %v11608_v0 }
  0xb6   :  { %v606_v7 = vadd.f32 %v605_v5, %v573_v6  ;;  %v1287_v2 = vsub.f32 %v11608_v0, %v11616_v1 }
  0xb8   :  { %v659_v8 = vpop.f32.mrf.mxu2  ;;  %v11627_v5 = vand.u32 4294901760, %v1287_v2 }
  0xb9   :  { %v630_v9 = vpop.f32.mrf.mxu1  ;;  %v660_v13 = vadd.f32 %v659_v8, %v11536_v31 }
  0xba   :  { %v631_v10 = vadd.f32 %v630_v9, %v606_v7 }
  0xbb   :  { %v700_v14 = vpop.f32.mrf.mxu3 }
  0xbc   :  { %v1190_v15 = vmax.f32 %v631_v10, 0.0  ;;  %v701_v16 = vadd.f32 %v700_v14, %v660_v13  ;;  %v730_v17 = vpop.f32.mrf.mxu0 }
  0xbe   :  { %v11558_v12 = vmul.f32 %v1197_v11, %v1190_v15  ;;  %v731_v19 = vadd.f32 %v730_v17, %v701_v16 }
  0xc0   :  { %1242 = vrot.lane.b32.xlu2 %v11558_v12, %s11092_s9 }
  0xc2   :  { %v790_v20 = vpop.f32.mrf.mxu2 }
  0xc3   :  { %v757_v21 = vpop.f32.mrf.mxu1 }
  0xc4   :  { %v758_v22 = vadd.f32 %v757_v21, %v731_v19 }
  0xc5   :  { %v815_v23 = vpop.f32.mrf.mxu3 }
  0xc6   :  { %v791_v25 = vadd.f32 %v790_v20, %v758_v22  ;;  %v844_v28 = vpop.f32.mrf.mxu0 }
  0xc7   :  { %v845_v26 = vadd.f32 %v844_v28, %v11536_v31 }
  0xc8   :  { %v816_v24 = vadd.f32 %v815_v23, %v791_v25 }
  0xca   :  { %v1191_v29 = vmax.f32 %v816_v24, 0.0 }
  0xcc   :  { %v11563_v30 = vmul.f32 %v1198_v27, %v1191_v29  ;;  %v915_v32 = vpop.f32.mrf.mxu2 }
  0xcd   :  { %v885_v33 = vpop.f32.mrf.mxu1 }
  0xce   :  { %v886_v35 = vadd.f32 %v885_v33, %v845_v26  ;;  %v942_v36 = vpop.f32.mrf.mxu3  ;;  %1244 = vrot.lane.b32.xlu2 %v11563_v30, %s11092_s9 }
  0xd0   :  { %v916_v37 = vadd.f32 %v915_v32, %v886_v35 }
  0xd1   :  { %v975_v38 = vpop.f32.mrf.mxu0  ;;  %v1237_v3 = vpop.permute.xlu0 %1236 }
  0xd2   :  { %v943_v18 = vadd.f32 %v942_v36, %v916_v37 }
  0xd4   :  { %v976_v39 = vadd.f32 %v975_v38, %v943_v18 }
  0xd5   :  { %v1029_v40 = vpop.f32.mrf.mxu2 }
  0xd6   :  { %v1000_v41 = vpop.f32.mrf.mxu1  ;;  %v1030_v42 = vadd.f32 %v1029_v40, %v11536_v31  ;;  %2143 = vrot.lane.b32.xlu2 %v11091_v46, %s11093_s1 }
  0xd7   :  { %v1001_v43 = vadd.f32 %v1000_v41, %v976_v39  ;;  %v1226_v41 = vld [vmem:[%s13098_s4] sm:$0xff] }
  0xd8   :  { %v1070_v45 = vpop.f32.mrf.mxu3 }
  0xd9   :  { %v1192_v47 = vmax.f32 %v1001_v43, 0.0  ;;  %v1071_v48 = vadd.f32 %v1070_v45, %v1030_v42  ;;  %v2171_v43 = vsel %vm1263_vm1, %v1226_v41, 0 }
  0xda   :  { %v1100_v50 = vpop.f32.mrf.mxu0 }
  0xdb   :  { %v11572_v51 = vmul.f32 %v1199_v44, %v1192_v47  ;;  %v1101_v52 = vadd.f32 %v1100_v50, %v1071_v48 }
  0xdd   :  { %1246 = vrot.lane.b32.xlu0 %v11572_v51, %s11092_s9 }
  0xde   :  { %v1127_v53 = vpop.f32.mrf.mxu1  ;;  %2149 = vrot.lane.b32.xlu2 %v11558_v12, %s11093_s1 }
  0xdf   :  { %v1128_v31 = vadd.f32 %v1127_v53, %v1101_v52  ;;  %v11717_v53 = vand.u32 4294901760, %v2171_v43 }
  0xe1   :  { %v1160_v54 = vpop.f32.mrf.mxu2 }
  0xe2   :  { %v1161_v55 = vadd.f32 %v1160_v54, %v1128_v31 }
  0xe3   :  { %v1185_v56 = vpop.f32.mrf.mxu3 }
  0xe4   :  { %v1186_v57 = vadd.f32 %v1185_v56, %v1161_v55 }
  0xe5   :  { %2145 = vrot.lane.b32.xlu0 %v11546_v49, %s11093_s1 }
  0xe6   :  { %v1193_v59 = vmax.f32 %v1186_v57, 0.0  ;;  %v11729_v57 = vsub.f32 %v2171_v43, %v11717_v53 }
  0xe8   :  { %v11581_v60 = vmul.f32 %v1200_v58, %v1193_v59  ;;  %v11733_v61 = vand.u32 4294901760, %v11729_v57 }
  0xea   :  { %2155 = vrot.lane.b32.xlu2 %v11581_v60, %s11093_s1  ;;  %1248 = vrot.lane.b32.xlu1 %v11581_v60, %s11092_s9 }
  0xed   :  { %2151 = vrot.lane.b32.xlu0 %v11563_v30, %s11093_s1 }
  0xf2   :  { %3055 = vrot.lane.b32.xlu2 %v11551_v62, %s11094_s12  ;;  %2147 = vrot.lane.b32.xlu1 %v11551_v62, %s11093_s1 }
  0xf5   :  { %3051 = vrot.lane.b32.xlu0 %v11091_v46, %s11094_s12 }
  0xfa   :  { %3061 = vrot.lane.b32.xlu2 %v11572_v51, %s11094_s12  ;;  %2153 = vrot.lane.b32.xlu1 %v11572_v51, %s11093_s1 }
  0xfd   :  { %3057 = vrot.lane.b32.xlu0 %v11558_v12, %s11094_s12 }
 0x102   :  { %3967 = vrot.lane.b32.xlu2 %v11546_v49, %s11095_s15  ;;  %3053 = vrot.lane.b32.xlu1 %v11546_v49, %s11094_s12 }
 0x105   :  { %3063 = vrot.lane.b32.xlu0 %v11581_v60, %s11094_s12 }
 0x10a   :  { %3973 = vrot.lane.b32.xlu2 %v11563_v30, %s11095_s15  ;;  %3059 = vrot.lane.b32.xlu1 %v11563_v30, %s11094_s12 }
 0x10d   :  { %3969 = vrot.lane.b32.xlu0 %v11551_v62, %s11095_s15 }
 0x112   :  { %5780 = vrot.lane.b32.xlu2 %v11546_v49, %s11096_s16  ;;  %3965 = vrot.lane.b32.xlu1 %v11091_v46, %s11095_s15 }
 0x114   :  { %v1239_v4 = vpop.permute.xlu1 %1238 }
 0x115   :  { %3975 = vrot.lane.b32.xlu0 %v11572_v51, %s11095_s15  ;;  %v1251_v6 = vsel %vm1250_vm2, %v1237_v3, %v1239_v4 }
 0x116   :  { %v1282_v7 = vand.u32 4294901760, %v1251_v6 }
 0x118   :  { %v1309_v8 = vsub.f32 %v1251_v6, %v1282_v7  ;;  %1283 = vmatpush.msrb.mxu0 %v1282_v7  ;;  %1359 = vmatpush.msrb.mxu3 %v1282_v7  ;;  %v9434_v6 = vld [vmem:[%s13099_s5] sm:$0xff] }
 0x119   :  { %1289 = vmatmul.f32.vlgmr.msrb.gmra.mxu0 %v11627_v5  ;;  %1363 = vmatmul.f32.vlgmr.msrb.gmra.mxu3 %v11616_v1 }
 0x11a   :  { %5786 = vrot.lane.b32.xlu2 %v11563_v30, %s11096_s16  ;;  %3971 = vrot.lane.b32.xlu1 %v11558_v12, %s11095_s15  ;;  %v1310_v9 = vand.u32 4294901760, %v1309_v8  ;;  %v1243_v13 = vpop.permute.xlu2 %1242 }
 0x11b   :  { %1336 = vmatpush.msrb.mxu2 %v1309_v8 }
 0x11c   :  { %v1311_v10 = vsub.f32 %v1309_v8, %v1310_v9  ;;  %1385 = vmatpush.msra.mxu0 %v1310_v9  ;;  %1339 = vmatmul.f32.vlgmr.msrb.gmra.mxu2 %v11608_v0 }
 0x11d   :  { %5782 = vrot.lane.b32.xlu0 %v11551_v62, %s11096_s16 }
 0x11e   :  { %v1312_v11 = vand.u32 4294901760, %v1311_v10 }
 0x120   :  { %1313 = vmatpush.msrb.mxu1 %v1312_v11 }
 0x121   :  { %1315 = vmatmul.f32.vlgmr.msrb.gmra.mxu1 %v11605_v63  ;;  %1387 = vmatmul.f32.vlgmr.msra.gmra.mxu0 %v11605_v63 }
 0x122   :  { %5792 = vrot.lane.b32.xlu2 %v11091_v46, %s11096_s16  ;;  %3977 = vrot.lane.b32.xlu1 %v11581_v60, %s11095_s15  ;;  %v1241_v14 = vpop.permute.xlu1 %1240  ;;  %s11100_s15 = smov [#allocation3]  }
 0x123   :  { %v1252_v15 = vsel %vm1250_vm2, %v1239_v4, %v1241_v14  ;;  %v1253_v16 = vsel %vm1250_vm2, %v1241_v14, %v1243_v13  ;;  %1407 = vmatpush.msra.mxu1 %v1282_v7  ;;  %v2193_v7 = vsub.f32 %v11729_v57, %v11733_v61 }
 0x124   :  { %v1428_v17 = vand.u32 4294901760, %v1252_v15  ;;  %v1574_v19 = vand.u32 4294901760, %v1253_v16 }
 0x125   :  { %5788 = vrot.lane.b32.xlu0 %v11572_v51, %s11096_s16  ;;  %v11748_v14 = vand.u32 4294901760, %v2193_v7 }
 0x126   :  { %v1455_v20 = vsub.f32 %v1252_v15, %v1428_v17  ;;  %v1601_v21 = vsub.f32 %v1253_v16, %v1574_v19  ;;  %1429 = vmatpush.msra.mxu2 %v1428_v17  ;;  %1505 = vmatpush.msrb.mxu1 %v1428_v17 }
 0x127   :  { %1435 = vmatmul.f32.vlgmr.msra.gmra.mxu2 %v11627_v5 }
 0x128   :  { %v11649_v22 = vpop.permute.xlu2 %1244  ;;  %v1456_v23 = vand.u32 4294901760, %v1455_v20  ;;  %v1602_v25 = vand.u32 4294901760, %v1601_v21  ;;  %1482 = vmatpush.msrb.mxu0 %v1455_v20 }
 0x129   :  { %v1254_v24 = vsel %vm1250_vm2, %v1243_v13, %v11649_v22  ;;  %1409 = vmatmul.f32.vlgmr.msra.gmra.mxu1 %v11605_v63  ;;  %1485 = vmatmul.f32.vlgmr.msrb.gmra.mxu0 %v11608_v0 }
 0x12a   :  { %1575 = vmatpush.msra.mxu0 %v1574_v19  ;;  %6698 = vrot.lane.b32.xlu2 %v11558_v12, %s11097_s17  ;;  %v1720_v27 = vand.u32 4294901760, %v1254_v24  ;;  %v1457_v28 = vsub.f32 %v1455_v20, %v1456_v23  ;;  %v1603_v29 = vsub.f32 %v1601_v21, %v1602_v25 }
 0x12b   :  { %5784 = vrot.lane.b32.xlu1 %v11558_v12, %s11096_s16  ;;  %1531 = vmatpush.msrb.mxu2 %v1456_v23 }
 0x12c   :  { %v1747_v26 = vsub.f32 %v1254_v24, %v1720_v27  ;;  %1677 = vmatpush.msrb.mxu0 %v1602_v25  ;;  %v1458_v32 = vand.u32 4294901760, %v1457_v28  ;;  %v1604_v33 = vand.u32 4294901760, %v1603_v29 }
 0x12d   :  { %1628 = vmatpush.msra.mxu2 %v1601_v21  ;;  %6694 = vrot.lane.b32.xlu0 %v11546_v49, %s11097_s17 }
 0x12e   :  { %v1748_v35 = vand.u32 4294901760, %v1747_v26  ;;  %1459 = vmatpush.msra.mxu3 %v1458_v32  ;;  %1605 = vmatpush.msra.mxu1 %v1604_v33 }
 0x12f   :  { %1461 = vmatmul.f32.vlgmr.msra.gmra.mxu3 %v11605_v63  ;;  %1533 = vmatmul.f32.vlgmr.msrb.gmra.mxu2 %v11605_v63 }
 0x130   :  { %1553 = vmatpush.msrb.mxu3 %v1428_v17  ;;  %1721 = vmatpush.msrb.mxu2 %v1720_v27  ;;  %v1749_v36 = vsub.f32 %v1747_v26, %v1748_v35  ;;  %v2144_v44 = vpop.permute.xlu2 %2143  ;;  %v9458_v17 = vld [vmem:[%s13101_s7 + $0x10] sm:$0xff] }
 0x131   :  { %1509 = vmatmul.f32.vlgmr.msrb.gmra.mxu1 %v11616_v1  ;;  %1581 = vmatmul.f32.vlgmr.msra.gmra.mxu0 %v11627_v5 }
 0x132   :  { %1651 = vmatpush.msra.mxu3 %v1574_v19  ;;  %6704 = vrot.lane.b32.xlu2 %v11581_v60, %s11097_s17  ;;  %v1750_v37 = vand.u32 4294901760, %v1749_v36 }
 0x133   :  { %5790 = vrot.lane.b32.xlu1 %v11581_v60, %s11096_s16  ;;  %1699 = vmatpush.msrb.mxu1 %v1574_v19  ;;  %s11002_s16 = sshll.u32 %s11100_s15, 4  ;;  %s11003_s16 = int_to_ptr.vmem [resolvable:$true] %s11002_s16 }
 0x134   :  { %1774 = vmatpush.msra.mxu0 %v1747_v26 }
 0x135   :  { %6700 = vrot.lane.b32.xlu0 %v11563_v30, %s11097_s17 }
 0x137   :  { %1555 = vmatmul.f32.vlgmr.msrb.gmra.mxu3 %v11605_v63  ;;  %1631 = vmatmul.f32.vlgmr.msra.gmra.mxu2 %v11608_v0 }
 0x138   :  { %1751 = vmatpush.msrb.mxu3 %v1750_v37  ;;  %1823 = vmatpush.msra.mxu2 %v1748_v35  ;;  %v2150_v10 = vpop.permute.xlu2 %2149 }
 0x139   :  { %1607 = vmatmul.f32.vlgmr.msra.gmra.mxu1 %v11605_v63  ;;  %1679 = vmatmul.f32.vlgmr.msrb.gmra.mxu0 %v11605_v63 }
 0x13a   :  { %7610 = vrot.lane.b32.xlu2 %v11551_v62, %s11098_s18  ;;  %1797 = vmatpush.msra.mxu1 %v1720_v27 }
 0x13b   :  { %6696 = vrot.lane.b32.xlu1 %v11551_v62, %s11097_s17 }
 0x13d   :  { %6706 = vrot.lane.b32.xlu0 %v11091_v46, %s11097_s17 }
 0x13f   :  { %1655 = vmatmul.f32.vlgmr.msra.gmra.mxu3 %v11616_v1  ;;  %1727 = vmatmul.f32.vlgmr.msrb.gmra.mxu2 %v11627_v5 }
 0x140   :  { %1845 = vmatpush.msra.mxu3 %v1720_v27 }
 0x141   :  { %1701 = vmatmul.f32.vlgmr.msrb.gmra.mxu1 %v11605_v63  ;;  %1777 = vmatmul.f32.vlgmr.msra.gmra.mxu0 %v11608_v0 }
 0x142   :  { %7616 = vrot.lane.b32.xlu2 %v11572_v51, %s11098_s18 }
 0x143   :  { %6702 = vrot.lane.b32.xlu1 %v11572_v51, %s11097_s17 }
 0x144   :  { %v2156_v37 = vpop.permute.xlu2 %2155 }
 0x145   :  { %7612 = vrot.lane.b32.xlu0 %v11558_v12, %s11098_s18 }
 0x147   :  { %1753 = vmatmul.f32.vlgmr.msrb.gmra.mxu3 %v11605_v63  ;;  %1825 = vmatmul.f32.vlgmr.msra.gmra.mxu2 %v11605_v63 }
 0x149   :  { %1801 = vmatmul.f32.vlgmr.msra.gmra.mxu1 %v11616_v1 }
 0x14a   :  { %8522 = vrot.lane.b32.xlu2 %v11546_v49, %s11099_s19 }
 0x14b   :  { %7608 = vrot.lane.b32.xlu1 %v11546_v49, %s11098_s18 }
 0x14d   :  { %7618 = vrot.lane.b32.xlu0 %v11581_v60, %s11098_s18 }
 0x14f   :  { %v1247_v38 = vpop.permute.xlu0 %1246  ;;  %1847 = vmatmul.f32.vlgmr.msra.gmra.mxu3 %v11605_v63 }
 0x150   :  { %v1255_v18 = vsel %vm1250_vm2, %v11649_v22, %v1247_v38 }
 0x151   :  { %v1866_v39 = vand.u32 4294901760, %v1255_v18 }
 0x152   :  { %8528 = vrot.lane.b32.xlu2 %v11563_v30, %s11099_s19 }
 0x153   :  { %7614 = vrot.lane.b32.xlu1 %v11563_v30, %s11098_s18  ;;  %v1893_v40 = vsub.f32 %v1255_v18, %v1866_v39  ;;  %1867 = vmatpush.msrb.mxu0 %v1866_v39 }
 0x154   :  { %1943 = vmatpush.msrb.mxu3 %v1866_v39  ;;  %1873 = vmatmul.f32.vlgmr.msrb.gmra.mxu0 %v11627_v5 }
 0x155   :  { %v1894_v42 = vand.u32 4294901760, %v1893_v40  ;;  %8524 = vrot.lane.b32.xlu0 %v11551_v62, %s11099_s19  ;;  %1920 = vmatpush.msrb.mxu2 %v1893_v40 }
 0x156   :  { %1923 = vmatmul.f32.vlgmr.msrb.gmra.mxu2 %v11608_v0 }
 0x157   :  { %v1895_v45 = vsub.f32 %v1893_v40, %v1894_v42  ;;  %v2146_v47 = vpop.permute.xlu0 %2145  ;;  %1969 = vmatpush.msra.mxu0 %v1894_v42  ;;  %1947 = vmatmul.f32.vlgmr.msrb.gmra.mxu3 %v11616_v1 }
 0x158   :  { %v2158_v48 = vsel %vm2157_vm3, %v2144_v44, %v2146_v47 }
 0x159   :  { %v2188_v50 = vand.u32 4294901760, %v2158_v48  ;;  %v1896_v52 = vand.u32 4294901760, %v1895_v45 }
 0x15a   :  { %8534 = vrot.lane.b32.xlu2 %v11091_v46, %s11099_s19 }
 0x15b   :  { %7620 = vrot.lane.b32.xlu1 %v11091_v46, %s11098_s18  ;;  %v2215_v31 = vsub.f32 %v2158_v48, %v2188_v50  ;;  %1897 = vmatpush.msrb.mxu1 %v1896_v52 }
 0x15c   :  { %v1249_v54 = vpop.permute.xlu1 %1248  ;;  %1899 = vmatmul.f32.vlgmr.msrb.gmra.mxu1 %v11605_v63  ;;  %1971 = vmatmul.f32.vlgmr.msra.gmra.mxu0 %v11605_v63 }
 0x15d   :  { %v2216_v55 = vand.u32 4294901760, %v2215_v31  ;;  %v1256_v56 = vsel %vm1250_vm2, %v1247_v38, %v1249_v54  ;;  %1991 = vmatpush.msra.mxu1 %v1866_v39  ;;  %8530 = vrot.lane.b32.xlu0 %v11572_v51, %s11099_s19 }
 0x15e   :  { %v2012_v58 = vand.u32 4294901760, %v1256_v56 }
 0x15f   :  { %v2217_v59 = vsub.f32 %v2215_v31, %v2216_v55  ;;  %v2152_v21 = vpop.permute.xlu0 %2151 }
 0x160   :  { %v2039_v46 = vsub.f32 %v1256_v56, %v2012_v58  ;;  %2013 = vmatpush.msra.mxu2 %v2012_v58  ;;  %2089 = vmatpush.msrb.mxu1 %v2012_v58 }
 0x161   :  { %2019 = vmatmul.f32.vlgmr.msra.gmra.mxu2 %v11627_v5  ;;  %v2218_v34 = vand.u32 4294901760, %v2217_v59 }
 0x162   :  { %v2040_v2 = vand.u32 4294901760, %v2039_v46  ;;  %2066 = vmatpush.msrb.mxu0 %v2039_v46 }
 0x163   :  { %8526 = vrot.lane.b32.xlu1 %v11558_v12, %s11099_s19 }
 0x164   :  { %2189 = vmatpush.msra.mxu0 %v2188_v50  ;;  %v2041_v3 = vsub.f32 %v2039_v46, %v2040_v2  ;;  %2115 = vmatpush.msrb.mxu2 %v2040_v2  ;;  %v2148_v4 = vpop.permute.xlu1 %2147  ;;  %v3056_v2 = vpop.permute.xlu2 %3055 }
 0x165   :  { %1993 = vmatmul.f32.vlgmr.msra.gmra.mxu1 %v11605_v63  ;;  %v2159_v5 = vsel %vm2157_vm3, %v2146_v47, %v2148_v4  ;;  %2069 = vmatmul.f32.vlgmr.msrb.gmra.mxu0 %v11608_v0  ;;  %v2160_v11 = vsel %vm2157_vm3, %v2148_v4, %v2150_v10 }
 0x166   :  { %2219 = vmatpush.msra.mxu1 %v2218_v34  ;;  %v2334_v8 = vand.u32 4294901760, %v2159_v5  ;;  %2242 = vmatpush.msra.mxu2 %v2215_v31  ;;  %v2042_v9 = vand.u32 4294901760, %v2041_v3  ;;  %v2480_v15 = vand.u32 4294901760, %v2160_v11 }
 0x167   :  { %2291 = vmatpush.msrb.mxu0 %v2216_v55  ;;  %9437 = vperm.xlu0 %11037, %v9434_v6   ;;  %v3052_v44 = vpop.permute.xlu0 %3051 }
 0x168   :  { %v2361_v13 = vsub.f32 %v2159_v5, %v2334_v8  ;;  %2043 = vmatpush.msra.mxu3 %v2042_v9  ;;  %v2507_v20 = vsub.f32 %v2160_v11, %v2480_v15 }
 0x169   :  { %2045 = vmatmul.f32.vlgmr.msra.gmra.mxu3 %v11605_v63  ;;  %2117 = vmatmul.f32.vlgmr.msrb.gmra.mxu2 %v11605_v63 }
 0x16a   :  { %v2362_v0 = vand.u32 4294901760, %v2361_v13  ;;  %2137 = vmatpush.msrb.mxu3 %v2012_v58  ;;  %2335 = vmatpush.msrb.mxu2 %v2334_v8  ;;  %v2508_v22 = vand.u32 4294901760, %v2507_v20 }
 0x16b   :  { %8532 = vrot.lane.b32.xlu1 %v11581_v60, %s11099_s19  ;;  %s11004_s19 = sshll.u32 %s13102_s8, 4  ;;  %s11005_s19 = int_to_ptr.hbm [resolvable:$true] %s11004_s19 }
 0x16c   :  { %2265 = vmatpush.msra.mxu3 %v2188_v50  ;;  %v2363_v16 = vsub.f32 %v2361_v13, %v2362_v0  ;;  %v2509_v23 = vsub.f32 %v2507_v20, %v2508_v22  ;;  %v2154_v27 = vpop.permute.xlu1 %2153 }
 0x16d   :  { %2093 = vmatmul.f32.vlgmr.msrb.gmra.mxu1 %v11616_v1  ;;  %2195 = vmatmul.f32.vlgmr.msra.gmra.mxu0 %v11748_v14  ;;  %v2161_v1 = vsel %vm2157_vm3, %v2150_v10, %v2152_v21  ;;  %v2162_v29 = vsel %vm2157_vm3, %v2152_v21, %v2154_v27  ;;  %v2163_v38 = vsel %vm2157_vm3, %v2154_v27, %v2156_v37 }
 0x16e   :  { %2313 = vmatpush.msrb.mxu1 %v2188_v50  ;;  %2388 = vmatpush.msra.mxu0 %v2361_v13  ;;  %v2364_v19 = vand.u32 4294901760, %v2363_v16  ;;  %v2626_v25 = vand.u32 4294901760, %v2161_v1  ;;  %v2772_v26 = vand.u32 4294901760, %v2162_v29  ;;  %v2918_v39 = vand.u32 4294901760, %v2163_v38  ;;  %v11017_v50 = vld [vmem:[%s13098_s4 + $0x10] sm:$0xff] }
 0x16f   :  { %9472 = vperm.xlu0 %11037, %v9458_v17   ;;  %v3079_v54 = vsel %vm1263_vm1, %v11017_v50, 0 }
 0x170   :  { %v2653_v24 = vsub.f32 %v2161_v1, %v2626_v25  ;;  %v2799_v33 = vsub.f32 %v2162_v29, %v2772_v26  ;;  %v2945_v41 = vsub.f32 %v2163_v38, %v2918_v39  ;;  %v11799_v46 = vand.u32 4294901760, %v3079_v54 }
 0x171   :  { %2139 = vmatmul.f32.vlgmr.msrb.gmra.mxu3 %v11605_v63  ;;  %2245 = vmatmul.f32.vlgmr.msra.gmra.mxu2 %v11729_v57  ;;  %v2510_v63 = vand.u32 4294901760, %v2509_v23 }
 0x172   :  { %2365 = vmatpush.msrb.mxu3 %v2364_v19  ;;  %2437 = vmatpush.msra.mxu2 %v2362_v0  ;;  %v2654_v28 = vand.u32 4294901760, %v2653_v24  ;;  %v2800_v36 = vand.u32 4294901760, %v2799_v33  ;;  %v2946_v45 = vand.u32 4294901760, %v2945_v41  ;;  %v11805_v4 = vsub.f32 %v3079_v54, %v11799_v46 }
 0x174   :  { %v2655_v32 = vsub.f32 %v2653_v24, %v2654_v28  ;;  %v2801_v18 = vsub.f32 %v2799_v33, %v2800_v36  ;;  %v3054_v42 = vpop.permute.xlu1 %3053  ;;  %v2947_v52 = vsub.f32 %v2945_v41, %v2946_v45  ;;  %v11812_v9 = vand.u32 4294901760, %v11805_v4 }
 0x175   :  { %2221 = vmatmul.f32.vlgmr.msra.gmra.mxu1 %v11717_v53  ;;  %2293 = vmatmul.f32.vlgmr.msrb.gmra.mxu0 %v11717_v53  ;;  %v3066_v47 = vsel %vm3065_vm4, %v3052_v44, %v3054_v42  ;;  %v3067_v3 = vsel %vm3065_vm4, %v3054_v42, %v3056_v2  ;;  %v3062_v44 = vpop.permute.xlu2 %3061 }
 0x176   :  { %2411 = vmatpush.msra.mxu1 %v2334_v8  ;;  %2481 = vmatpush.msrb.mxu0 %v2480_v15  ;;  %v2656_v35 = vand.u32 4294901760, %v2655_v32  ;;  %v2802_v40 = vand.u32 4294901760, %v2801_v18  ;;  %v3096_v48 = vand.u32 4294901760, %v3066_v47  ;;  %v2948_v58 = vand.u32 4294901760, %v2947_v52 }
 0x177   :  { %v3242_v7 = vand.u32 4294901760, %v3067_v3 }
 0x178   :  { %v3123_v55 = vsub.f32 %v3066_v47, %v3096_v48 }
 0x179   :  { %2269 = vmatmul.f32.vlgmr.msra.gmra.mxu3 %v11733_v61  ;;  %2341 = vmatmul.f32.vlgmr.msrb.gmra.mxu2 %v11748_v14  ;;  %v3269_v0 = vsub.f32 %v3067_v3, %v3242_v7 }
 0x17a   :  { %2459 = vmatpush.msra.mxu3 %v2334_v8  ;;  %2534 = vmatpush.msrb.mxu2 %v2507_v20  ;;  %v3124_v34 = vand.u32 4294901760, %v3123_v55 }
 0x17b   :  { %v3270_v17 = vand.u32 4294901760, %v3269_v0 }
 0x17c   :  { %v3125_v5 = vsub.f32 %v3123_v55, %v3124_v34  ;;  %v3060_v29 = vpop.permute.xlu1 %3059 }
 0x17d   :  { %2315 = vmatmul.f32.vlgmr.msrb.gmra.mxu1 %v11717_v53  ;;  %2391 = vmatmul.f32.vlgmr.msra.gmra.mxu0 %v11729_v57  ;;  %v3070_v47 = vsel %vm3065_vm4, %v3060_v29, %v3062_v44 }
 0x17e   :  { %2511 = vmatpush.msrb.mxu1 %v2510_v63  ;;  %2583 = vmatpush.msra.mxu0 %v2508_v22  ;;  %v3126_v13 = vand.u32 4294901760, %v3125_v5  ;;  %v11855_v52 = vand.u32 4294901760, %v3070_v47 }
 0x181   :  { %2367 = vmatmul.f32.vlgmr.msrb.gmra.mxu3 %v11717_v53  ;;  %2439 = vmatmul.f32.vlgmr.msra.gmra.mxu2 %v11717_v53 }
 0x182   :  { %2557 = vmatpush.msrb.mxu3 %v2480_v15  ;;  %2627 = vmatpush.msra.mxu2 %v2626_v25 }
 0x185   :  { %2415 = vmatmul.f32.vlgmr.msra.gmra.mxu1 %v11733_v61  ;;  %2487 = vmatmul.f32.vlgmr.msrb.gmra.mxu0 %v11748_v14 }
 0x186   :  { %2605 = vmatpush.msra.mxu1 %v2480_v15  ;;  %2680 = vmatpush.msrb.mxu0 %v2653_v24  ;;  %v3058_v15 = vpop.permute.xlu0 %3057 }
 0x187   :  { %v3068_v16 = vsel %vm3065_vm4, %v3056_v2, %v3058_v15  ;;  %v3707_v2 = vsub.f32 %v3070_v47, %v11855_v52 }
 0x189   :  { %2461 = vmatmul.f32.vlgmr.msra.gmra.mxu3 %v11717_v53  ;;  %2537 = vmatmul.f32.vlgmr.msrb.gmra.mxu2 %v11729_v57 }
 0x18a   :  { %2657 = vmatpush.msra.mxu3 %v2656_v35  ;;  %2729 = vmatpush.msrb.mxu2 %v2654_v28 }
 0x18d   :  { %2513 = vmatmul.f32.vlgmr.msrb.gmra.mxu1 %v11717_v53  ;;  %2585 = vmatmul.f32.vlgmr.msra.gmra.mxu0 %v11717_v53 }
 0x18e   :  { %2703 = vmatpush.msrb.mxu1 %v2626_v25  ;;  %2773 = vmatpush.msra.mxu0 %v2772_v26 }
 0x191   :  { %2561 = vmatmul.f32.vlgmr.msrb.gmra.mxu3 %v11733_v61  ;;  %2633 = vmatmul.f32.vlgmr.msra.gmra.mxu2 %v11748_v14 }
 0x192   :  { %2751 = vmatpush.msrb.mxu3 %v2626_v25  ;;  %2826 = vmatpush.msra.mxu2 %v2799_v33  ;;  %v3271_v25 = vsub.f32 %v3269_v0, %v3270_v17 }
 0x194   :  { %v3272_v28 = vand.u32 4294901760, %v3271_v25 }
 0x195   :  { %2607 = vmatmul.f32.vlgmr.msra.gmra.mxu1 %v11717_v53  ;;  %2683 = vmatmul.f32.vlgmr.msrb.gmra.mxu0 %v11729_v57 }
 0x196   :  { %2803 = vmatpush.msra.mxu1 %v2802_v40  ;;  %2875 = vmatpush.msrb.mxu0 %v2800_v36  ;;  %v11780_v43 = vpop.f32.mrf.mxu0  ;;  %v3069_v36 = vsel %vm3065_vm4, %v3058_v15, %v3060_v29  ;;  %v3708_v15 = vand.u32 4294901760, %v3707_v2  ;;  %v3968_v29 = vpop.permute.xlu2 %3967 }
 0x197   :  { %v3534_v38 = vand.u32 4294901760, %v3069_v36 }
 0x199   :  { %2659 = vmatmul.f32.vlgmr.msra.gmra.mxu3 %v11717_v53  ;;  %2731 = vmatmul.f32.vlgmr.msrb.gmra.mxu2 %v11717_v53  ;;  %v3561_v40 = vsub.f32 %v3069_v36, %v3534_v38 }
 0x19a   :  { %2849 = vmatpush.msra.mxu3 %v2772_v26  ;;  %2919 = vmatpush.msrb.mxu2 %v2918_v39 }
 0x19c   :  { %v11814_v10 = vpop.f32.mrf.mxu3 }
 0x19d   :  { %2707 = vmatmul.f32.vlgmr.msrb.gmra.mxu1 %v11733_v61  ;;  %2779 = vmatmul.f32.vlgmr.msra.gmra.mxu0 %v11748_v14 }
 0x19e   :  { %2897 = vmatpush.msrb.mxu1 %v2772_v26  ;;  %2972 = vmatpush.msra.mxu0 %v2945_v41  ;;  %v11790_v31 = vpop.f32.mrf.mxu1  ;;  %v11793_v56 = vpop.f32.mrf.mxu0 }
 0x19f   :  { %v11795_v59 = vpop.f32.mrf.mxu2 }
 0x1a1   :  { %2753 = vmatmul.f32.vlgmr.msrb.gmra.mxu3 %v11717_v53  ;;  %2829 = vmatmul.f32.vlgmr.msra.gmra.mxu2 %v11729_v57 }
 0x1a2   :  { %2949 = vmatpush.msrb.mxu3 %v2948_v58  ;;  %3021 = vmatpush.msra.mxu2 %v2946_v45 }
 0x1a5   :  { %2805 = vmatmul.f32.vlgmr.msra.gmra.mxu1 %v11717_v53  ;;  %2877 = vmatmul.f32.vlgmr.msrb.gmra.mxu0 %v11717_v53 }
 0x1a6   :  { %2995 = vmatpush.msra.mxu1 %v2918_v39  ;;  %3097 = vmatpush.msrb.mxu0 %v3096_v48  ;;  %v11807_v6 = vpop.f32.mrf.mxu1  ;;  %v1486_v8 = vpop.f32.mrf.mxu0 }
 0x1a9   :  { %2853 = vmatmul.f32.vlgmr.msra.gmra.mxu3 %v11733_v61  ;;  %2925 = vmatmul.f32.vlgmr.msrb.gmra.mxu2 %v11748_v14  ;;  %v3101_v14 = vsub.f32 %v11805_v4, %v11812_v9 }
 0x1aa   :  { %3043 = vmatpush.msra.mxu3 %v2918_v39  ;;  %3150 = vmatpush.msrb.mxu2 %v3123_v55  ;;  %v1436_v11 = vpop.f32.mrf.mxu2 }
 0x1ab   :  { %v11823_v20 = vand.u32 4294901760, %v3101_v14 }
 0x1ad   :  { %2899 = vmatmul.f32.vlgmr.msrb.gmra.mxu1 %v11717_v53  ;;  %2975 = vmatmul.f32.vlgmr.msra.gmra.mxu0 %v11729_v57  ;;  %v3388_v57 = vand.u32 4294901760, %v3068_v16 }
 0x1ae   :  { %3127 = vmatpush.msrb.mxu1 %v3126_v13  ;;  %3199 = vmatpush.msra.mxu0 %v3124_v34  ;;  %v1510_v19 = vpop.f32.mrf.mxu1  ;;  %v11825_v1 = vpop.f32.mrf.mxu0 }
 0x1af   :  { %v3415_v24 = vsub.f32 %v3068_v16, %v3388_v57  ;;  %v3064_v13 = vpop.permute.xlu0 %3063  ;;  %v3709_v16 = vsub.f32 %v3707_v2, %v3708_v15 }
 0x1b0   :  { %v3071_v14 = vsel %vm3065_vm4, %v3062_v44, %v3064_v13  ;;  %v11018_v44 = vld [vmem:[%s13098_s4 + $0x18] sm:$0xff] }
 0x1b1   :  { %2951 = vmatmul.f32.vlgmr.msrb.gmra.mxu3 %v11717_v53  ;;  %3023 = vmatmul.f32.vlgmr.msra.gmra.mxu2 %v11717_v53  ;;  %v3416_v33 = vand.u32 4294901760, %v3415_v24 }
 0x1b2   :  { %3173 = vmatpush.msrb.mxu3 %v3096_v48  ;;  %3243 = vmatpush.msra.mxu2 %v3242_v7  ;;  %v1462_v21 = vpop.f32.mrf.mxu3  ;;  %v1534_v22 = vpop.f32.mrf.mxu2 }
 0x1b3   :  { %v1463_v23 = vadd.f32 %v1462_v21, %v1436_v11  ;;  %v3417_v37 = vsub.f32 %v3415_v24, %v3416_v33 }
 0x1b5   :  { %2999 = vmatmul.f32.vlgmr.msra.gmra.mxu1 %v11733_v61  ;;  %3103 = vmatmul.f32.vlgmr.msrb.gmra.mxu0 %v11823_v20  ;;  %v1487_v63 = vadd.f32 %v1486_v8, %v1463_v23  ;;  %v3418_v39 = vand.u32 4294901760, %v3417_v37  ;;  %v3710_v23 = vand.u32 4294901760, %v3709_v16 }
 0x1b6   :  { %3221 = vmatpush.msra.mxu1 %v3096_v48  ;;  %3296 = vmatpush.msrb.mxu0 %v3269_v0  ;;  %v11833_v32 = vpop.f32.mrf.mxu1  ;;  %v3562_v48 = vand.u32 4294901760, %v3561_v40 }
 0x1b7   :  { %v1511_v27 = vadd.f32 %v1510_v19, %v1487_v63 }
 0x1b8   :  { %v3563_v55 = vsub.f32 %v3561_v40, %v3562_v48 }
 0x1b9   :  { %3045 = vmatmul.f32.vlgmr.msra.gmra.mxu3 %v11717_v53  ;;  %3153 = vmatmul.f32.vlgmr.msrb.gmra.mxu2 %v11805_v4  ;;  %v11831_v26 = vadd.f32 %v1534_v22, %v1511_v27  ;;  %v11842_v53 = vpop.f32.mrf.mxu0  ;;  %v3966_v27 = vpop.permute.xlu1 %3965 }
 0x1ba   :  { %3273 = vmatpush.msra.mxu3 %v3272_v28  ;;  %3345 = vmatpush.msrb.mxu2 %v3270_v17  ;;  %v11835_v61 = vpop.f32.mrf.mxu3  ;;  %v11838_v35 = vpop.f32.mrf.mxu2  ;;  %v3564_v5 = vand.u32 4294901760, %v3563_v55  ;;  %v11870_v17 = vand.u32 4294901760, %v3071_v14  ;;  %v3980_v36 = vsel %vm3979_vm5, %v3966_v27, %v3968_v29 }
 0x1bc   :  { %v3853_v63 = vsub.f32 %v3071_v14, %v11870_v17 }
 0x1bd   :  { %3129 = vmatmul.f32.vlgmr.msrb.gmra.mxu1 %v11799_v46  ;;  %3201 = vmatmul.f32.vlgmr.msra.gmra.mxu0 %v11799_v46 }
 0x1be   :  { %3319 = vmatpush.msrb.mxu1 %v3242_v7  ;;  %3389 = vmatpush.msra.mxu0 %v3388_v57  ;;  %v11849_v41 = vpop.f32.mrf.mxu1 }
 0x1c1   :  { %3177 = vmatmul.f32.vlgmr.msrb.gmra.mxu3 %v11812_v9  ;;  %3249 = vmatmul.f32.vlgmr.msra.gmra.mxu2 %v11823_v20  ;;  %v1778_v45 = vpop.f32.mrf.mxu0  ;;  %v3972_v27 = vpop.permute.xlu1 %3971 }
 0x1c2   :  { %3367 = vmatpush.msrb.mxu3 %v3242_v7  ;;  %3442 = vmatpush.msra.mxu2 %v3415_v24  ;;  %v11846_v18 = vpop.f32.mrf.mxu3  ;;  %v1728_v42 = vpop.f32.mrf.mxu2 }
 0x1c5   :  { %3223 = vmatmul.f32.vlgmr.msra.gmra.mxu1 %v11799_v46  ;;  %3299 = vmatmul.f32.vlgmr.msrb.gmra.mxu0 %v11805_v4 }
 0x1c6   :  { %3419 = vmatpush.msra.mxu1 %v3418_v39  ;;  %3491 = vmatpush.msrb.mxu0 %v3416_v33  ;;  %v1802_v34 = vpop.f32.mrf.mxu1  ;;  %v3854_v33 = vand.u32 4294901760, %v3853_v63 }
 0x1c9   :  { %3275 = vmatmul.f32.vlgmr.msra.gmra.mxu3 %v11799_v46  ;;  %3347 = vmatmul.f32.vlgmr.msrb.gmra.mxu2 %v11799_v46 }
 0x1ca   :  { %3465 = vmatpush.msra.mxu3 %v3388_v57  ;;  %3535 = vmatpush.msrb.mxu2 %v3534_v38  ;;  %v1754_v50 = vpop.f32.mrf.mxu3  ;;  %v1826_v7 = vpop.f32.mrf.mxu2 }
 0x1cb   :  { %v1755_v54 = vadd.f32 %v1754_v50, %v1728_v42  ;;  %v1317_v42 = vadd.f32 %v11790_v31, %v11780_v43 }
 0x1cd   :  { %3323 = vmatmul.f32.vlgmr.msrb.gmra.mxu1 %v11812_v9  ;;  %3395 = vmatmul.f32.vlgmr.msra.gmra.mxu0 %v11823_v20  ;;  %v1779_v58 = vadd.f32 %v1778_v45, %v1755_v54  ;;  %v3855_v45 = vsub.f32 %v3853_v63, %v3854_v33  ;;  %v1341_v54 = vadd.f32 %v11795_v59, %v1317_v42 }
 0x1ce   :  { %3513 = vmatpush.msrb.mxu1 %v3388_v57  ;;  %3588 = vmatpush.msra.mxu0 %v3561_v40  ;;  %v11886_v40 = vand.u32 4294901760, %v3980_v36 }
 0x1cf   :  { %v1803_v3 = vadd.f32 %v1802_v34, %v1779_v58  ;;  %v3856_v43 = vand.u32 4294901760, %v3855_v45  ;;  %v3970_v58 = vpop.permute.xlu0 %3969 }
 0x1d0   :  { %v4037_v50 = vsub.f32 %v3980_v36, %v11886_v40  ;;  %v3981_v59 = vsel %vm3979_vm5, %v3968_v29, %v3970_v58 }
 0x1d1   :  { %3369 = vmatmul.f32.vlgmr.msrb.gmra.mxu3 %v11799_v46  ;;  %3445 = vmatmul.f32.vlgmr.msra.gmra.mxu2 %v11805_v4  ;;  %v1874_v8 = vpop.f32.mrf.mxu0  ;;  %v11862_v11 = vadd.f32 %v1826_v7, %v1803_v3  ;;  %v11913_v14 = vand.u32 4294901760, %v3981_v59 }
 0x1d2   :  { %3565 = vmatpush.msrb.mxu3 %v3564_v5  ;;  %3637 = vmatpush.msra.mxu2 %v3562_v48  ;;  %v11864_v0 = vpop.f32.mrf.mxu3  ;;  %v3993_v48 = vsel %vm1263_vm1, %v11018_v44, 0  ;;  %v1557_v44 = vadd.f32 %v11835_v61, %v11831_v26 }
 0x1d3   :  { %v11901_v55 = vand.u32 4294901760, %v3993_v48 }
 0x1d5   :  { %3421 = vmatmul.f32.vlgmr.msra.gmra.mxu1 %v11799_v46  ;;  %3493 = vmatmul.f32.vlgmr.msrb.gmra.mxu0 %v11799_v46 }
 0x1d6   :  { %3611 = vmatpush.msra.mxu1 %v3534_v38  ;;  %3681 = vmatpush.msrb.mxu0 %v11855_v52 }
 0x1d9   :  { %3469 = vmatmul.f32.vlgmr.msra.gmra.mxu3 %v11812_v9  ;;  %3541 = vmatmul.f32.vlgmr.msrb.gmra.mxu2 %v11823_v20  ;;  %v1900_v19 = vpop.f32.mrf.mxu1  ;;  %v1972_v22 = vpop.f32.mrf.mxu0 }
 0x1da   :  { %3659 = vmatpush.msra.mxu3 %v3534_v38  ;;  %3734 = vmatpush.msrb.mxu2 %v3707_v2  ;;  %v1901_v21 = vadd.f32 %v1900_v19, %v1874_v8  ;;  %v1924_v57 = vpop.f32.mrf.mxu2  ;;  %v1948_v25 = vpop.f32.mrf.mxu3  ;;  %v1365_v2 = vadd.f32 %v11814_v10, %v1341_v54  ;;  %v11909_v8 = vsub.f32 %v3993_v48, %v11901_v55 }
 0x1db   :  { %v1609_v54 = vadd.f32 %v11833_v32, %v11825_v1  ;;  %v3974_v32 = vpop.permute.xlu2 %3973 }
 0x1dc   :  { %v1925_v24 = vadd.f32 %v1924_v57, %v1901_v21  ;;  %v11918_v21 = vand.u32 4294901760, %v11909_v8 }
 0x1dd   :  { %3515 = vmatmul.f32.vlgmr.msrb.gmra.mxu1 %v11799_v46  ;;  %3591 = vmatmul.f32.vlgmr.msra.gmra.mxu0 %v11805_v4  ;;  %v1633_v61 = vadd.f32 %v11838_v35, %v1609_v54  ;;  %v3983_v35 = vsel %vm3979_vm5, %v3972_v27, %v3974_v32 }
 0x1de   :  { %3711 = vmatpush.msrb.mxu1 %v3710_v23  ;;  %3783 = vmatpush.msra.mxu0 %v3708_v15  ;;  %v1949_v28 = vadd.f32 %v1948_v25, %v1925_v24  ;;  %v1389_v15 = vadd.f32 %v11793_v56, %v1365_v2  ;;  %v4183_v25 = vsub.f32 %v3981_v59, %v11913_v14 }
 0x1e0   :  { %v11878_v37 = vadd.f32 %v1972_v22, %v1949_v28  ;;  %v1411_v57 = vadd.f32 %v11807_v6, %v1389_v15  ;;  %v4184_v29 = vand.u32 4294901760, %v4183_v25  ;;  %v11958_v15 = vand.u32 4294901760, %v3983_v35 }
 0x1e1   :  { %3567 = vmatmul.f32.vlgmr.msrb.gmra.mxu3 %v11799_v46  ;;  %3639 = vmatmul.f32.vlgmr.msra.gmra.mxu2 %v11799_v46 }
 0x1e2   :  { %v11882_v38 = vpop.f32.mrf.mxu1  ;;  %3757 = vmatpush.msrb.mxu3 %v11855_v52  ;;  %3827 = vmatpush.msra.mxu2 %v11870_v17  ;;  %v2070_v39 = vpop.f32.mrf.mxu0 }
 0x1e4   :  { %v2020_v47 = vpop.f32.mrf.mxu2 }
 0x1e5   :  { %3615 = vmatmul.f32.vlgmr.msra.gmra.mxu1 %v11812_v9  ;;  %3687 = vmatmul.f32.vlgmr.msrb.gmra.mxu0 %v11823_v20 }
 0x1e6   :  { %3805 = vmatpush.msra.mxu1 %v11855_v52  ;;  %3880 = vmatpush.msrb.mxu0 %v3853_v63  ;;  %v4038_v52 = vand.u32 4294901760, %v4037_v50 }
 0x1e8   :  { %v4039_v13 = vsub.f32 %v4037_v50, %v4038_v52 }
 0x1e9   :  { %3661 = vmatmul.f32.vlgmr.msra.gmra.mxu3 %v11799_v46  ;;  %3737 = vmatmul.f32.vlgmr.msrb.gmra.mxu2 %v11805_v4 }
 0x1ea   :  { %v2094_v31 = vpop.f32.mrf.mxu1  ;;  %3857 = vmatpush.msra.mxu3 %v3856_v43  ;;  %3929 = vmatpush.msrb.mxu2 %v3854_v33  ;;  %v2196_v34 = vpop.f32.mrf.mxu0  ;;  %v4040_v56 = vand.u32 4294901760, %v4039_v13  ;;  %v3982_v33 = vsel %vm3979_vm5, %v3970_v58, %v3972_v27 }
 0x1eb   :  { %v11936_v42 = vand.u32 4294901760, %v3982_v33 }
 0x1ec   :  { %v2046_v3 = vpop.f32.mrf.mxu3  ;;  %v2118_v5 = vpop.f32.mrf.mxu2 }
 0x1ed   :  { %3713 = vmatmul.f32.vlgmr.msrb.gmra.mxu1 %v11799_v46  ;;  %v2047_v7 = vadd.f32 %v2046_v3, %v2020_v47  ;;  %3785 = vmatmul.f32.vlgmr.msra.gmra.mxu0 %v11799_v46  ;;  %v4185_v47 = vsub.f32 %v4183_v25, %v4184_v29  ;;  %v4329_v58 = vsub.f32 %v3982_v33, %v11936_v42 }
 0x1ee   :  { %3903 = vmatpush.msrb.mxu1 %v11870_v17  ;;  %4011 = vmatpush.msra.mxu0 %v11886_v40 }
 0x1ef   :  { %v2071_v10 = vadd.f32 %v2070_v39, %v2047_v7  ;;  %v4186_v26 = vand.u32 4294901760, %v4185_v47  ;;  %v4330_v2 = vand.u32 4294901760, %v4329_v58 }
 0x1f1   :  { %v2095_v16 = vadd.f32 %v2094_v31, %v2071_v10  ;;  %3761 = vmatmul.f32.vlgmr.msrb.gmra.mxu3 %v11812_v9  ;;  %3833 = vmatmul.f32.vlgmr.msra.gmra.mxu2 %v11823_v20  ;;  %v2197_v20 = vadd.f32 %v2196_v34, %v1411_v57 }
 0x1f2   :  { %v2222_v19 = vpop.f32.mrf.mxu1  ;;  %3951 = vmatpush.msrb.mxu3 %v11870_v17  ;;  %4064 = vmatpush.msra.mxu2 %v4037_v50  ;;  %v2294_v22 = vpop.f32.mrf.mxu0  ;;  %v4015_v17 = vsub.f32 %v11909_v8, %v11918_v21 }
 0x1f3   :  { %v2119_v23 = vadd.f32 %v2118_v5, %v2095_v16  ;;  %v2223_v6 = vadd.f32 %v2222_v19, %v2197_v20 }
 0x1f4   :  { %v2140_v63 = vpop.f32.mrf.mxu3  ;;  %v2246_v24 = vpop.f32.mrf.mxu2  ;;  %v11932_v39 = vand.u32 4294901760, %v4015_v17 }
 0x1f5   :  { %3807 = vmatmul.f32.vlgmr.msra.gmra.mxu1 %v11799_v46  ;;  %v11924_v28 = vadd.f32 %v2140_v63, %v2119_v23  ;;  %3883 = vmatmul.f32.vlgmr.msrb.gmra.mxu0 %v11805_v4  ;;  %v2247_v45 = vadd.f32 %v2246_v24, %v2223_v6  ;;  %v4475_v23 = vsub.f32 %v3983_v35, %v11958_v15 }
 0x1f6   :  { %4041 = vmatpush.msra.mxu1 %v4040_v56  ;;  %4113 = vmatpush.msrb.mxu0 %v4038_v52 }
 0x1f9   :  { %3859 = vmatmul.f32.vlgmr.msra.gmra.mxu3 %v11799_v46  ;;  %3931 = vmatmul.f32.vlgmr.msrb.gmra.mxu2 %v11799_v46 }
 0x1fa   :  { %v2316_v36 = vpop.f32.mrf.mxu1  ;;  %4087 = vmatpush.msra.mxu3 %v11886_v40  ;;  %4157 = vmatpush.msrb.mxu2 %v11913_v14  ;;  %v2392_v4 = vpop.f32.mrf.mxu0 }
 0x1fc   :  { %v2270_v48 = vpop.f32.mrf.mxu3  ;;  %v2342_v50 = vpop.f32.mrf.mxu2 }
 0x1fd   :  { %3907 = vmatmul.f32.vlgmr.msrb.gmra.mxu1 %v11812_v9  ;;  %v2271_v43 = vadd.f32 %v2270_v48, %v2247_v45  ;;  %v2343_v31 = vadd.f32 %v2342_v50, %v1557_v44  ;;  %4017 = vmatmul.f32.vlgmr.msra.gmra.mxu0 %v11932_v39 }
 0x1fe   :  { %4135 = vmatpush.msrb.mxu1 %v11886_v40  ;;  %4210 = vmatpush.msra.mxu0 %v4183_v25  ;;  %v1657_v40 = vadd.f32 %v11846_v18, %v1633_v61  ;;  %v3976_v25 = vpop.permute.xlu0 %3975 }
 0x1ff   :  { %v2295_v34 = vadd.f32 %v2294_v22, %v2271_v43  ;;  %v3984_v27 = vsel %vm3979_vm5, %v3974_v32, %v3976_v25  ;;  %v3978_v43 = vpop.permute.xlu1 %3977 }
 0x200   :  { %v1681_v7 = vadd.f32 %v11842_v53, %v1657_v40  ;;  %v11974_v6 = vand.u32 4294901760, %v3984_v27 }
 0x201   :  { %3953 = vmatmul.f32.vlgmr.msrb.gmra.mxu3 %v11799_v46  ;;  %4067 = vmatmul.f32.vlgmr.msra.gmra.mxu2 %v11909_v8  ;;  %v11949_v52 = vadd.f32 %v2316_v36, %v2295_v34  ;;  %v4331_v46 = vsub.f32 %v4329_v58, %v4330_v2 }
 0x202   :  { %v2416_v9 = vpop.f32.mrf.mxu1  ;;  %4187 = vmatpush.msrb.mxu3 %v4186_v26  ;;  %4259 = vmatpush.msra.mxu2 %v4184_v29  ;;  %v2488_v1 = vpop.f32.mrf.mxu0  ;;  %v1703_v19 = vadd.f32 %v11849_v41, %v1681_v7  ;;  %v4476_v41 = vand.u32 4294901760, %v4475_v23  ;;  %v1849_v29 = vadd.f32 %v11864_v0, %v11862_v11  ;;  %v4621_v48 = vsub.f32 %v3984_v27, %v11974_v6 }
 0x203   :  { %v4332_v57 = vand.u32 4294901760, %v4331_v46 }
 0x204   :  { %v2368_v3 = vpop.f32.mrf.mxu3  ;;  %v2440_v5 = vpop.f32.mrf.mxu2  ;;  %v2489_v63 = vadd.f32 %v2488_v1, %v1703_v19  ;;  %v4477_v36 = vsub.f32 %v4475_v23, %v4476_v41 }
 0x205   :  { %4043 = vmatmul.f32.vlgmr.msra.gmra.mxu1 %v11901_v55  ;;  %v2369_v59 = vadd.f32 %v2368_v3, %v2343_v31  ;;  %4115 = vmatmul.f32.vlgmr.msrb.gmra.mxu0 %v11901_v55 }
 0x206   :  { %4233 = vmatpush.msra.mxu1 %v11913_v14  ;;  %4303 = vmatpush.msrb.mxu0 %v11936_v42  ;;  %v4478_v54 = vand.u32 4294901760, %v4477_v36 }
 0x207   :  { %v2393_v13 = vadd.f32 %v2392_v4, %v2369_v59 }
 0x209   :  { %v2417_v18 = vadd.f32 %v2416_v9, %v2393_v13  ;;  %4091 = vmatmul.f32.vlgmr.msra.gmra.mxu3 %v11918_v21  ;;  %4163 = vmatmul.f32.vlgmr.msrb.gmra.mxu2 %v11932_v39  ;;  %v1995_v9 = vadd.f32 %v11882_v38, %v11878_v37 }
 0x20a   :  { %v2514_v10 = vpop.f32.mrf.mxu1  ;;  %4281 = vmatpush.msra.mxu3 %v11913_v14  ;;  %4356 = vmatpush.msrb.mxu2 %v4329_v58  ;;  %v2586_v16 = vpop.f32.mrf.mxu0  ;;  %v4622_v58 = vand.u32 4294901760, %v4621_v48 }
 0x20b   :  { %v2441_v22 = vadd.f32 %v2440_v5, %v2417_v18  ;;  %v2515_v14 = vadd.f32 %v2514_v10, %v2489_v63 }
 0x20c   :  { %v2462_v53 = vpop.f32.mrf.mxu3  ;;  %v2538_v56 = vpop.f32.mrf.mxu2  ;;  %v4623_v1 = vsub.f32 %v4621_v48, %v4622_v58 }
 0x20d   :  { %4137 = vmatmul.f32.vlgmr.msrb.gmra.mxu1 %v11901_v55  ;;  %v11966_v24 = vadd.f32 %v2462_v53, %v2441_v22  ;;  %4213 = vmatmul.f32.vlgmr.msra.gmra.mxu0 %v11909_v8  ;;  %v2539_v33 = vadd.f32 %v2538_v56, %v2515_v14  ;;  %v12008_v22 = vand.u32 4294901760, %v11546_v49 }
 0x20e   :  { %4333 = vmatpush.msrb.mxu1 %v4332_v57  ;;  %4405 = vmatpush.msra.mxu0 %v4330_v2  ;;  %v4624_v37 = vand.u32 4294901760, %v4623_v1  ;;  %v11019_v57 = vld [vmem:[%s13098_s4 + $0x20] sm:$0xff] }
 0x20f   :  { %v4880_v14 = vsel %vm1263_vm1, %v11019_v57, 0  ;;  %v5335_v57 = vand.u32 4294901760, %v11563_v30 }
 0x211   :  { %4189 = vmatmul.f32.vlgmr.msrb.gmra.mxu3 %v11901_v55  ;;  %4261 = vmatmul.f32.vlgmr.msra.gmra.mxu2 %v11901_v55 }
 0x212   :  { %v2608_v20 = vpop.f32.mrf.mxu1  ;;  %4379 = vmatpush.msrb.mxu3 %v11936_v42  ;;  %4449 = vmatpush.msra.mxu2 %v11958_v15  ;;  %v2684_v17 = vpop.f32.mrf.mxu0 }
 0x214   :  { %v2562_v4 = vpop.f32.mrf.mxu3  ;;  %v2634_v44 = vpop.f32.mrf.mxu2 }
 0x215   :  { %4237 = vmatmul.f32.vlgmr.msra.gmra.mxu1 %v11918_v21  ;;  %v2563_v45 = vadd.f32 %v2562_v4, %v2539_v33  ;;  %v2635_v47 = vadd.f32 %v2634_v44, %v1849_v29  ;;  %4309 = vmatmul.f32.vlgmr.msrb.gmra.mxu0 %v11932_v39 }
 0x216   :  { %4427 = vmatpush.msra.mxu1 %v11936_v42  ;;  %4502 = vmatpush.msrb.mxu0 %v4475_v23  ;;  %v3985_v42 = vsel %vm3979_vm5, %v3976_v25, %v3978_v43 }
 0x217   :  { %v2587_v50 = vadd.f32 %v2586_v16, %v2563_v45  ;;  %v11993_v2 = vand.u32 4294901760, %v3985_v42 }
 0x219   :  { %4283 = vmatmul.f32.vlgmr.msra.gmra.mxu3 %v11901_v55  ;;  %4359 = vmatmul.f32.vlgmr.msrb.gmra.mxu2 %v11909_v8  ;;  %v11984_v0 = vadd.f32 %v2608_v20, %v2587_v50  ;;  %v4767_v38 = vsub.f32 %v3985_v42, %v11993_v2 }
 0x21a   :  { %v2708_v11 = vpop.f32.mrf.mxu1  ;;  %4479 = vmatpush.msra.mxu3 %v4478_v54  ;;  %4551 = vmatpush.msrb.mxu2 %v4476_v41  ;;  %v2780_v31 = vpop.f32.mrf.mxu0  ;;  %v4924_v41 = vsub.f32 %v11546_v49, %v12008_v22 }
 0x21b   :  { %v2781_v40 = vadd.f32 %v2780_v31, %v1995_v9  ;;  %v4768_v16 = vand.u32 4294901760, %v4767_v38 }
 0x21c   :  { %v2660_v34 = vpop.f32.mrf.mxu3  ;;  %v2732_v26 = vpop.f32.mrf.mxu2  ;;  %v4925_v33 = vand.u32 4294901760, %v4924_v41 }
 0x21d   :  { %4335 = vmatmul.f32.vlgmr.msrb.gmra.mxu1 %v11901_v55  ;;  %v2661_v61 = vadd.f32 %v2660_v34, %v2635_v47  ;;  %4407 = vmatmul.f32.vlgmr.msra.gmra.mxu0 %v11901_v55  ;;  %v4769_v23 = vsub.f32 %v4767_v38, %v4768_v16 }
 0x21e   :  { %4525 = vmatpush.msrb.mxu1 %v11958_v15  ;;  %4595 = vmatpush.msra.mxu0 %v11974_v6  ;;  %v4926_v47 = vsub.f32 %v4924_v41, %v4925_v33 }
 0x21f   :  { %v2685_v32 = vadd.f32 %v2684_v17, %v2661_v61  ;;  %v4770_v20 = vand.u32 4294901760, %v4769_v23 }
 0x220   :  { %v4927_v34 = vand.u32 4294901760, %v4926_v47 }
 0x221   :  { %v2709_v3 = vadd.f32 %v2708_v11, %v2685_v32  ;;  %4383 = vmatmul.f32.vlgmr.msrb.gmra.mxu3 %v11918_v21  ;;  %4455 = vmatmul.f32.vlgmr.msra.gmra.mxu2 %v11932_v39 }
 0x222   :  { %v2806_v5 = vpop.f32.mrf.mxu1  ;;  %4573 = vmatpush.msrb.mxu3 %v11958_v15  ;;  %4648 = vmatpush.msra.mxu2 %v4621_v48  ;;  %v2878_v59 = vpop.f32.mrf.mxu0  ;;  %v12034_v48 = vand.u32 4294901760, %v11551_v62 }
 0x223   :  { %v2807_v35 = vadd.f32 %v2806_v5, %v2781_v40  ;;  %v2733_v46 = vadd.f32 %v2732_v26, %v2709_v3 }
 0x224   :  { %v2754_v7 = vpop.f32.mrf.mxu3  ;;  %v2830_v13 = vpop.f32.mrf.mxu2  ;;  %v5070_v61 = vsub.f32 %v11551_v62, %v12034_v48 }
 0x225   :  { %4429 = vmatmul.f32.vlgmr.msra.gmra.mxu1 %v11901_v55  ;;  %v12000_v18 = vadd.f32 %v2754_v7, %v2733_v46  ;;  %v2831_v10 = vadd.f32 %v2830_v13, %v2807_v35  ;;  %4505 = vmatmul.f32.vlgmr.msrb.gmra.mxu0 %v11909_v8 }
 0x226   :  { %4625 = vmatpush.msra.mxu1 %v4624_v37  ;;  %4697 = vmatpush.msrb.mxu0 %v4622_v58  ;;  %v5071_v32 = vand.u32 4294901760, %v5070_v61 }
 0x228   :  { %v5072_v35 = vsub.f32 %v5070_v61, %v5071_v32 }
 0x229   :  { %4481 = vmatmul.f32.vlgmr.msra.gmra.mxu3 %v11901_v55  ;;  %4553 = vmatmul.f32.vlgmr.msrb.gmra.mxu2 %v11901_v55 }
 0x22a   :  { %v2900_v15 = vpop.f32.mrf.mxu1  ;;  %4671 = vmatpush.msra.mxu3 %v11974_v6  ;;  %4741 = vmatpush.msrb.mxu2 %v11993_v2  ;;  %v2976_v19 = vpop.f32.mrf.mxu0 }
 0x22c   :  { %v2854_v53 = vpop.f32.mrf.mxu3  ;;  %v2926_v56 = vpop.f32.mrf.mxu2 }
 0x22d   :  { %4529 = vmatmul.f32.vlgmr.msrb.gmra.mxu1 %v11918_v21  ;;  %v2855_v25 = vadd.f32 %v2854_v53, %v2831_v10  ;;  %v2927_v63 = vadd.f32 %v2926_v56, %v11924_v28  ;;  %4601 = vmatmul.f32.vlgmr.msra.gmra.mxu0 %v11932_v39  ;;  %v12024_v28 = vand.u32 4294901760, %v4880_v14 }
 0x22e   :  { %4719 = vmatpush.msrb.mxu1 %v11974_v6  ;;  %4794 = vmatpush.msra.mxu0 %v4767_v38  ;;  %v5073_v38 = vand.u32 4294901760, %v5072_v35 }
 0x22f   :  { %v2879_v27 = vadd.f32 %v2878_v59, %v2855_v25  ;;  %v12030_v49 = vsub.f32 %v4880_v14, %v12024_v28 }
 0x231   :  { %v12020_v17 = vadd.f32 %v2900_v15, %v2879_v27  ;;  %4575 = vmatmul.f32.vlgmr.msrb.gmra.mxu3 %v11901_v55  ;;  %4651 = vmatmul.f32.vlgmr.msra.gmra.mxu2 %v11909_v8  ;;  %v12039_v11 = vand.u32 4294901760, %v12030_v49 }
 0x232   :  { %v3000_v29 = vpop.f32.mrf.mxu1  ;;  %4771 = vmatpush.msrb.mxu3 %v4770_v20  ;;  %4843 = vmatpush.msra.mxu2 %v4768_v16  ;;  %v3104_v6 = vpop.f32.mrf.mxu0 }
 0x233   :  { %v4902_v1 = vsub.f32 %v12030_v49, %v12039_v11 }
 0x234   :  { %v2952_v36 = vpop.f32.mrf.mxu3  ;;  %v3024_v4 = vpop.f32.mrf.mxu2 }
 0x235   :  { %4627 = vmatmul.f32.vlgmr.msra.gmra.mxu1 %v11901_v55  ;;  %v2953_v44 = vadd.f32 %v2952_v36, %v2927_v63  ;;  %4699 = vmatmul.f32.vlgmr.msrb.gmra.mxu0 %v11901_v55 }
 0x236   :  { %4817 = vmatpush.msra.mxu1 %v11993_v2  ;;  %4898 = vmatpush.msrb.mxu0 %v12008_v22 }
 0x237   :  { %v2977_v45 = vadd.f32 %v2976_v19, %v2953_v44 }
 0x239   :  { %v3001_v50 = vadd.f32 %v3000_v29, %v2977_v45  ;;  %4675 = vmatmul.f32.vlgmr.msra.gmra.mxu3 %v11918_v21  ;;  %4747 = vmatmul.f32.vlgmr.msrb.gmra.mxu2 %v11932_v39 }
 0x23a   :  { %v3130_v54 = vpop.f32.mrf.mxu1  ;;  %4865 = vmatpush.msra.mxu3 %v11993_v2  ;;  %4951 = vmatpush.msrb.mxu2 %v4924_v41  ;;  %v3202_v31 = vpop.f32.mrf.mxu0  ;;  %v12052_v2 = vand.u32 4294901760, %v4902_v1  ;;  %v5362_v41 = vsub.f32 %v11563_v30, %v5335_v57  ;;  %v12087_v30 = vand.u32 4294901760, %v11572_v51 }
 0x23b   :  { %v3131_v43 = vadd.f32 %v3130_v54, %v3104_v6  ;;  %v3025_v58 = vadd.f32 %v3024_v4, %v3001_v50 }
 0x23c   :  { %v3046_v26 = vpop.f32.mrf.mxu3  ;;  %v3154_v42 = vpop.f32.mrf.mxu2  ;;  %v5508_v50 = vsub.f32 %v11572_v51, %v12087_v30 }
 0x23d   :  { %4721 = vmatmul.f32.vlgmr.msrb.gmra.mxu1 %v11901_v55  ;;  %v12045_v9 = vadd.f32 %v3046_v26, %v3025_v58  ;;  %4797 = vmatmul.f32.vlgmr.msra.gmra.mxu0 %v11909_v8  ;;  %v3155_v39 = vadd.f32 %v3154_v42, %v3131_v43  ;;  %v12057_v8 = vand.u32 4294901760, %v11558_v12 }
 0x23e   :  { %4928 = vmatpush.msrb.mxu1 %v4927_v34  ;;  %5000 = vmatpush.msra.mxu0 %v4925_v33  ;;  %v5363_v33 = vand.u32 4294901760, %v5362_v41  ;;  %v5509_v26 = vand.u32 4294901760, %v5508_v50 }
 0x23f   :  { %v5216_v37 = vsub.f32 %v11558_v12, %v12057_v8 }
 0x240   :  { %v5364_v47 = vsub.f32 %v5362_v41, %v5363_v33  ;;  %v5510_v1 = vsub.f32 %v5508_v50, %v5509_v26 }
 0x241   :  { %4773 = vmatmul.f32.vlgmr.msrb.gmra.mxu3 %v11901_v55  ;;  %4845 = vmatmul.f32.vlgmr.msra.gmra.mxu2 %v11901_v55  ;;  %v5217_v16 = vand.u32 4294901760, %v5216_v37 }
 0x242   :  { %v3224_v40 = vpop.f32.mrf.mxu1  ;;  %4974 = vmatpush.msrb.mxu3 %v12008_v22  ;;  %5044 = vmatpush.msra.mxu2 %v12034_v48  ;;  %v3300_v62 = vpop.f32.mrf.mxu0  ;;  %v5365_v54 = vand.u32 4294901760, %v5364_v47 }
 0x244   :  { %v3178_v3 = vpop.f32.mrf.mxu3  ;;  %v3250_v5 = vpop.f32.mrf.mxu2 }
 0x245   :  { %4821 = vmatmul.f32.vlgmr.msra.gmra.mxu1 %v11918_v21  ;;  %v3179_v59 = vadd.f32 %v3178_v3, %v3155_v39  ;;  %4904 = vmatmul.f32.vlgmr.msrb.gmra.mxu0 %v12052_v2 }
 0x246   :  { %5022 = vmatpush.msra.mxu1 %v12008_v22  ;;  %5097 = vmatpush.msrb.mxu0 %v5070_v61 }
 0x247   :  { %v3203_v46 = vadd.f32 %v3202_v31, %v3179_v59 }
 0x249   :  { %v3225_v7 = vadd.f32 %v3224_v40, %v3203_v46  ;;  %4867 = vmatmul.f32.vlgmr.msra.gmra.mxu3 %v11901_v55  ;;  %4954 = vmatmul.f32.vlgmr.msrb.gmra.mxu2 %v12030_v49  ;;  %v5218_v55 = vsub.f32 %v5216_v37, %v5217_v16 }
 0x24a   :  { %v3324_v13 = vpop.f32.mrf.mxu1  ;;  %5074 = vmatpush.msra.mxu3 %v5073_v38  ;;  %5146 = vmatpush.msrb.mxu2 %v5071_v32  ;;  %v3396_v21 = vpop.f32.mrf.mxu0  ;;  %v12103_v32 = vand.u32 4294901760, %v11581_v60 }
 0x24b   :  { %v12067_v10 = vadd.f32 %v3225_v7, %v11949_v52  ;;  %v5219_v63 = vand.u32 4294901760, %v5218_v55 }
 0x24c   :  { %v3276_v15 = vpop.f32.mrf.mxu3  ;;  %v3348_v19 = vpop.f32.mrf.mxu2  ;;  %v5654_v46 = vsub.f32 %v11581_v60, %v12103_v32 }
 0x24d   :  { %4930 = vmatmul.f32.vlgmr.msrb.gmra.mxu1 %v12024_v28  ;;  %v3277_v22 = vadd.f32 %v3276_v15, %v3250_v5  ;;  %5002 = vmatmul.f32.vlgmr.msra.gmra.mxu0 %v12024_v28  ;;  %v5511_v5 = vand.u32 4294901760, %v5510_v1 }
 0x24e   :  { %5120 = vmatpush.msrb.mxu1 %v12034_v48  ;;  %5190 = vmatpush.msra.mxu0 %v12057_v8  ;;  %v5655_v15 = vand.u32 4294901760, %v5654_v46 }
 0x24f   :  { %v3301_v12 = vadd.f32 %v3300_v62, %v3277_v22 }
 0x251   :  { %v3325_v23 = vadd.f32 %v3324_v13, %v3301_v12  ;;  %4978 = vmatmul.f32.vlgmr.msrb.gmra.mxu3 %v12039_v11  ;;  %5050 = vmatmul.f32.vlgmr.msra.gmra.mxu2 %v12052_v2  ;;  %v5781_v13 = vpop.permute.xlu2 %5780 }
 0x252   :  { %v3422_v52 = vpop.f32.mrf.mxu1  ;;  %5168 = vmatpush.msrb.mxu3 %v12034_v48  ;;  %5243 = vmatpush.msra.mxu2 %v5216_v37  ;;  %v3494_v56 = vpop.f32.mrf.mxu0 }
 0x253   :  { %v3423_v53 = vadd.f32 %v3422_v52, %v3396_v21  ;;  %v3349_v25 = vadd.f32 %v3348_v19, %v3325_v23  ;;  %v5783_v37 = vpop.permute.xlu0 %5782 }
 0x254   :  { %v3370_v14 = vpop.f32.mrf.mxu3  ;;  %v3446_v27 = vpop.f32.mrf.mxu2 }
 0x255   :  { %5024 = vmatmul.f32.vlgmr.msra.gmra.mxu1 %v12024_v28  ;;  %v3371_v20 = vadd.f32 %v3370_v14, %v3349_v25  ;;  %5100 = vmatmul.f32.vlgmr.msrb.gmra.mxu0 %v12030_v49  ;;  %v3447_v29 = vadd.f32 %v3446_v27, %v3423_v53 }
 0x256   :  { %5220 = vmatpush.msra.mxu1 %v5219_v63  ;;  %5292 = vmatpush.msrb.mxu0 %v5217_v16  ;;  %v5795_v16 = vsel %vm5794_vm6, %v5781_v13, %v5783_v37 }
 0x257   :  { %v12081_v6 = vadd.f32 %v3371_v20, %v11966_v24  ;;  %v12119_v22 = vand.u32 4294901760, %v5795_v16 }
 0x259   :  { %5076 = vmatmul.f32.vlgmr.msra.gmra.mxu3 %v12024_v28  ;;  %5148 = vmatmul.f32.vlgmr.msrb.gmra.mxu2 %v12024_v28  ;;  %v5852_v53 = vsub.f32 %v5795_v16, %v12119_v22 }
 0x25a   :  { %v3516_v36 = vpop.f32.mrf.mxu1  ;;  %5266 = vmatpush.msra.mxu3 %v12057_v8  ;;  %5336 = vmatpush.msrb.mxu2 %v5335_v57  ;;  %v3592_v4 = vpop.f32.mrf.mxu0 }
 0x25c   :  { %v3470_v44 = vpop.f32.mrf.mxu3  ;;  %v3542_v45 = vpop.f32.mrf.mxu2 }
 0x25d   :  { %5124 = vmatmul.f32.vlgmr.msrb.gmra.mxu1 %v12039_v11  ;;  %v3471_v24 = vadd.f32 %v3470_v44, %v3447_v29  ;;  %5196 = vmatmul.f32.vlgmr.msra.gmra.mxu0 %v12052_v2  ;;  %v5853_v29 = vand.u32 4294901760, %v5852_v53 }
 0x25e   :  { %5314 = vmatpush.msrb.mxu1 %v12057_v8  ;;  %5389 = vmatpush.msra.mxu0 %v5362_v41  ;;  %v5785_v41 = vpop.permute.xlu1 %5784 }
 0x25f   :  { %v3495_v48 = vadd.f32 %v3494_v56, %v3471_v24  ;;  %v5854_v47 = vsub.f32 %v5852_v53, %v5853_v29 }
 0x261   :  { %v3517_v43 = vadd.f32 %v3516_v36, %v3495_v48  ;;  %5170 = vmatmul.f32.vlgmr.msrb.gmra.mxu3 %v12024_v28  ;;  %5246 = vmatmul.f32.vlgmr.msra.gmra.mxu2 %v12030_v49 }
 0x262   :  { %v3616_v31 = vpop.f32.mrf.mxu1  ;;  %5366 = vmatpush.msrb.mxu3 %v5365_v54  ;;  %5438 = vmatpush.msra.mxu2 %v5363_v33  ;;  %v3688_v58 = vpop.f32.mrf.mxu0 }
 0x263   :  { %v12097_v34 = vadd.f32 %v3517_v43, %v11984_v0 }
 0x264   :  { %v3568_v42 = vpop.f32.mrf.mxu3  ;;  %v3640_v61 = vpop.f32.mrf.mxu2 }
 0x265   :  { %5222 = vmatmul.f32.vlgmr.msra.gmra.mxu1 %v12024_v28  ;;  %v3569_v39 = vadd.f32 %v3568_v42, %v3542_v45  ;;  %5294 = vmatmul.f32.vlgmr.msrb.gmra.mxu0 %v12024_v28 }
 0x266   :  { %5412 = vmatpush.msra.mxu1 %v5335_v57  ;;  %5482 = vmatpush.msrb.mxu0 %v12087_v30 }
 0x267   :  { %v3593_v51 = vadd.f32 %v3592_v4, %v3569_v39 }
 0x269   :  { %v3617_v40 = vadd.f32 %v3616_v31, %v3593_v51  ;;  %5270 = vmatmul.f32.vlgmr.msra.gmra.mxu3 %v12039_v11  ;;  %5342 = vmatmul.f32.vlgmr.msrb.gmra.mxu2 %v12052_v2 }
 0x26a   :  { %v3714_v0 = vpop.f32.mrf.mxu1  ;;  %5460 = vmatpush.msra.mxu3 %v5335_v57  ;;  %5535 = vmatpush.msrb.mxu2 %v5508_v50  ;;  %v3786_v8 = vpop.f32.mrf.mxu0  ;;  %v5656_v57 = vsub.f32 %v5654_v46, %v5655_v15 }
 0x26b   :  { %v3715_v62 = vadd.f32 %v3714_v0, %v3688_v58  ;;  %v3641_v3 = vadd.f32 %v3640_v61, %v3617_v40 }
 0x26c   :  { %v3662_v35 = vpop.f32.mrf.mxu3  ;;  %v3738_v59 = vpop.f32.mrf.mxu2  ;;  %v5657_v25 = vand.u32 4294901760, %v5656_v57 }
 0x26d   :  { %5316 = vmatmul.f32.vlgmr.msrb.gmra.mxu1 %v12024_v28  ;;  %v3663_v38 = vadd.f32 %v3662_v35, %v3641_v3  ;;  %5392 = vmatmul.f32.vlgmr.msra.gmra.mxu0 %v12030_v49  ;;  %v3739_v7 = vadd.f32 %v3738_v59, %v3715_v62 }
 0x26e   :  { %5512 = vmatpush.msrb.mxu1 %v5511_v5  ;;  %5584 = vmatpush.msra.mxu0 %v5509_v26  ;;  %v5855_v26 = vand.u32 4294901760, %v5854_v47 }
 0x26f   :  { %v12112_v21 = vadd.f32 %v3663_v38, %v12000_v18  ;;  %v11020_v18 = vld [vmem:[%s13098_s4 + $0x28] sm:$0xff] }
 0x270   :  { %v5808_v52 = vsel %vm1263_vm1, %v11020_v18, 0 }
 0x271   :  { %5368 = vmatmul.f32.vlgmr.msrb.gmra.mxu3 %v12024_v28  ;;  %5440 = vmatmul.f32.vlgmr.msra.gmra.mxu2 %v12024_v28  ;;  %v12131_v27 = vand.u32 4294901760, %v5808_v52 }
 0x272   :  { %v3808_v60 = vpop.f32.mrf.mxu1  ;;  %5558 = vmatpush.msrb.mxu3 %v12087_v30  ;;  %5628 = vmatpush.msra.mxu2 %v12103_v32  ;;  %v3884_v19 = vpop.f32.mrf.mxu0 }
 0x273   :  { %v12141_v45 = vsub.f32 %v5808_v52, %v12131_v27 }
 0x274   :  { %v3762_v12 = vpop.f32.mrf.mxu3  ;;  %v3834_v55 = vpop.f32.mrf.mxu2 }
 0x275   :  { %5416 = vmatmul.f32.vlgmr.msra.gmra.mxu1 %v12039_v11  ;;  %v3763_v23 = vadd.f32 %v3762_v12, %v3739_v7  ;;  %5488 = vmatmul.f32.vlgmr.msrb.gmra.mxu0 %v12052_v2  ;;  %v12149_v54 = vand.u32 4294901760, %v12141_v45 }
 0x276   :  { %5606 = vmatpush.msra.mxu1 %v12087_v30  ;;  %5681 = vmatpush.msrb.mxu0 %v5654_v46  ;;  %v5796_v30 = vsel %vm5794_vm6, %v5783_v37, %v5785_v41 }
 0x277   :  { %v3787_v56 = vadd.f32 %v3786_v8, %v3763_v23  ;;  %v5830_v1 = vsub.f32 %v12141_v45, %v12149_v54 }
 0x279   :  { %v3809_v63 = vadd.f32 %v3808_v60, %v3787_v56  ;;  %5462 = vmatmul.f32.vlgmr.msra.gmra.mxu3 %v12024_v28  ;;  %5538 = vmatmul.f32.vlgmr.msrb.gmra.mxu2 %v12030_v49  ;;  %v12163_v8 = vand.u32 4294901760, %v5830_v1 }
 0x27a   :  { %v3908_v14 = vpop.f32.mrf.mxu1  ;;  %5658 = vmatpush.msra.mxu3 %v5657_v25  ;;  %5730 = vmatpush.msrb.mxu2 %v5655_v15  ;;  %v4018_v20 = vpop.f32.mrf.mxu0 }
 0x27b   :  { %v12134_v33 = vadd.f32 %v3809_v63, %v12020_v17  ;;  %v12144_v17 = vand.u32 4294901760, %v5796_v30  ;;  %v5789_v15 = vpop.permute.xlu0 %5788 }
 0x27c   :  { %v3860_v36 = vpop.f32.mrf.mxu3  ;;  %v3932_v4 = vpop.f32.mrf.mxu2 }
 0x27d   :  { %5514 = vmatmul.f32.vlgmr.msrb.gmra.mxu1 %v12024_v28  ;;  %v3861_v44 = vadd.f32 %v3860_v36, %v3834_v55  ;;  %5586 = vmatmul.f32.vlgmr.msra.gmra.mxu0 %v12024_v28  ;;  %v5998_v42 = vsub.f32 %v5796_v30, %v12144_v17 }
 0x27e   :  { %5704 = vmatpush.msrb.mxu1 %v12103_v32  ;;  %5826 = vmatpush.msra.mxu0 %v12119_v22 }
 0x27f   :  { %v3885_v24 = vadd.f32 %v3884_v19, %v3861_v44  ;;  %v5999_v62 = vand.u32 4294901760, %v5998_v42 }
 0x281   :  { %v3909_v48 = vadd.f32 %v3908_v14, %v3885_v24  ;;  %5562 = vmatmul.f32.vlgmr.msrb.gmra.mxu3 %v12039_v11  ;;  %5634 = vmatmul.f32.vlgmr.msra.gmra.mxu2 %v12052_v2  ;;  %v6000_v35 = vsub.f32 %v5998_v42, %v5999_v62 }
 0x282   :  { %v4044_v50 = vpop.f32.mrf.mxu1  ;;  %5752 = vmatpush.msrb.mxu3 %v12103_v32  ;;  %5879 = vmatpush.msra.mxu2 %v5852_v53  ;;  %v4116_v31 = vpop.f32.mrf.mxu0 }
 0x283   :  { %v4045_v43 = vadd.f32 %v4044_v50, %v4018_v20  ;;  %v3933_v58 = vadd.f32 %v3932_v4, %v3909_v48  ;;  %v5787_v32 = vpop.permute.xlu2 %5786  ;;  %v6001_v7 = vand.u32 4294901760, %v6000_v35 }
 0x284   :  { %v3954_v61 = vpop.f32.mrf.mxu3  ;;  %v4068_v39 = vpop.f32.mrf.mxu2  ;;  %v5797_v0 = vsel %vm5794_vm6, %v5785_v41, %v5787_v32  ;;  %v5798_v12 = vsel %vm5794_vm6, %v5787_v32, %v5789_v15 }
 0x285   :  { %5608 = vmatmul.f32.vlgmr.msra.gmra.mxu1 %v12024_v28  ;;  %v3955_v51 = vadd.f32 %v3954_v61, %v3933_v58  ;;  %5684 = vmatmul.f32.vlgmr.msrb.gmra.mxu0 %v12030_v49  ;;  %v4069_v2 = vadd.f32 %v4068_v39, %v4045_v43  ;;  %v12167_v5 = vand.u32 4294901760, %v5797_v0  ;;  %v12183_v23 = vand.u32 4294901760, %v5798_v12 }
 0x286   :  { %5856 = vmatpush.msra.mxu1 %v5855_v26  ;;  %5928 = vmatpush.msrb.mxu0 %v5853_v29  ;;  %v5791_v29 = vpop.permute.xlu1 %5790 }
 0x287   :  { %v12158_v40 = vadd.f32 %v3955_v51, %v12045_v9  ;;  %v6144_v37 = vsub.f32 %v5797_v0, %v12167_v5  ;;  %v6290_v14 = vsub.f32 %v5798_v12, %v12183_v23  ;;  %v5799_v47 = vsel %vm5794_vm6, %v5789_v15, %v5791_v29 }
 0x288   :  { %v12199_v48 = vand.u32 4294901760, %v5799_v47 }
 0x289   :  { %5660 = vmatmul.f32.vlgmr.msra.gmra.mxu3 %v12024_v28  ;;  %5732 = vmatmul.f32.vlgmr.msrb.gmra.mxu2 %v12024_v28  ;;  %v6145_v60 = vand.u32 4294901760, %v6144_v37  ;;  %v6291_v44 = vand.u32 4294901760, %v6290_v14 }
 0x28a   :  { %v4138_v49 = vpop.f32.mrf.mxu1  ;;  %5902 = vmatpush.msra.mxu3 %v12119_v22  ;;  %5972 = vmatpush.msrb.mxu2 %v12144_v17  ;;  %v4214_v3 = vpop.f32.mrf.mxu0  ;;  %v6436_v58 = vsub.f32 %v5799_v47, %v12199_v48 }
 0x28b   :  { %v6292_v50 = vsub.f32 %v6290_v14, %v6291_v44 }
 0x28c   :  { %v4092_v9 = vpop.f32.mrf.mxu3  ;;  %v4164_v59 = vpop.f32.mrf.mxu2  ;;  %v6437_v1 = vand.u32 4294901760, %v6436_v58 }
 0x28d   :  { %5708 = vmatmul.f32.vlgmr.msrb.gmra.mxu1 %v12039_v11  ;;  %v4093_v46 = vadd.f32 %v4092_v9, %v4069_v2  ;;  %5832 = vmatmul.f32.vlgmr.msra.gmra.mxu0 %v12163_v8  ;;  %v5793_v2 = vpop.permute.xlu2 %5792 }
 0x28e   :  { %5950 = vmatpush.msrb.mxu1 %v12119_v22  ;;  %6025 = vmatpush.msra.mxu0 %v5998_v42  ;;  %v6293_v42 = vand.u32 4294901760, %v6292_v50 }
 0x28f   :  { %v4117_v38 = vadd.f32 %v4116_v31, %v4093_v46 }
 0x291   :  { %v4139_v13 = vadd.f32 %v4138_v49, %v4117_v38  ;;  %5754 = vmatmul.f32.vlgmr.msrb.gmra.mxu3 %v12024_v28  ;;  %5882 = vmatmul.f32.vlgmr.msra.gmra.mxu2 %v12141_v45  ;;  %v6146_v28 = vsub.f32 %v6144_v37, %v6145_v60  ;;  %v5800_v49 = vsel %vm5794_vm6, %v5791_v29, %v5793_v2 }
 0x292   :  { %v4238_v16 = vpop.f32.mrf.mxu1  ;;  %6002 = vmatpush.msrb.mxu3 %v6001_v7  ;;  %6074 = vmatpush.msra.mxu2 %v5999_v62  ;;  %v4310_v11 = vpop.f32.mrf.mxu0  ;;  %v12215_v9 = vand.u32 4294901760, %v5800_v49 }
 0x293   :  { %v12176_v19 = vadd.f32 %v4139_v13, %v12067_v10  ;;  %v6147_v63 = vand.u32 4294901760, %v6146_v28 }
 0x294   :  { %v4190_v22 = vpop.f32.mrf.mxu3  ;;  %v4262_v18 = vpop.f32.mrf.mxu2  ;;  %v6582_v13 = vsub.f32 %v5800_v49, %v12215_v9 }
 0x295   :  { %5858 = vmatmul.f32.vlgmr.msra.gmra.mxu1 %v12131_v27  ;;  %v4191_v55 = vadd.f32 %v4190_v22, %v4164_v59  ;;  %5930 = vmatmul.f32.vlgmr.msrb.gmra.mxu0 %v12131_v27  ;;  %v6699_v47 = vpop.permute.xlu2 %6698 }
 0x296   :  { %6048 = vmatpush.msra.mxu1 %v12144_v17  ;;  %6118 = vmatpush.msrb.mxu0 %v12167_v5 }
 0x297   :  { %v4215_v57 = vadd.f32 %v4214_v3, %v4191_v55  ;;  %v6583_v55 = vand.u32 4294901760, %v6582_v13 }
 0x299   :  { %v4239_v52 = vadd.f32 %v4238_v16, %v4215_v57  ;;  %5906 = vmatmul.f32.vlgmr.msra.gmra.mxu3 %v12149_v54  ;;  %5978 = vmatmul.f32.vlgmr.msrb.gmra.mxu2 %v12163_v8 }
 0x29a   :  { %v4336_v10 = vpop.f32.mrf.mxu1  ;;  %6096 = vmatpush.msra.mxu3 %v12144_v17  ;;  %6171 = vmatpush.msrb.mxu2 %v6144_v37  ;;  %v4408_v56 = vpop.f32.mrf.mxu0 }
 0x29b   :  { %v4337_v53 = vadd.f32 %v4336_v10, %v4310_v11  ;;  %v4263_v25 = vadd.f32 %v4262_v18, %v4239_v52  ;;  %v6697_v11 = vpop.permute.xlu1 %6696  ;;  %v6695_v18 = vpop.permute.xlu0 %6694  ;;  %v6584_v10 = vsub.f32 %v6582_v13, %v6583_v55 }
 0x29c   :  { %v4284_v41 = vpop.f32.mrf.mxu3  ;;  %v4360_v20 = vpop.f32.mrf.mxu2  ;;  %v6709_v28 = vsel %vm6708_vm7, %v6695_v18, %v6697_v11 }
 0x29d   :  { %5952 = vmatmul.f32.vlgmr.msrb.gmra.mxu1 %v12131_v27  ;;  %v4285_v36 = vadd.f32 %v4284_v41, %v4263_v25  ;;  %6028 = vmatmul.f32.vlgmr.msra.gmra.mxu0 %v12141_v45  ;;  %v4361_v4 = vadd.f32 %v4360_v20, %v4337_v53  ;;  %v12231_v52 = vand.u32 4294901760, %v6709_v28  ;;  %v6585_v20 = vand.u32 4294901760, %v6584_v10 }
 0x29e   :  { %6148 = vmatpush.msrb.mxu1 %v6147_v63  ;;  %6220 = vmatpush.msra.mxu0 %v6145_v60 }
 0x29f   :  { %v12192_v30 = vadd.f32 %v4285_v36, %v12081_v6 }
 0x2a1   :  { %6004 = vmatmul.f32.vlgmr.msrb.gmra.mxu3 %v12131_v27  ;;  %6076 = vmatmul.f32.vlgmr.msra.gmra.mxu2 %v12131_v27 }
 0x2a2   :  { %v4430_v24 = vpop.f32.mrf.mxu1  ;;  %6194 = vmatpush.msrb.mxu3 %v12167_v5  ;;  %6264 = vmatpush.msra.mxu2 %v12183_v23  ;;  %v4506_v17 = vpop.f32.mrf.mxu0 }
 0x2a4   :  { %v4384_v43 = vpop.f32.mrf.mxu3  ;;  %v4456_v6 = vpop.f32.mrf.mxu2 }
 0x2a5   :  { %6052 = vmatmul.f32.vlgmr.msra.gmra.mxu1 %v12149_v54  ;;  %v4385_v31 = vadd.f32 %v4384_v43, %v4361_v4  ;;  %6124 = vmatmul.f32.vlgmr.msrb.gmra.mxu0 %v12163_v8  ;;  %v6710_v43 = vsel %vm6708_vm7, %v6697_v11, %v6699_v47 }
 0x2a6   :  { %6242 = vmatpush.msra.mxu1 %v12167_v5  ;;  %6317 = vmatpush.msrb.mxu0 %v6290_v14  ;;  %v6438_v5 = vsub.f32 %v6436_v58, %v6437_v1  ;;  %v6766_v14 = vsub.f32 %v6709_v28, %v12231_v52  ;;  %v6703_v28 = vpop.permute.xlu1 %6702 }
 0x2a7   :  { %v4409_v26 = vadd.f32 %v4408_v56, %v4385_v31 }
 0x2a8   :  { %v6439_v7 = vand.u32 4294901760, %v6438_v5  ;;  %v6701_v5 = vpop.permute.xlu0 %6700 }
 0x2a9   :  { %v4431_v61 = vadd.f32 %v4430_v24, %v4409_v26  ;;  %6098 = vmatmul.f32.vlgmr.msra.gmra.mxu3 %v12131_v27  ;;  %6174 = vmatmul.f32.vlgmr.msrb.gmra.mxu2 %v12141_v45  ;;  %v6767_v24 = vand.u32 4294901760, %v6766_v14  ;;  %v6712_v10 = vsel %vm6708_vm7, %v6701_v5, %v6703_v28 }
 0x2aa   :  { %v4530_v39 = vpop.f32.mrf.mxu1  ;;  %6294 = vmatpush.msra.mxu3 %v6293_v42  ;;  %6366 = vmatpush.msrb.mxu2 %v6291_v44  ;;  %v4602_v51 = vpop.f32.mrf.mxu0 }
 0x2ab   :  { %v12208_v32 = vadd.f32 %v4431_v61, %v12097_v34 }
 0x2ac   :  { %v4482_v0 = vpop.f32.mrf.mxu3  ;;  %v4554_v62 = vpop.f32.mrf.mxu2 }
 0x2ad   :  { %6150 = vmatmul.f32.vlgmr.msrb.gmra.mxu1 %v12131_v27  ;;  %v4483_v3 = vadd.f32 %v4482_v0, %v4456_v6  ;;  %6222 = vmatmul.f32.vlgmr.msra.gmra.mxu0 %v12131_v27 }
 0x2ae   :  { %6340 = vmatpush.msrb.mxu1 %v12183_v23  ;;  %6410 = vmatpush.msra.mxu0 %v12199_v48 }
 0x2af   :  { %v4507_v35 = vadd.f32 %v4506_v17, %v4483_v3 }
 0x2b1   :  { %v4531_v59 = vadd.f32 %v4530_v39, %v4507_v35  ;;  %6198 = vmatmul.f32.vlgmr.msrb.gmra.mxu3 %v12149_v54  ;;  %6270 = vmatmul.f32.vlgmr.msra.gmra.mxu2 %v12163_v8 }
 0x2b2   :  { %v4628_v34 = vpop.f32.mrf.mxu1  ;;  %6388 = vmatpush.msrb.mxu3 %v12183_v23  ;;  %6463 = vmatpush.msra.mxu2 %v6436_v58  ;;  %v4700_v37 = vpop.f32.mrf.mxu0  ;;  %v6768_v58 = vsub.f32 %v6766_v14, %v6767_v24 }
 0x2b3   :  { %v4629_v46 = vadd.f32 %v4628_v34, %v4602_v51  ;;  %v4555_v38 = vadd.f32 %v4554_v62, %v4531_v59  ;;  %v6711_v34 = vsel %vm6708_vm7, %v6699_v47, %v6701_v5  ;;  %v6707_v5 = vpop.permute.xlu0 %6706 }
 0x2b4   :  { %v4576_v16 = vpop.f32.mrf.mxu3  ;;  %v4652_v15 = vpop.f32.mrf.mxu2  ;;  %v6769_v0 = vand.u32 4294901760, %v6768_v58 }
 0x2b5   :  { %6244 = vmatmul.f32.vlgmr.msra.gmra.mxu1 %v12131_v27  ;;  %v4577_v60 = vadd.f32 %v4576_v16, %v4555_v38  ;;  %6320 = vmatmul.f32.vlgmr.msrb.gmra.mxu0 %v12141_v45  ;;  %v4653_v22 = vadd.f32 %v4652_v15, %v4629_v46 }
 0x2b6   :  { %6440 = vmatpush.msra.mxu1 %v6439_v7  ;;  %6512 = vmatpush.msrb.mxu0 %v6437_v1  ;;  %v12279_v7 = vand.u32 4294901760, %v6711_v34 }
 0x2b7   :  { %v12224_v12 = vadd.f32 %v4577_v60, %v12112_v21  ;;  %v11021_v21 = vld [vmem:[%s13098_s4 + $0x30] sm:$0xff] }
 0x2b8   :  { %v6722_v63 = vsel %vm1263_vm1, %v11021_v21, 0  ;;  %v7058_v11 = vsub.f32 %v6711_v34, %v12279_v7 }
 0x2b9   :  { %6296 = vmatmul.f32.vlgmr.msra.gmra.mxu3 %v12131_v27  ;;  %6368 = vmatmul.f32.vlgmr.msrb.gmra.mxu2 %v12131_v27  ;;  %v12243_v4 = vand.u32 4294901760, %v6722_v63 }
 0x2ba   :  { %v4722_v57 = vpop.f32.mrf.mxu1  ;;  %6486 = vmatpush.msra.mxu3 %v12199_v48  ;;  %6556 = vmatpush.msrb.mxu2 %v12215_v9  ;;  %v4798_v23 = vpop.f32.mrf.mxu0 }
 0x2bb   :  { %v12253_v31 = vsub.f32 %v6722_v63, %v12243_v4 }
 0x2bc   :  { %v4676_v53 = vpop.f32.mrf.mxu3  ;;  %v4748_v56 = vpop.f32.mrf.mxu2 }
 0x2bd   :  { %6344 = vmatmul.f32.vlgmr.msrb.gmra.mxu1 %v12149_v54  ;;  %v4677_v25 = vadd.f32 %v4676_v53, %v4653_v22  ;;  %6416 = vmatmul.f32.vlgmr.msra.gmra.mxu0 %v12163_v8  ;;  %v12261_v39 = vand.u32 4294901760, %v12253_v31 }
 0x2be   :  { %6534 = vmatpush.msrb.mxu1 %v12199_v48  ;;  %6609 = vmatpush.msra.mxu0 %v6582_v13 }
 0x2bf   :  { %v4701_v41 = vadd.f32 %v4700_v37, %v4677_v25  ;;  %v12295_v25 = vand.u32 4294901760, %v6712_v10 }
 0x2c1   :  { %v4723_v29 = vadd.f32 %v4722_v57, %v4701_v41  ;;  %6390 = vmatmul.f32.vlgmr.msrb.gmra.mxu3 %v12131_v27  ;;  %6466 = vmatmul.f32.vlgmr.msra.gmra.mxu2 %v12141_v45  ;;  %v7059_v57 = vand.u32 4294901760, %v7058_v11 }
 0x2c2   :  { %v4822_v36 = vpop.f32.mrf.mxu1  ;;  %6586 = vmatpush.msrb.mxu3 %v6585_v20  ;;  %6658 = vmatpush.msra.mxu2 %v6583_v55  ;;  %v4905_v44 = vpop.f32.mrf.mxu0 }
 0x2c3   :  { %v12246_v17 = vadd.f32 %v4723_v29, %v12134_v33  ;;  %v12256_v33 = vand.u32 4294901760, %v6710_v43 }
 0x2c4   :  { %v4774_v48 = vpop.f32.mrf.mxu3  ;;  %v4846_v50 = vpop.f32.mrf.mxu2 }
 0x2c5   :  { %6442 = vmatmul.f32.vlgmr.msra.gmra.mxu1 %v12131_v27  ;;  %v4775_v6 = vadd.f32 %v4774_v48, %v4748_v56  ;;  %6514 = vmatmul.f32.vlgmr.msrb.gmra.mxu0 %v12131_v27  ;;  %v6912_v62 = vsub.f32 %v6710_v43, %v12256_v33 }
 0x2c6   :  { %6632 = vmatpush.msra.mxu1 %v12215_v9  ;;  %6740 = vmatpush.msrb.mxu0 %v12231_v52 }
 0x2c7   :  { %v4799_v26 = vadd.f32 %v4798_v23, %v4775_v6  ;;  %v6913_v46 = vand.u32 4294901760, %v6912_v62 }
 0x2c9   :  { %v4823_v42 = vadd.f32 %v4822_v36, %v4799_v26  ;;  %6490 = vmatmul.f32.vlgmr.msra.gmra.mxu3 %v12149_v54  ;;  %6562 = vmatmul.f32.vlgmr.msrb.gmra.mxu2 %v12163_v8  ;;  %v6914_v13 = vsub.f32 %v6912_v62, %v6913_v46  ;;  %v7204_v36 = vsub.f32 %v6712_v10, %v12295_v25 }
 0x2ca   :  { %v4931_v61 = vpop.f32.mrf.mxu1  ;;  %6680 = vmatpush.msra.mxu3 %v12215_v9  ;;  %6793 = vmatpush.msrb.mxu2 %v6766_v14  ;;  %v5003_v2 = vpop.f32.mrf.mxu0  ;;  %v6744_v9 = vsub.f32 %v12253_v31, %v12261_v39 }
 0x2cb   :  { %v4932_v51 = vadd.f32 %v4931_v61, %v4905_v44  ;;  %v4847_v1 = vadd.f32 %v4846_v50, %v4823_v42  ;;  %v6915_v22 = vand.u32 4294901760, %v6914_v13  ;;  %v6705_v50 = vpop.permute.xlu2 %6704  ;;  %v7205_v58 = vand.u32 4294901760, %v7204_v36 }
 0x2cc   :  { %v4868_v49 = vpop.f32.mrf.mxu3  ;;  %v4955_v3 = vpop.f32.mrf.mxu2  ;;  %v12275_v37 = vand.u32 4294901760, %v6744_v9  ;;  %v6713_v6 = vsel %vm6708_vm7, %v6703_v28, %v6705_v50 }
 0x2cd   :  { %6536 = vmatmul.f32.vlgmr.msrb.gmra.mxu1 %v12131_v27  ;;  %v4869_v35 = vadd.f32 %v4868_v49, %v4847_v1  ;;  %6612 = vmatmul.f32.vlgmr.msra.gmra.mxu0 %v12141_v45  ;;  %v4956_v8 = vadd.f32 %v4955_v3, %v4932_v51  ;;  %v12311_v42 = vand.u32 4294901760, %v6713_v6  ;;  %v7206_v61 = vsub.f32 %v7204_v36, %v7205_v58 }
 0x2ce   :  { %6770 = vmatpush.msrb.mxu1 %v6769_v0  ;;  %6842 = vmatpush.msra.mxu0 %v6767_v24 }
 0x2cf   :  { %v12270_v59 = vadd.f32 %v4869_v35, %v12158_v40  ;;  %v7350_v1 = vsub.f32 %v6713_v6, %v12311_v42  ;;  %v7613_v6 = vpop.permute.xlu0 %7612 }
 0x2d1   :  { %6588 = vmatmul.f32.vlgmr.msrb.gmra.mxu3 %v12131_v27  ;;  %6660 = vmatmul.f32.vlgmr.msra.gmra.mxu2 %v12131_v27 }
 0x2d2   :  { %v5025_v38 = vpop.f32.mrf.mxu1  ;;  %6816 = vmatpush.msrb.mxu3 %v12231_v52  ;;  %6886 = vmatpush.msra.mxu2 %v12256_v33  ;;  %v5101_v45 = vpop.f32.mrf.mxu0 }
 0x2d4   :  { %v4979_v40 = vpop.f32.mrf.mxu3  ;;  %v5051_v16 = vpop.f32.mrf.mxu2 }
 0x2d5   :  { %6636 = vmatmul.f32.vlgmr.msra.gmra.mxu1 %v12149_v54  ;;  %v4980_v15 = vadd.f32 %v4979_v40, %v4956_v8  ;;  %6746 = vmatmul.f32.vlgmr.msrb.gmra.mxu0 %v12275_v37  ;;  %v7351_v8 = vand.u32 4294901760, %v7350_v1 }
 0x2d6   :  { %6864 = vmatpush.msra.mxu1 %v12231_v52  ;;  %6939 = vmatpush.msrb.mxu0 %v6912_v62  ;;  %v7207_v62 = vand.u32 4294901760, %v7206_v61 }
 0x2d7   :  { %v5004_v60 = vadd.f32 %v5003_v2, %v4980_v15 }
 0x2d9   :  { %v5026_v18 = vadd.f32 %v5025_v38, %v5004_v60  ;;  %6682 = vmatmul.f32.vlgmr.msra.gmra.mxu3 %v12131_v27  ;;  %6796 = vmatmul.f32.vlgmr.msrb.gmra.mxu2 %v12253_v31  ;;  %v7060_v27 = vsub.f32 %v7058_v11, %v7059_v57  ;;  %v6714_v38 = vsel %vm6708_vm7, %v6705_v50, %v6707_v5 }
 0x2da   :  { %v5125_v55 = vpop.f32.mrf.mxu1  ;;  %6916 = vmatpush.msra.mxu3 %v6915_v22  ;;  %6988 = vmatpush.msrb.mxu2 %v6913_v46  ;;  %v5197_v54 = vpop.f32.mrf.mxu0  ;;  %v12327_v40 = vand.u32 4294901760, %v6714_v38 }
 0x2db   :  { %v12288_v23 = vadd.f32 %v5026_v18, %v12176_v19  ;;  %v7061_v29 = vand.u32 4294901760, %v7060_v27 }
 0x2dc   :  { %v5077_v52 = vpop.f32.mrf.mxu3  ;;  %v5149_v21 = vpop.f32.mrf.mxu2  ;;  %v7496_v18 = vsub.f32 %v6714_v38, %v12327_v40 }
 0x2dd   :  { %6772 = vmatmul.f32.vlgmr.msrb.gmra.mxu1 %v12243_v4  ;;  %v5078_v53 = vadd.f32 %v5077_v52, %v5051_v16  ;;  %6844 = vmatmul.f32.vlgmr.msra.gmra.mxu0 %v12243_v4 }
 0x2de   :  { %6962 = vmatpush.msrb.mxu1 %v12256_v33  ;;  %7032 = vmatpush.msra.mxu0 %v12279_v7 }
 0x2df   :  { %v5102_v56 = vadd.f32 %v5101_v45, %v5078_v53  ;;  %v7497_v53 = vand.u32 4294901760, %v7496_v18 }
 0x2e1   :  { %v5126_v63 = vadd.f32 %v5125_v55, %v5102_v56  ;;  %6820 = vmatmul.f32.vlgmr.msrb.gmra.mxu3 %v12261_v39  ;;  %6892 = vmatmul.f32.vlgmr.msra.gmra.mxu2 %v12275_v37 }
 0x2e2   :  { %v5223_v19 = vpop.f32.mrf.mxu1  ;;  %7010 = vmatpush.msrb.mxu3 %v12256_v33  ;;  %7085 = vmatpush.msra.mxu2 %v7058_v11  ;;  %v5295_v41 = vpop.f32.mrf.mxu0 }
 0x2e3   :  { %v5224_v14 = vadd.f32 %v5223_v19, %v5197_v54  ;;  %v5150_v20 = vadd.f32 %v5149_v21, %v5126_v63  ;;  %v7609_v54 = vpop.permute.xlu1 %7608  ;;  %v7611_v21 = vpop.permute.xlu2 %7610  ;;  %v7498_v19 = vsub.f32 %v7496_v18, %v7497_v53 }
 0x2e4   :  { %v5171_v44 = vpop.f32.mrf.mxu3  ;;  %v5247_v47 = vpop.f32.mrf.mxu2  ;;  %v7623_v27 = vsel %vm7622_vm8, %v7609_v54, %v7611_v21 }
 0x2e5   :  { %6866 = vmatmul.f32.vlgmr.msra.gmra.mxu1 %v12243_v4  ;;  %v5172_v24 = vadd.f32 %v5171_v44, %v5150_v20  ;;  %6942 = vmatmul.f32.vlgmr.msrb.gmra.mxu0 %v12253_v31  ;;  %v5248_v48 = vadd.f32 %v5247_v47, %v5224_v14  ;;  %v12343_v63 = vand.u32 4294901760, %v7623_v27  ;;  %v7499_v47 = vand.u32 4294901760, %v7498_v19 }
 0x2e6   :  { %7062 = vmatpush.msra.mxu1 %v7061_v29  ;;  %7134 = vmatpush.msrb.mxu0 %v7059_v57 }
 0x2e7   :  { %v12304_v43 = vadd.f32 %v5172_v24, %v12192_v30 }
 0x2e9   :  { %6918 = vmatmul.f32.vlgmr.msra.gmra.mxu3 %v12243_v4  ;;  %6990 = vmatmul.f32.vlgmr.msrb.gmra.mxu2 %v12243_v4 }
 0x2ea   :  { %v5317_v26 = vpop.f32.mrf.mxu1  ;;  %7108 = vmatpush.msra.mxu3 %v12279_v7  ;;  %7178 = vmatpush.msrb.mxu2 %v12295_v25  ;;  %v5393_v33 = vpop.f32.mrf.mxu0 }
 0x2ec   :  { %v5271_v51 = vpop.f32.mrf.mxu3  ;;  %v5343_v30 = vpop.f32.mrf.mxu2 }
 0x2ed   :  { %6966 = vmatmul.f32.vlgmr.msrb.gmra.mxu1 %v12261_v39  ;;  %v5272_v2 = vadd.f32 %v5271_v51, %v5248_v48  ;;  %7038 = vmatmul.f32.vlgmr.msra.gmra.mxu0 %v12275_v37  ;;  %v7624_v51 = vsel %vm7622_vm8, %v7611_v21, %v7613_v6 }
 0x2ee   :  { %7156 = vmatpush.msrb.mxu1 %v12279_v7  ;;  %7231 = vmatpush.msra.mxu0 %v7204_v36  ;;  %v7352_v7 = vsub.f32 %v7350_v1, %v7351_v8  ;;  %v7680_v36 = vsub.f32 %v7623_v27, %v12343_v63  ;;  %v7617_v27 = vpop.permute.xlu2 %7616 }
 0x2ef   :  { %v5296_v0 = vadd.f32 %v5295_v41, %v5272_v2 }
 0x2f0   :  { %v7353_v22 = vand.u32 4294901760, %v7352_v7  ;;  %v7615_v7 = vpop.permute.xlu1 %7614 }
 0x2f1   :  { %v5318_v49 = vadd.f32 %v5317_v26, %v5296_v0  ;;  %7012 = vmatmul.f32.vlgmr.msrb.gmra.mxu3 %v12243_v4  ;;  %7088 = vmatmul.f32.vlgmr.msra.gmra.mxu2 %v12253_v31  ;;  %v7681_v26 = vand.u32 4294901760, %v7680_v36  ;;  %v7626_v19 = vsel %vm7622_vm8, %v7615_v7, %v7617_v27 }
 0x2f2   :  { %v5417_v3 = vpop.f32.mrf.mxu1  ;;  %7208 = vmatpush.msrb.mxu3 %v7207_v62  ;;  %7280 = vmatpush.msra.mxu2 %v7205_v58  ;;  %v5489_v35 = vpop.f32.mrf.mxu0 }
 0x2f3   :  { %v12320_v9 = vadd.f32 %v5318_v49, %v12208_v32 }
 0x2f4   :  { %v5369_v34 = vpop.f32.mrf.mxu3  ;;  %v5441_v46 = vpop.f32.mrf.mxu2 }
 0x2f5   :  { %7064 = vmatmul.f32.vlgmr.msra.gmra.mxu1 %v12243_v4  ;;  %v5370_v45 = vadd.f32 %v5369_v34, %v5343_v30  ;;  %7136 = vmatmul.f32.vlgmr.msrb.gmra.mxu0 %v12243_v4 }
 0x2f6   :  { %7254 = vmatpush.msra.mxu1 %v12295_v25  ;;  %7324 = vmatpush.msrb.mxu0 %v12311_v42 }
 0x2f7   :  { %v5394_v13 = vadd.f32 %v5393_v33, %v5370_v45 }
 0x2f9   :  { %v5418_v16 = vadd.f32 %v5417_v3, %v5394_v13  ;;  %7112 = vmatmul.f32.vlgmr.msra.gmra.mxu3 %v12261_v39  ;;  %7184 = vmatmul.f32.vlgmr.msrb.gmra.mxu2 %v12275_v37 }
 0x2fa   :  { %v5515_v32 = vpop.f32.mrf.mxu1  ;;  %7302 = vmatpush.msra.mxu3 %v12295_v25  ;;  %7377 = vmatpush.msrb.mxu2 %v7350_v1  ;;  %v5587_v11 = vpop.f32.mrf.mxu0  ;;  %v7682_v1 = vsub.f32 %v7680_v36, %v7681_v26 }
 0x2fb   :  { %v5516_v15 = vadd.f32 %v5515_v32, %v5489_v35  ;;  %v5442_v60 = vadd.f32 %v5441_v46, %v5418_v16 }
 0x2fc   :  { %v5463_v55 = vpop.f32.mrf.mxu3  ;;  %v5539_v28 = vpop.f32.mrf.mxu2  ;;  %v7683_v34 = vand.u32 4294901760, %v7682_v1 }
 0x2fd   :  { %7158 = vmatmul.f32.vlgmr.msrb.gmra.mxu1 %v12243_v4  ;;  %v5464_v57 = vadd.f32 %v5463_v55, %v5442_v60  ;;  %7234 = vmatmul.f32.vlgmr.msra.gmra.mxu0 %v12253_v31  ;;  %v5540_v52 = vadd.f32 %v5539_v28, %v5516_v15  ;;  %v7625_v15 = vsel %vm7622_vm8, %v7613_v6, %v7615_v7  ;;  %v7621_v7 = vpop.permute.xlu1 %7620 }
 0x2fe   :  { %7354 = vmatpush.msrb.mxu1 %v7353_v22  ;;  %7426 = vmatpush.msra.mxu0 %v7351_v8  ;;  %v12391_v22 = vand.u32 4294901760, %v7625_v15 }
 0x2ff   :  { %v12336_v10 = vadd.f32 %v5464_v57, %v12224_v12  ;;  %v11022_v12 = vld [vmem:[%s13098_s4 + $0x38] sm:$0xff] }
 0x300   :  { %v7636_v29 = vsel %vm1263_vm1, %v11022_v12, 0  ;;  %v7972_v54 = vsub.f32 %v7625_v15, %v12391_v22 }
 0x301   :  { %7210 = vmatmul.f32.vlgmr.msrb.gmra.mxu3 %v12243_v4  ;;  %7282 = vmatmul.f32.vlgmr.msra.gmra.mxu2 %v12243_v4  ;;  %v12355_v50 = vand.u32 4294901760, %v7636_v29 }
 0x302   :  { %v5609_v56 = vpop.f32.mrf.mxu1  ;;  %7400 = vmatpush.msrb.mxu3 %v12311_v42  ;;  %7470 = vmatpush.msra.mxu2 %v12327_v40  ;;  %v5685_v25 = vpop.f32.mrf.mxu0 }
 0x303   :  { %v12365_v2 = vsub.f32 %v7636_v29, %v12355_v50 }
 0x304   :  { %v5563_v14 = vpop.f32.mrf.mxu3  ;;  %v5635_v41 = vpop.f32.mrf.mxu2 }
 0x305   :  { %7258 = vmatmul.f32.vlgmr.msra.gmra.mxu1 %v12261_v39  ;;  %v5564_v20 = vadd.f32 %v5563_v14, %v5540_v52  ;;  %7330 = vmatmul.f32.vlgmr.msrb.gmra.mxu0 %v12275_v37  ;;  %v12373_v3 = vand.u32 4294901760, %v12365_v2 }
 0x306   :  { %7448 = vmatpush.msra.mxu1 %v12311_v42  ;;  %7523 = vmatpush.msrb.mxu0 %v7496_v18 }
 0x307   :  { %v5588_v44 = vadd.f32 %v5587_v11, %v5564_v20  ;;  %v12407_v20 = vand.u32 4294901760, %v7626_v19 }
 0x309   :  { %v5610_v24 = vadd.f32 %v5609_v56, %v5588_v44  ;;  %7304 = vmatmul.f32.vlgmr.msra.gmra.mxu3 %v12243_v4  ;;  %7380 = vmatmul.f32.vlgmr.msrb.gmra.mxu2 %v12253_v31  ;;  %v7973_v56 = vand.u32 4294901760, %v7972_v54 }
 0x30a   :  { %v5709_v48 = vpop.f32.mrf.mxu1  ;;  %7500 = vmatpush.msra.mxu3 %v7499_v47  ;;  %7572 = vmatpush.msrb.mxu2 %v7497_v53  ;;  %v5833_v58 = vpop.f32.mrf.mxu0 }
 0x30b   :  { %v12358_v33 = vadd.f32 %v5610_v24, %v12246_v17  ;;  %v12368_v17 = vand.u32 4294901760, %v7624_v51 }
 0x30c   :  { %v5661_v42 = vpop.f32.mrf.mxu3  ;;  %v5733_v61 = vpop.f32.mrf.mxu2 }
 0x30d   :  { %7356 = vmatmul.f32.vlgmr.msrb.gmra.mxu1 %v12243_v4  ;;  %v5662_v30 = vadd.f32 %v5661_v42, %v5635_v41  ;;  %7428 = vmatmul.f32.vlgmr.msra.gmra.mxu0 %v12243_v4  ;;  %v7826_v46 = vsub.f32 %v7624_v51, %v12368_v17 }
 0x30e   :  { %7546 = vmatpush.msrb.mxu1 %v12327_v40  ;;  %7654 = vmatpush.msra.mxu0 %v12343_v63 }
 0x30f   :  { %v5686_v0 = vadd.f32 %v5685_v25, %v5662_v30  ;;  %v7827_v32 = vand.u32 4294901760, %v7826_v46 }
 0x311   :  { %v5710_v62 = vadd.f32 %v5709_v48, %v5686_v0  ;;  %7404 = vmatmul.f32.vlgmr.msrb.gmra.mxu3 %v12261_v39  ;;  %7476 = vmatmul.f32.vlgmr.msra.gmra.mxu2 %v12275_v37  ;;  %v7828_v18 = vsub.f32 %v7826_v46, %v7827_v32  ;;  %v8118_v48 = vsub.f32 %v7626_v19, %v12407_v20 }
 0x312   :  { %v5859_v49 = vpop.f32.mrf.mxu1  ;;  %7594 = vmatpush.msrb.mxu3 %v12327_v40  ;;  %7707 = vmatpush.msra.mxu2 %v7680_v36  ;;  %v5931_v35 = vpop.f32.mrf.mxu0  ;;  %v7658_v40 = vsub.f32 %v12365_v2, %v12373_v3 }
 0x313   :  { %v5860_v5 = vadd.f32 %v5859_v49, %v5833_v58  ;;  %v5734_v8 = vadd.f32 %v5733_v61, %v5710_v62  ;;  %v7829_v52 = vand.u32 4294901760, %v7828_v18  ;;  %v8119_v1 = vand.u32 4294901760, %v8118_v48 }
 0x314   :  { %v5755_v38 = vpop.f32.mrf.mxu3  ;;  %v5883_v45 = vpop.f32.mrf.mxu2  ;;  %v12387_v11 = vand.u32 4294901760, %v7658_v40 }
 0x315   :  { %7450 = vmatmul.f32.vlgmr.msra.gmra.mxu1 %v12243_v4  ;;  %v5756_v13 = vadd.f32 %v5755_v38, %v5734_v8  ;;  %7526 = vmatmul.f32.vlgmr.msrb.gmra.mxu0 %v12253_v31  ;;  %v5884_v37 = vadd.f32 %v5883_v45, %v5860_v5  ;;  %v8120_v49 = vsub.f32 %v8118_v48, %v8119_v1 }
 0x316   :  { %7684 = vmatpush.msra.mxu1 %v7683_v34  ;;  %7756 = vmatpush.msrb.mxu0 %v7681_v26  ;;  %v7619_v26 = vpop.permute.xlu0 %7618 }
 0x317   :  { %v12382_v16 = vadd.f32 %v5756_v13, %v12270_v59  ;;  %v7627_v30 = vsel %vm7622_vm8, %v7617_v27, %v7619_v26 }
 0x318   :  { %v12423_v62 = vand.u32 4294901760, %v7627_v30 }
 0x319   :  { %7502 = vmatmul.f32.vlgmr.msra.gmra.mxu3 %v12243_v4  ;;  %7574 = vmatmul.f32.vlgmr.msrb.gmra.mxu2 %v12243_v4 }
 0x31a   :  { %v5953_v60 = vpop.f32.mrf.mxu1  ;;  %7730 = vmatpush.msra.mxu3 %v12343_v63  ;;  %7800 = vmatpush.msrb.mxu2 %v12368_v17  ;;  %v6029_v31 = vpop.f32.mrf.mxu0  ;;  %v8264_v8 = vsub.f32 %v7627_v30, %v12423_v62 }
 0x31b   :  { %v8527_v30 = vpop.permute.xlu1 %8526 }
 0x31c   :  { %v5907_v59 = vpop.f32.mrf.mxu3  ;;  %v5979_v55 = vpop.f32.mrf.mxu2 }
 0x31d   :  { %7550 = vmatmul.f32.vlgmr.msrb.gmra.mxu1 %v12261_v39  ;;  %v5908_v28 = vadd.f32 %v5907_v59, %v5884_v37  ;;  %7660 = vmatmul.f32.vlgmr.msra.gmra.mxu0 %v12387_v11  ;;  %v8265_v37 = vand.u32 4294901760, %v8264_v8 }
 0x31e   :  { %7778 = vmatpush.msrb.mxu1 %v12343_v63  ;;  %7853 = vmatpush.msra.mxu0 %v7826_v46  ;;  %v8121_v46 = vand.u32 4294901760, %v8120_v49  ;;  %v8525_v27 = vpop.permute.xlu0 %8524 }
 0x31f   :  { %v5932_v57 = vadd.f32 %v5931_v35, %v5908_v28 }
 0x321   :  { %v5954_v21 = vadd.f32 %v5953_v60, %v5932_v57  ;;  %7596 = vmatmul.f32.vlgmr.msrb.gmra.mxu3 %v12243_v4  ;;  %7710 = vmatmul.f32.vlgmr.msra.gmra.mxu2 %v12365_v2  ;;  %v7974_v4 = vsub.f32 %v7972_v54, %v7973_v56  ;;  %v7628_v60 = vsel %vm7622_vm8, %v7619_v26, %v7621_v7 }
 0x322   :  { %v6053_v53 = vpop.f32.mrf.mxu1  ;;  %7830 = vmatpush.msrb.mxu3 %v7829_v52  ;;  %7902 = vmatpush.msra.mxu2 %v7827_v32  ;;  %v6125_v39 = vpop.f32.mrf.mxu0  ;;  %v12439_v59 = vand.u32 4294901760, %v7628_v60 }
 0x323   :  { %v12400_v25 = vadd.f32 %v5954_v21, %v12288_v23  ;;  %v7975_v24 = vand.u32 4294901760, %v7974_v4 }
 0x324   :  { %v6005_v63 = vpop.f32.mrf.mxu3  ;;  %v6077_v12 = vpop.f32.mrf.mxu2  ;;  %v8410_v21 = vsub.f32 %v7628_v60, %v12439_v59 }
 0x325   :  { %7686 = vmatmul.f32.vlgmr.msra.gmra.mxu1 %v12355_v50  ;;  %v6006_v14 = vadd.f32 %v6005_v63, %v5979_v55  ;;  %7758 = vmatmul.f32.vlgmr.msrb.gmra.mxu0 %v12355_v50 }
 0x326   :  { %7876 = vmatpush.msra.mxu1 %v12368_v17  ;;  %7946 = vmatpush.msrb.mxu0 %v12391_v22  ;;  %v8411_v4 = vand.u32 4294901760, %v8410_v21 }
 0x327   :  { %v6030_v41 = vadd.f32 %v6029_v31, %v6006_v14 }
 0x329   :  { %v6054_v29 = vadd.f32 %v6053_v53, %v6030_v41  ;;  %7734 = vmatmul.f32.vlgmr.msra.gmra.mxu3 %v12373_v3  ;;  %7806 = vmatmul.f32.vlgmr.msrb.gmra.mxu2 %v12387_v11 }
 0x32a   :  { %v6151_v23 = vpop.f32.mrf.mxu1  ;;  %7924 = vmatpush.msra.mxu3 %v12368_v17  ;;  %7999 = vmatpush.msrb.mxu2 %v7972_v54  ;;  %v6223_v44 = vpop.f32.mrf.mxu0 }
 0x32b   :  { %v6152_v36 = vadd.f32 %v6151_v23, %v6125_v39  ;;  %v6078_v47 = vadd.f32 %v6077_v12, %v6054_v29  ;;  %v8523_v12 = vpop.permute.xlu2 %8522  ;;  %v8412_v23 = vsub.f32 %v8410_v21, %v8411_v4 }
 0x32c   :  { %v6099_v6 = vpop.f32.mrf.mxu3  ;;  %v6175_v58 = vpop.f32.mrf.mxu2  ;;  %v8537_v14 = vsel %vm8536_vm9, %v8523_v12, %v8525_v27 }
 0x32d   :  { %7780 = vmatmul.f32.vlgmr.msrb.gmra.mxu1 %v12355_v50  ;;  %v6100_v42 = vadd.f32 %v6099_v6, %v6078_v47  ;;  %7856 = vmatmul.f32.vlgmr.msra.gmra.mxu0 %v12365_v2  ;;  %v6176_v61 = vadd.f32 %v6175_v58, %v6152_v36  ;;  %v12455_v29 = vand.u32 4294901760, %v8537_v14  ;;  %v8413_v58 = vand.u32 4294901760, %v8412_v23 }
 0x32e   :  { %7976 = vmatpush.msrb.mxu1 %v7975_v24  ;;  %8048 = vmatpush.msra.mxu0 %v7973_v56 }
 0x32f   :  { %v12416_v51 = vadd.f32 %v6100_v42, %v12304_v43 }
 0x331   :  { %7832 = vmatmul.f32.vlgmr.msrb.gmra.mxu3 %v12355_v50  ;;  %7904 = vmatmul.f32.vlgmr.msra.gmra.mxu2 %v12355_v50 }
 0x332   :  { %v6245_v0 = vpop.f32.mrf.mxu1  ;;  %8022 = vmatpush.msrb.mxu3 %v12391_v22  ;;  %8092 = vmatpush.msra.mxu2 %v12407_v20  ;;  %v6321_v17 = vpop.f32.mrf.mxu0 }
 0x334   :  { %v6199_v5 = vpop.f32.mrf.mxu3  ;;  %v6271_v43 = vpop.f32.mrf.mxu2 }
 0x335   :  { %7880 = vmatmul.f32.vlgmr.msra.gmra.mxu1 %v12373_v3  ;;  %v6200_v35 = vadd.f32 %v6199_v5, %v6176_v61  ;;  %7952 = vmatmul.f32.vlgmr.msrb.gmra.mxu0 %v12387_v11  ;;  %v8538_v5 = vsel %vm8536_vm9, %v8525_v27, %v8527_v30 }
 0x336   :  { %8070 = vmatpush.msra.mxu1 %v12391_v22  ;;  %8145 = vmatpush.msrb.mxu0 %v8118_v48  ;;  %v8266_v22 = vsub.f32 %v8264_v8, %v8265_v37  ;;  %v8594_v48 = vsub.f32 %v8537_v14, %v12455_v29 }
 0x337   :  { %v6224_v34 = vadd.f32 %v6223_v44, %v6200_v35 }
 0x338   :  { %v8267_v52 = vand.u32 4294901760, %v8266_v22 }
 0x339   :  { %v6246_v38 = vadd.f32 %v6245_v0, %v6224_v34  ;;  %7926 = vmatmul.f32.vlgmr.msra.gmra.mxu3 %v12355_v50  ;;  %8002 = vmatmul.f32.vlgmr.msrb.gmra.mxu2 %v12365_v2  ;;  %v8595_v0 = vand.u32 4294901760, %v8594_v48 }
 0x33a   :  { %v6345_v45 = vpop.f32.mrf.mxu1  ;;  %8122 = vmatpush.msra.mxu3 %v8121_v46  ;;  %8194 = vmatpush.msrb.mxu2 %v8119_v1  ;;  %v6417_v13 = vpop.f32.mrf.mxu0 }
 0x33b   :  { %v12432_v40 = vadd.f32 %v6246_v38, %v12320_v9 }
 0x33c   :  { %v6297_v32 = vpop.f32.mrf.mxu3  ;;  %v6369_v15 = vpop.f32.mrf.mxu2 }
 0x33d   :  { %7978 = vmatmul.f32.vlgmr.msrb.gmra.mxu1 %v12355_v50  ;;  %v6298_v31 = vadd.f32 %v6297_v32, %v6271_v43  ;;  %8050 = vmatmul.f32.vlgmr.msra.gmra.mxu0 %v12355_v50 }
 0x33e   :  { %8168 = vmatpush.msrb.mxu1 %v12407_v20  ;;  %8238 = vmatpush.msra.mxu0 %v12423_v62 }
 0x33f   :  { %v6322_v18 = vadd.f32 %v6321_v17, %v6298_v31 }
 0x341   :  { %v6346_v55 = vadd.f32 %v6345_v45, %v6322_v18  ;;  %8026 = vmatmul.f32.vlgmr.msrb.gmra.mxu3 %v12373_v3  ;;  %8098 = vmatmul.f32.vlgmr.msra.gmra.mxu2 %v12387_v11 }
 0x342   :  { %v6443_v9 = vpop.f32.mrf.mxu1  ;;  %8216 = vmatpush.msrb.mxu3 %v12407_v20  ;;  %8291 = vmatpush.msra.mxu2 %v8264_v8  ;;  %v6515_v54 = vpop.f32.mrf.mxu0  ;;  %v8596_v8 = vsub.f32 %v8594_v48, %v8595_v0 }
 0x343   :  { %v6444_v28 = vadd.f32 %v6443_v9, %v6417_v13  ;;  %v6370_v57 = vadd.f32 %v6369_v15, %v6346_v55 }
 0x344   :  { %v6391_v53 = vpop.f32.mrf.mxu3  ;;  %v6467_v39 = vpop.f32.mrf.mxu2  ;;  %v8597_v32 = vand.u32 4294901760, %v8596_v8 }
 0x345   :  { %8072 = vmatmul.f32.vlgmr.msra.gmra.mxu1 %v12355_v50  ;;  %v6392_v56 = vadd.f32 %v6391_v53, %v6370_v57  ;;  %8148 = vmatmul.f32.vlgmr.msrb.gmra.mxu0 %v12365_v2  ;;  %v6468_v63 = vadd.f32 %v6467_v39, %v6444_v28 }
 0x346   :  { %8268 = vmatpush.msra.mxu1 %v8267_v52  ;;  %8340 = vmatpush.msrb.mxu0 %v8265_v37 }
 0x347   :  { %v12448_v19 = vadd.f32 %v6392_v56, %v12336_v10  ;;  %v11023_v10 = vld [vmem:[%s13098_s4 + $0x40] sm:$0xff] }
 0x348   :  { %v8550_v24 = vsel %vm1263_vm1, %v11023_v10, 0 }
 0x349   :  { %8124 = vmatmul.f32.vlgmr.msra.gmra.mxu3 %v12355_v50  ;;  %8196 = vmatmul.f32.vlgmr.msrb.gmra.mxu2 %v12355_v50  ;;  %v12467_v61 = vand.u32 4294901760, %v8550_v24 }
 0x34a   :  { %v6537_v41 = vpop.f32.mrf.mxu1  ;;  %8314 = vmatpush.msra.mxu3 %v12423_v62  ;;  %8384 = vmatpush.msrb.mxu2 %v12439_v59  ;;  %v6613_v20 = vpop.f32.mrf.mxu0 }
 0x34b   :  { %v12477_v35 = vsub.f32 %v8550_v24, %v12467_v61 }
 0x34c   :  { %v6491_v36 = vpop.f32.mrf.mxu3  ;;  %v6563_v44 = vpop.f32.mrf.mxu2 }
 0x34d   :  { %8172 = vmatmul.f32.vlgmr.msrb.gmra.mxu1 %v12373_v3  ;;  %v6492_v47 = vadd.f32 %v6491_v36, %v6468_v63  ;;  %8244 = vmatmul.f32.vlgmr.msra.gmra.mxu0 %v12387_v11  ;;  %v12485_v45 = vand.u32 4294901760, %v12477_v35 }
 0x34e   :  { %8362 = vmatpush.msrb.mxu1 %v12423_v62  ;;  %8437 = vmatpush.msra.mxu0 %v8410_v21 }
 0x34f   :  { %v6516_v6 = vadd.f32 %v6515_v54, %v6492_v47  ;;  %v8572_v18 = vsub.f32 %v12477_v35, %v12485_v45 }
 0x351   :  { %v6538_v26 = vadd.f32 %v6537_v41, %v6516_v6  ;;  %8218 = vmatmul.f32.vlgmr.msrb.gmra.mxu3 %v12355_v50  ;;  %8294 = vmatmul.f32.vlgmr.msra.gmra.mxu2 %v12365_v2  ;;  %v12499_v54 = vand.u32 4294901760, %v8572_v18 }
 0x352   :  { %v6637_v42 = vpop.f32.mrf.mxu1  ;;  %8414 = vmatpush.msrb.mxu3 %v8413_v58  ;;  %8486 = vmatpush.msra.mxu2 %v8411_v4  ;;  %v6747_v1 = vpop.f32.mrf.mxu0 }
 0x353   :  { %v12470_v17 = vadd.f32 %v6538_v26, %v12358_v33  ;;  %v12480_v33 = vand.u32 4294901760, %v8538_v5  ;;  %v8531_v4 = vpop.permute.xlu0 %8530 }
 0x354   :  { %v6589_v62 = vpop.f32.mrf.mxu3  ;;  %v6661_v49 = vpop.f32.mrf.mxu2 }
 0x355   :  { %13103 = vst [vmem:[#allocation6_spill] sm:$0xff] %v12470_v17  ;;  %8270 = vmatmul.f32.vlgmr.msra.gmra.mxu1 %v12355_v50  ;;  %v6590_v43 = vadd.f32 %v6589_v62, %v6563_v44  ;;  %8342 = vmatmul.f32.vlgmr.msrb.gmra.mxu0 %v12355_v50  ;;  %v8740_v15 = vsub.f32 %v8538_v5, %v12480_v33 }
 0x356   :  { %8460 = vmatpush.msra.mxu1 %v12439_v59  ;;  %8568 = vmatpush.msrb.mxu0 %v12455_v29 }
 0x357   :  { %v6614_v34 = vadd.f32 %v6613_v20, %v6590_v43  ;;  %v8741_v28 = vand.u32 4294901760, %v8740_v15 }
 0x359   :  { %v6638_v46 = vadd.f32 %v6637_v42, %v6614_v34  ;;  %8318 = vmatmul.f32.vlgmr.msra.gmra.mxu3 %v12373_v3  ;;  %8390 = vmatmul.f32.vlgmr.msrb.gmra.mxu2 %v12387_v11  ;;  %v8742_v21 = vsub.f32 %v8740_v15, %v8741_v28 }
 0x35a   :  { %v6773_v38 = vpop.f32.mrf.mxu1  ;;  %8508 = vmatpush.msra.mxu3 %v12439_v59  ;;  %8621 = vmatpush.msrb.mxu2 %v8594_v48  ;;  %v6845_v13 = vpop.f32.mrf.mxu0 }
 0x35b   :  { %v6774_v7 = vadd.f32 %v6773_v38, %v6747_v1  ;;  %v6662_v37 = vadd.f32 %v6661_v49, %v6638_v46  ;;  %v8529_v59 = vpop.permute.xlu2 %8528  ;;  %v8743_v63 = vand.u32 4294901760, %v8742_v21  ;;  %v8533_v1 = vpop.permute.xlu1 %8532 }
 0x35c   :  { %v6683_v60 = vpop.f32.mrf.mxu3  ;;  %v6797_v31 = vpop.f32.mrf.mxu2  ;;  %v8539_v9 = vsel %vm8536_vm9, %v8527_v30, %v8529_v59  ;;  %v8540_v23 = vsel %vm8536_vm9, %v8529_v59, %v8531_v4  ;;  %v8541_v5 = vsel %vm8536_vm9, %v8531_v4, %v8533_v1 }
 0x35d   :  { %8364 = vmatmul.f32.vlgmr.msrb.gmra.mxu1 %v12355_v50  ;;  %v6684_v22 = vadd.f32 %v6683_v60, %v6662_v37  ;;  %8440 = vmatmul.f32.vlgmr.msra.gmra.mxu0 %v12365_v2  ;;  %v6798_v11 = vadd.f32 %v6797_v31, %v6774_v7  ;;  %v12503_v52 = vand.u32 4294901760, %v8539_v9  ;;  %v9005_v47 = vand.u32 4294901760, %v8540_v23 }
 0x35e   :  { %8598 = vmatpush.msrb.mxu1 %v8597_v32  ;;  %8670 = vmatpush.msra.mxu0 %v8595_v0  ;;  %v9151_v34 = vand.u32 4294901760, %v8541_v5 }
 0x35f   :  { %v12494_v55 = vadd.f32 %v6684_v22, %v12382_v16  ;;  %v8886_v27 = vsub.f32 %v8539_v9, %v12503_v52  ;;  %v9032_v26 = vsub.f32 %v8540_v23, %v9005_v47 }
 0x360   :  { %v9178_v38 = vsub.f32 %v8541_v5, %v9151_v34 }
 0x361   :  { %13104 = vst [vmem:[#allocation7_spill] sm:$0xff] %v12494_v55  ;;  %8416 = vmatmul.f32.vlgmr.msrb.gmra.mxu3 %v12355_v50  ;;  %8488 = vmatmul.f32.vlgmr.msra.gmra.mxu2 %v12355_v50  ;;  %v8887_v41 = vand.u32 4294901760, %v8886_v27  ;;  %v9033_v49 = vand.u32 4294901760, %v9032_v26 }
 0x362   :  { %v6867_v2 = vpop.f32.mrf.mxu1  ;;  %8644 = vmatpush.msrb.mxu3 %v12455_v29  ;;  %8714 = vmatpush.msra.mxu2 %v12480_v33  ;;  %v6943_v57 = vpop.f32.mrf.mxu0 }
 0x363   :  { %v8535_v37 = vpop.permute.xlu2 %8534 }
 0x364   :  { %v6821_v16 = vpop.f32.mrf.mxu3  ;;  %v6893_v53 = vpop.f32.mrf.mxu2  ;;  %v8542_v22 = vsel %vm8536_vm9, %v8533_v1, %v8535_v37 }
 0x365   :  { %8464 = vmatmul.f32.vlgmr.msra.gmra.mxu1 %v12373_v3  ;;  %v6822_v39 = vadd.f32 %v6821_v16, %v6798_v11  ;;  %8574 = vmatmul.f32.vlgmr.msrb.gmra.mxu0 %v12499_v54  ;;  %v9297_v18 = vand.u32 4294901760, %v8542_v22 }
 0x366   :  { %8692 = vmatpush.msra.mxu1 %v12455_v29  ;;  %8767 = vmatpush.msrb.mxu0 %v8740_v15  ;;  %v9179_v15 = vand.u32 4294901760, %v9178_v38 }
 0x367   :  { %v6846_v56 = vadd.f32 %v6845_v13, %v6822_v39 }
 0x368   :  { %v9180_v11 = vsub.f32 %v9178_v38, %v9179_v15 }
 0x369   :  { %v6868_v12 = vadd.f32 %v6867_v2, %v6846_v56  ;;  %8510 = vmatmul.f32.vlgmr.msra.gmra.mxu3 %v12355_v50  ;;  %8624 = vmatmul.f32.vlgmr.msrb.gmra.mxu2 %v12477_v35  ;;  %v8888_v50 = vsub.f32 %v8886_v27, %v8887_v41  ;;  %v9324_v2 = vsub.f32 %v8542_v22, %v9297_v18 }
 0x36a   :  { %v6967_v14 = vpop.f32.mrf.mxu1  ;;  %8744 = vmatpush.msra.mxu3 %v8743_v63  ;;  %8816 = vmatpush.msrb.mxu2 %v8741_v28  ;;  %v12511_v3 = vpop.f32.mrf.mxu0  ;;  %v9181_v28 = vand.u32 4294901760, %v9180_v11 }
 0x36b   :  { %v12514_v20 = vadd.f32 %v6868_v12, %v12400_v25  ;;  %v8889_v58 = vand.u32 4294901760, %v8888_v50  ;;  %v9325_v21 = vand.u32 4294901760, %v9324_v2 }
 0x36c   :  { %v6919_v29 = vpop.f32.mrf.mxu3  ;;  %v6991_v10 = vpop.f32.mrf.mxu2 }
 0x36d   :  { %8600 = vmatmul.f32.vlgmr.msrb.gmra.mxu1 %v12467_v61  ;;  %v6920_v36 = vadd.f32 %v6919_v29, %v6893_v53  ;;  %8672 = vmatmul.f32.vlgmr.msra.gmra.mxu0 %v12467_v61  ;;  %v9326_v39 = vsub.f32 %v9324_v2, %v9325_v21 }
 0x36e   :  { %8790 = vmatpush.msrb.mxu1 %v12480_v33  ;;  %8860 = vmatpush.msra.mxu0 %v12503_v52 }
 0x36f   :  { %v6944_v44 = vadd.f32 %v6943_v57, %v6920_v36  ;;  %v9327_v63 = vand.u32 4294901760, %v9326_v39 }
 0x371   :  { %v6968_v24 = vadd.f32 %v6967_v14, %v6944_v44  ;;  %8648 = vmatmul.f32.vlgmr.msrb.gmra.mxu3 %v12485_v45  ;;  %8720 = vmatmul.f32.vlgmr.msra.gmra.mxu2 %v12499_v54 }
 0x372   :  { %v12523_v25 = vpop.f32.mrf.mxu1  ;;  %8838 = vmatpush.msrb.mxu3 %v12480_v33  ;;  %8913 = vmatpush.msra.mxu2 %v8886_v27  ;;  %v12526_v48 = vpop.f32.mrf.mxu0  ;;  %v9034_v33 = vsub.f32 %v9032_v26, %v9033_v49 }
 0x373   :  { %v6992_v6 = vadd.f32 %v6991_v10, %v6968_v24 }
 0x374   :  { %v7013_v42 = vpop.f32.mrf.mxu3  ;;  %v12529_v30 = vpop.f32.mrf.mxu2  ;;  %v9035_v7 = vand.u32 4294901760, %v9034_v33 }
 0x375   :  { %8694 = vmatmul.f32.vlgmr.msra.gmra.mxu1 %v12467_v61  ;;  %v7014_v0 = vadd.f32 %v7013_v42, %v6992_v6  ;;  %8770 = vmatmul.f32.vlgmr.msrb.gmra.mxu0 %v12477_v35 }
 0x376   :  { %8890 = vmatpush.msra.mxu1 %v8889_v58  ;;  %8962 = vmatpush.msrb.mxu0 %v8887_v41 }
 0x377   :  { %v12533_v62 = vadd.f32 %v7014_v0, %v12416_v51 }
 0x379   :  { %8746 = vmatmul.f32.vlgmr.msra.gmra.mxu3 %v12467_v61  ;;  %8818 = vmatmul.f32.vlgmr.msrb.gmra.mxu2 %v12467_v61 }
 0x37a   :  { %v12538_v43 = vpop.f32.mrf.mxu1  ;;  %8936 = vmatpush.msra.mxu3 %v12503_v52  ;;  %9006 = vmatpush.msrb.mxu2 %v9005_v47  ;;  %v12541_v8 = vpop.f32.mrf.mxu0 }
 0x37c   :  { %v12543_v46 = vpop.f32.mrf.mxu3  ;;  %v12546_v51 = vpop.f32.mrf.mxu2 }
 0x37d   :  { %8794 = vmatmul.f32.vlgmr.msrb.gmra.mxu1 %v12485_v45  ;;  %8866 = vmatmul.f32.vlgmr.msra.gmra.mxu0 %v12499_v54 }
 0x37e   :  { %8984 = vmatpush.msrb.mxu1 %v12503_v52  ;;  %9059 = vmatpush.msra.mxu0 %v9032_v26 }
 0x381   :  { %8840 = vmatmul.f32.vlgmr.msrb.gmra.mxu3 %v12467_v61  ;;  %8916 = vmatmul.f32.vlgmr.msra.gmra.mxu2 %v12477_v35 }
 0x382   :  { %v12552_v13 = vpop.f32.mrf.mxu1  ;;  %9036 = vmatpush.msrb.mxu3 %v9035_v7  ;;  %9108 = vmatpush.msra.mxu2 %v9033_v49  ;;  %v12554_v32 = vpop.f32.mrf.mxu0 }
 0x384   :  { %v12556_v60 = vpop.f32.mrf.mxu3  ;;  %v12559_v31 = vpop.f32.mrf.mxu2 }
 0x385   :  { %8892 = vmatmul.f32.vlgmr.msra.gmra.mxu1 %v12467_v61  ;;  %8964 = vmatmul.f32.vlgmr.msrb.gmra.mxu0 %v12467_v61 }
 0x386   :  { %9082 = vmatpush.msra.mxu1 %v9005_v47  ;;  %9152 = vmatpush.msrb.mxu0 %v9151_v34 }
 0x389   :  { %8940 = vmatmul.f32.vlgmr.msra.gmra.mxu3 %v12485_v45  ;;  %9012 = vmatmul.f32.vlgmr.msrb.gmra.mxu2 %v12499_v54 }
 0x38a   :  { %v12565_v59 = vpop.f32.mrf.mxu1  ;;  %9130 = vmatpush.msra.mxu3 %v9005_v47  ;;  %9205 = vmatpush.msrb.mxu2 %v9178_v38  ;;  %v12567_v9 = vpop.f32.mrf.mxu0 }
 0x38b   :  { %13105 = vst [vmem:[#allocation8_spill] sm:$0xff] %v12567_v9 }
 0x38c   :  { %v12569_v57 = vpop.f32.mrf.mxu3  ;;  %v12572_v52 = vpop.f32.mrf.mxu2 }
 0x38d   :  { %8986 = vmatmul.f32.vlgmr.msrb.gmra.mxu1 %v12467_v61  ;;  %9062 = vmatmul.f32.vlgmr.msra.gmra.mxu0 %v12477_v35 }
 0x38e   :  { %9182 = vmatpush.msrb.mxu1 %v9181_v28  ;;  %9254 = vmatpush.msra.mxu0 %v9179_v15 }
 0x391   :  { %9038 = vmatmul.f32.vlgmr.msrb.gmra.mxu3 %v12467_v61  ;;  %9110 = vmatmul.f32.vlgmr.msra.gmra.mxu2 %v12467_v61 }
 0x392   :  { %v12577_v16 = vpop.f32.mrf.mxu1  ;;  %9228 = vmatpush.msrb.mxu3 %v9151_v34  ;;  %9298 = vmatpush.msra.mxu2 %v9297_v18  ;;  %v12579_v53 = vpop.f32.mrf.mxu0 }
 0x393   :  { %13106 = vst [vmem:[#allocation9_spill] sm:$0xff] %v12577_v16 }
 0x394   :  { %13107 = vst [vmem:[#allocation10_spill] sm:$0xff] %v12579_v53  ;;  %v12581_v27 = vpop.f32.mrf.mxu3  ;;  %v12584_v56 = vpop.f32.mrf.mxu2  ;;  %v9452_v53 = vld [vmem:[%s13100_s6] sm:$0xff] }
 0x395   :  { %9086 = vmatmul.f32.vlgmr.msra.gmra.mxu1 %v12485_v45  ;;  %13108 = vst [vmem:[#allocation11_spill] sm:$0xff] %v12584_v56  ;;  %9158 = vmatmul.f32.vlgmr.msrb.gmra.mxu0 %v12499_v54 }
 0x396   :  { %9276 = vmatpush.msra.mxu1 %v9151_v34  ;;  %9351 = vmatpush.msrb.mxu0 %v9324_v2 }
 0x399   :  { %9132 = vmatmul.f32.vlgmr.msra.gmra.mxu3 %v12467_v61  ;;  %9208 = vmatmul.f32.vlgmr.msrb.gmra.mxu2 %v12477_v35 }
 0x39a   :  { %v12589_v12 = vpop.f32.mrf.mxu1  ;;  %9328 = vmatpush.msra.mxu3 %v9327_v63  ;;  %9400 = vmatpush.msrb.mxu2 %v9325_v21  ;;  %v7661_v14 = vpop.f32.mrf.mxu0 }
 0x39b   :  { %13109 = vst [vmem:[#allocation12_spill] sm:$0xff] %v12589_v12 }
 0x39c   :  { %v12591_v4 = vpop.f32.mrf.mxu3  ;;  %v12594_v41 = vpop.f32.mrf.mxu2 }
 0x39d   :  { %13110 = vst [vmem:[#allocation13_spill] sm:$0xff] %v12591_v4  ;;  %9184 = vmatmul.f32.vlgmr.msrb.gmra.mxu1 %v12467_v61  ;;  %9256 = vmatmul.f32.vlgmr.msra.gmra.mxu0 %v12467_v61 }
 0x39e   :  { %13111 = vst [vmem:[#allocation14_spill] sm:$0xff] %v12594_v41  ;;  %9374 = vmatpush.msrb.mxu1 %v9297_v18 }
 0x3a1   :  { %9232 = vmatmul.f32.vlgmr.msrb.gmra.mxu3 %v12485_v45  ;;  %9304 = vmatmul.f32.vlgmr.msra.gmra.mxu2 %v12499_v54 }
 0x3a2   :  { %v7687_v29 = vpop.f32.mrf.mxu1  ;;  %9422 = vmatpush.msrb.mxu3 %v9297_v18  ;;  %v7759_v10 = vpop.f32.mrf.mxu0 }
 0x3a3   :  { %v7688_v41 = vadd.f32 %v7687_v29, %v7661_v14  ;;  %v9453_v14 = vld [vmem:[%s13100_s6 + $0x8] sm:$0xff] }
 0x3a4   :  { %v12599_v23 = vpop.f32.mrf.mxu3  ;;  %v7711_v36 = vpop.f32.mrf.mxu2 }
 0x3a5   :  { %13112 = vst [vmem:[#allocation15_spill] sm:$0xff] %v12599_v23  ;;  %9278 = vmatmul.f32.vlgmr.msra.gmra.mxu1 %v12467_v61  ;;  %9354 = vmatmul.f32.vlgmr.msrb.gmra.mxu0 %v12477_v35  ;;  %v7712_v4 = vadd.f32 %v7711_v36, %v7688_v41 }
 0x3a9   :  { %9330 = vmatmul.f32.vlgmr.msra.gmra.mxu3 %v12467_v61  ;;  %9402 = vmatmul.f32.vlgmr.msrb.gmra.mxu2 %v12467_v61 }
 0x3aa   :  { %v7781_v50 = vpop.f32.mrf.mxu1  ;;  %v7857_v44 = vpop.f32.mrf.mxu0 }
 0x3ac   :  { %v7735_v47 = vpop.f32.mrf.mxu3  ;;  %v7807_v24 = vpop.f32.mrf.mxu2 }
 0x3ad   :  { %9378 = vmatmul.f32.vlgmr.msrb.gmra.mxu1 %v12485_v45  ;;  %v7736_v17 = vadd.f32 %v7735_v47, %v7712_v4 }
 0x3b1   :  { %9424 = vmatmul.f32.vlgmr.msrb.gmra.mxu3 %v12467_v61 }
 0x3b2   :  { %v7881_v54 = vpop.f32.mrf.mxu1  ;;  %v12607_v6 = vpop.f32.mrf.mxu0 }
 0x3b4   :  { %v7833_v58 = vpop.f32.mrf.mxu3  ;;  %v7905_v26 = vpop.f32.mrf.mxu2 }
 0x3ba   :  { %v12609_v42 = vpop.f32.mrf.mxu1  ;;  %v12611_v35 = vpop.f32.mrf.mxu0 }
 0x3bc   :  { %v12613_v1 = vpop.f32.mrf.mxu3  ;;  %v12615_v0 = vpop.f32.mrf.mxu2 }
 0x3c2   :  { %v12617_v49 = vpop.f32.mrf.mxu1  ;;  %v12619_v5 = vpop.f32.mrf.mxu0 }
 0x3c4   :  { %v12621_v45 = vpop.f32.mrf.mxu3  ;;  %v12623_v61 = vpop.f32.mrf.mxu2 }
 0x3ca   :  { %v12625_v34 = vpop.f32.mrf.mxu1  ;;  %v12627_v33 = vpop.f32.mrf.mxu0 }
 0x3cc   :  { %v12629_v38 = vpop.f32.mrf.mxu3  ;;  %v12631_v7 = vpop.f32.mrf.mxu2 }
 0x3d2   :  { %v12633_v37 = vpop.f32.mrf.mxu1  ;;  %v12635_v15 = vpop.f32.mrf.mxu0 }
 0x3d3   :  { %13113 = vst [vmem:[#allocation16_spill] sm:$0xff] %v12635_v15 }
 0x3d4   :  { %v12637_v22 = vpop.f32.mrf.mxu3  ;;  %v12639_v11 = vpop.f32.mrf.mxu2 }
 0x3da   :  { %v12641_v18 = vpop.f32.mrf.mxu1  ;;  %v12643_v28 = vpop.f32.mrf.mxu0 }
 0x3db   :  { %13114 = vst [vmem:[#allocation17_spill] sm:$0xff] %v12641_v18 }
 0x3dc   :  { %13115 = vst [vmem:[#allocation18_spill] sm:$0xff] %v12643_v28  ;;  %v12645_v2 = vpop.f32.mrf.mxu3  ;;  %v12647_v21 = vpop.f32.mrf.mxu2 }
 0x3dd   :  { %13116 = vst [vmem:[#allocation19_spill] sm:$0xff] %v12647_v21  ;;  %v9481_v21 = vsel %vm1263_vm1, %v9452_v53, 0  ;;  %v9484_v53 = vsel %vm1263_vm1, %v9453_v14, 0 }
 0x3de   :  { %v12661_v15 = vand.u32 4294901760, %v9481_v21 }
 0x3e2   :  { %v12649_v39 = vpop.f32.mrf.mxu1  ;;  %v8575_v63 = vpop.f32.mrf.mxu0 }
 0x3e3   :  { %13117 = vst [vmem:[#allocation20_spill] sm:$0xff] %v12649_v39  ;;  %v7834_v39 = vadd.f32 %v7833_v58, %v7807_v24 }
 0x3e4   :  { %v12651_v55 = vpop.f32.mrf.mxu3  ;;  %v12653_v23 = vpop.f32.mrf.mxu2 }
 0x3e5   :  { %13118 = vst [vmem:[#allocation21_spill] sm:$0xff] %v12651_v55  ;;  %v7760_v55 = vadd.f32 %v7759_v10, %v7736_v17  ;;  %v7858_v29 = vadd.f32 %v7857_v44, %v7834_v39  ;;  %v9456_v17 = vld [vmem:[%s13101_s7] sm:$0xff] }
 0x3e6   :  { %13119 = vst [vmem:[#allocation22_spill] sm:$0xff] %v12653_v23  ;;  %9462 = vperm.xlu1 %11038, %v9456_v17  }
 0x3e7   :  { %v7782_v4 = vadd.f32 %v7781_v50, %v7760_v55  ;;  %v12682_v50 = vpop.permute.xlu0 %9437 }
 0x3e9   :  { %v8514_v58 = vadd.f32 %v7782_v4, %v12514_v20 }
 0x3ea   :  { %v8601_v12 = vpop.f32.mrf.mxu1  ;;  %v8673_v18 = vpop.f32.mrf.mxu0 }
 0x3eb   :  { %v8602_v16 = vadd.f32 %v8601_v12, %v8575_v63  ;;  %v7882_v12 = vadd.f32 %v7881_v54, %v7858_v29  ;;  %v7066_v54 = vadd.f32 %v12523_v25, %v12511_v3 }
 0x3ec   :  { %v12658_v56 = vpop.f32.mrf.mxu3  ;;  %v8625_v28 = vpop.f32.mrf.mxu2 }
 0x3ed   :  { %13120 = vst [vmem:[#allocation23_spill] sm:$0xff] %v12658_v56  ;;  %v8626_v9 = vadd.f32 %v8625_v28, %v8602_v16  ;;  %v12667_v56 = vsub.f32 %v9481_v21, %v12661_v15  ;;  %v12676_v16 = vand.u32 4294901760, %v9484_v53  ;;  %v7906_v21 = vadd.f32 %v7905_v26, %v7882_v12 }
 0x3ee   :  { %v7980_v26 = vadd.f32 %v12609_v42, %v12607_v6  ;;  %v7090_v25 = vadd.f32 %v12529_v30, %v7066_v54 }
 0x3ef   :  { %v12674_v44 = vand.u32 4294901760, %v12667_v56  ;;  %v12689_v20 = vsub.f32 %v9484_v53, %v12676_v16  ;;  %v7928_v4 = vadd.f32 %v12613_v1, %v7906_v21  ;;  %v9455_v1 = vld [vmem:[%s13100_s6 + $0x18] sm:$0xff] }
 0x3f0   :  { %v8004_v6 = vadd.f32 %v12615_v0, %v7980_v26 }
 0x3f1   :  { %v9512_v14 = vsub.f32 %v12667_v56, %v12674_v44  ;;  %v12700_v12 = vand.u32 4294901760, %v12689_v20  ;;  %v8515_v30 = vadd.f32 %v7928_v4, %v12533_v62 }
 0x3f2   :  { %v8695_v23 = vpop.f32.mrf.mxu1  ;;  %v8771_v24 = vpop.f32.mrf.mxu0  ;;  %v8028_v21 = vadd.f32 %v12621_v45, %v8004_v6 }
 0x3f3   :  { %v12697_v17 = vand.u32 4294901760, %v9512_v14 }
 0x3f4   :  { %v8649_v41 = vpop.f32.mrf.mxu3  ;;  %v8721_v36 = vpop.f32.mrf.mxu2  ;;  %v8052_v4 = vadd.f32 %v12611_v35, %v8028_v21 }
 0x3f5   :  { %v8650_v47 = vadd.f32 %v8649_v41, %v8626_v9  ;;  %v9454_v9 = vld [vmem:[%s13100_s6 + $0x10] sm:$0xff]  ;;  %s11102_s6 = smov 48  }
 0x3f6   :  { %v9487_v41 = vsel %vm1263_vm1, %v9454_v9, 0  ;;  %v8074_v35 = vadd.f32 %v12617_v49, %v8052_v4  ;;  %v7212_v49 = vadd.f32 %v12556_v60, %v12546_v51 }
 0x3f7   :  { %v8674_v10 = vadd.f32 %v8673_v18, %v8650_v47  ;;  %v12702_v53 = vand.u32 4294901760, %v9487_v41 }
 0x3f9   :  { %v8696_v28 = vadd.f32 %v8695_v23, %v8674_v10  ;;  %v12716_v0 = vsub.f32 %v9487_v41, %v12702_v53 }
 0x3fa   :  { %v8795_v55 = vpop.f32.mrf.mxu1 }
 0x3fb   :  { %v9428_v39 = vadd.f32 %v8696_v28, %v8514_v58  ;;  %v8867_v58 = vpop.f32.mrf.mxu0  ;;  %v7114_v28 = vadd.f32 %v12543_v46, %v7090_v25  ;;  %v9520_v46 = vsub.f32 %v12689_v20, %v12700_v12  ;;  %v12724_v26 = vand.u32 4294901760, %v12716_v0 }
 0x3fc   :  { %v8747_v18 = vpop.f32.mrf.mxu3  ;;  %v8819_v63 = vpop.f32.mrf.mxu2 }
 0x3fd   :  { %v9440_v23 = vadd.f32 %v12682_v50, %v9428_v39  ;;  %v8748_v29 = vadd.f32 %v8747_v18, %v8721_v36  ;;  %v9490_v18 = vsel %vm1263_vm1, %v9455_v1, 0  ;;  %v9528_v6 = vsub.f32 %v12716_v0, %v12724_v26 }
 0x3fe   :  { %v12726_v41 = vand.u32 4294901760, %v9490_v18 }
 0x3ff   :  { %v9446_v47 = vmax.f32 %v9440_v23, 0.0  ;;  %v8772_v3 = vadd.f32 %v8771_v24, %v8748_v29  ;;  %v12721_v29 = vand.u32 4294901760, %v9520_v46  ;;  %v12747_v46 = vand.u32 4294901760, %v9528_v6 }
 0x401   :  { %v8796_v10 = vadd.f32 %v8795_v55, %v8772_v3  ;;  %v9507_v36 = vand.u32 4294901760, %v9446_v47 }
 0x402   :  { %v8893_v42 = vpop.f32.mrf.mxu1 }
 0x403   :  { %v8820_v24 = vadd.f32 %v8819_v63, %v8796_v10  ;;  %9508 = vmatpush.msra.mxu0 %v9507_v36  ;;  %9635 = vmatpush.msra.mxu3 %v9507_v36  ;;  %v9558_v9 = vsub.f32 %v9446_v47, %v9507_v36  ;;  %v8894_v54 = vadd.f32 %v8893_v42, %v8867_v58 }
 0x404   :  { %v8841_v55 = vpop.f32.mrf.mxu3  ;;  %9514 = vmatmul.f32.vlgmr.msra.gmra.mxu0 %v12697_v17  ;;  %9639 = vmatmul.f32.vlgmr.msra.gmra.mxu3 %v12674_v44  ;;  %v8917_v45 = vpop.f32.mrf.mxu2  ;;  %v7138_v63 = vadd.f32 %v12526_v48, %v7114_v28  ;;  %v12736_v42 = vsub.f32 %v9490_v18, %v12726_v41 }
 0x405   :  { %v8842_v39 = vadd.f32 %v8841_v55, %v8820_v24  ;;  %9597 = vmatpush.msra.mxu2 %v9558_v9  ;;  %v9559_v62 = vand.u32 4294901760, %v9558_v9  ;;  %v8918_v3 = vadd.f32 %v8917_v45, %v8894_v54  ;;  %v8965_v48 = vpop.f32.mrf.mxu0  ;;  %v9459_v24 = vld [vmem:[%s13101_s7 + $0x18] sm:$0xff] }
 0x406   :  { %9600 = vmatmul.f32.vlgmr.msra.gmra.mxu2 %v12667_v56  ;;  %v7160_v10 = vadd.f32 %v12538_v43, %v7138_v63  ;;  %9477 = vperm.xlu1 %11038, %v9459_v24  }
 0x407   :  { %v9429_v14 = vadd.f32 %v8842_v39, %v8515_v30  ;;  %9679 = vmatpush.msrb.mxu0 %v9559_v62  ;;  %v9560_v23 = vsub.f32 %v9558_v9, %v9559_v62 }
 0x408   :  { %v7602_v9 = vadd.f32 %v7160_v10, %v12432_v40  ;;  %v8126_v40 = vadd.f32 %v12629_v38, %v12623_v61 }
 0x409   :  { %v9441_v47 = vadd.f32 %v12682_v50, %v9429_v14  ;;  %v9561_v25 = vand.u32 4294901760, %v9560_v23  ;;  %v7236_v14 = vadd.f32 %v12541_v8, %v7212_v49  ;;  %v9457_v8 = vld [vmem:[%s13101_s7 + $0x8] sm:$0xff] }
 0x40a   :  { %v8987_v30 = vpop.f32.mrf.mxu1  ;;  %v8516_v39 = vadd.f32 %v8074_v35, %v7602_v9  ;;  %9467 = vperm.xlu2 %11039, %v9457_v8  }
 0x40b   :  { %v9447_v58 = vmax.f32 %v9441_v47, 0.0  ;;  %9562 = vmatpush.msra.mxu1 %v9561_v25  ;;  %v8150_v47 = vadd.f32 %v12619_v5, %v8126_v40  ;;  %v7260_v25 = vadd.f32 %v12552_v13, %v7236_v14  ;;  %v7358_v14 = vadd.f32 %v12565_v59, %v12554_v32 }
 0x40c   :  { %v8941_v28 = vpop.f32.mrf.mxu3  ;;  %9522 = vmatmul.f32.gmra.mxu0 %v12721_v29  ;;  %9564 = vmatmul.f32.vlgmr.msra.gmra.mxu1 %v12661_v15  ;;  %v9013_v45 = vpop.f32.mrf.mxu2 }
 0x40d   :  { %v8942_v1 = vadd.f32 %v8941_v28, %v8918_v3  ;;  %9645 = vmatmul.f32.gmra.mxu3 %v12700_v12  ;;  %9713 = vmatpush.msrb.mxu1 %v9507_v36  ;;  %v9746_v43 = vand.u32 4294901760, %v9447_v58  ;;  %v12750_v36 = vand.u32 4294901760, %v12736_v42  ;;  %v9063_v61 = vpop.f32.mrf.mxu0  ;;  %v8174_v28 = vadd.f32 %v12625_v34, %v8150_v47 }
 0x40e   :  { %9605 = vmatmul.f32.gmra.mxu2 %v12689_v20  ;;  %v7284_v5 = vadd.f32 %v12559_v31, %v7260_v25 }
 0x40f   :  { %v8966_v21 = vadd.f32 %v8965_v48, %v8942_v1  ;;  %9747 = vmatpush.msrb.mxu2 %v9746_v43  ;;  %9874 = vmatpush.msra.mxu1 %v9746_v43  ;;  %v9797_v55 = vsub.f32 %v9447_v58, %v9746_v43  ;;  %v9536_v60 = vsub.f32 %v12736_v42, %v12750_v36 }
 0x410   :  { %v8198_v13 = vadd.f32 %v12631_v7, %v8174_v28  ;;  %v13124_v28 = vld [vmem:[#allocation17_spill] sm:$0xff] }
 0x411   :  { %v8988_v62 = vadd.f32 %v8987_v30, %v8966_v21  ;;  %9836 = vmatpush.msra.mxu0 %v9797_v55  ;;  %v9798_v54 = vand.u32 4294901760, %v9797_v55  ;;  %v12767_v58 = vand.u32 4294901760, %v9536_v60  ;;  %v7306_v30 = vadd.f32 %v12569_v57, %v7284_v5  ;;  %v13125_v5 = vld [vmem:[#allocation6_spill] sm:$0xff] }
 0x412   :  { %v9087_v48 = vpop.f32.mrf.mxu1  ;;  %v8220_v9 = vadd.f32 %v12637_v22, %v8198_v13  ;;  %v8272_v60 = vadd.f32 %v12633_v37, %v12627_v33  ;;  %v13121_v37 = vld [vmem:[#allocation8_spill] sm:$0xff] }
 0x413   :  { %v9430_v18 = vadd.f32 %v8988_v62, %v8516_v39  ;;  %9918 = vmatpush.msra.mxu2 %v9798_v54  ;;  %v9799_v63 = vsub.f32 %v9797_v55, %v9798_v54  ;;  %v7603_v21 = vadd.f32 %v7306_v30, %v12448_v19  ;;  %v13126_v30 = vld [vmem:[#allocation11_spill] sm:$0xff] }
 0x414   :  { %v9039_v51 = vpop.f32.mrf.mxu3  ;;  %9530 = vmatmul.f32.gmra.mxu0 %v12747_v46  ;;  %9568 = vmatmul.f32.gmra.mxu1 %v12676_v16  ;;  %v9111_v1 = vpop.f32.mrf.mxu2  ;;  %v8296_v32 = vadd.f32 %v12639_v11, %v8272_v60 }
 0x415   :  { %v9442_v23 = vadd.f32 %v12682_v50, %v9430_v18  ;;  %v9040_v4 = vadd.f32 %v9039_v51, %v9013_v45  ;;  %9651 = vmatmul.f32.gmra.mxu3 %v12724_v26  ;;  %v9800_v38 = vand.u32 4294901760, %v9799_v63  ;;  %v8517_v7 = vadd.f32 %v8220_v9, %v7603_v21  ;;  %v9159_v51 = vpop.f32.mrf.mxu0  ;;  %v13129_v21 = vld [vmem:[#allocation21_spill] sm:$0xff] }
 0x416   :  { %9610 = vmatmul.f32.gmra.mxu2 %v12716_v0  ;;  %v8320_v33 = vadd.f32 %v12645_v2, %v8296_v32 }
 0x417   :  { %v9448_v3 = vmax.f32 %v9442_v23, 0.0  ;;  %9801 = vmatpush.msrb.mxu3 %v9800_v38  ;;  %v9064_v10 = vadd.f32 %v9063_v61, %v9040_v4  ;;  %v7382_v61 = vadd.f32 %v12572_v52, %v7358_v14  ;;  %v13122_v52 = vld [vmem:[#allocation16_spill] sm:$0xff] }
 0x419   :  { %9952 = vmatpush.msra.mxu3 %v9746_v43  ;;  %v9985_v6 = vand.u32 4294901760, %v9448_v3  ;;  %v9088_v35 = vadd.f32 %v9087_v48, %v9064_v10  ;;  %v7406_v38 = vadd.f32 %v12581_v27, %v7382_v61  ;;  %v8344_v10 = vadd.f32 %v13122_v52, %v8320_v33  ;;  %v13123_v27 = vld [vmem:[#allocation9_spill] sm:$0xff] }
 0x41a   :  { %v9185_v63 = vpop.f32.mrf.mxu1 }
 0x41b   :  { %v10036_v43 = vsub.f32 %v9448_v3, %v9985_v6  ;;  %v9112_v24 = vadd.f32 %v9111_v1, %v9088_v35  ;;  %v9186_v23 = vadd.f32 %v9185_v63, %v9159_v51  ;;  %v7430_v8 = vadd.f32 %v13121_v37, %v7406_v38  ;;  %v13133_v51 = vld [vmem:[#allocation20_spill] sm:$0xff] }
 0x41c   :  { %9538 = vmatmul.f32.gmra.mxu0 %v12767_v58  ;;  %9572 = vmatmul.f32.gmra.mxu1 %v12702_v53  ;;  %v9133_v34 = vpop.f32.mrf.mxu3  ;;  %v9209_v4 = vpop.f32.mrf.mxu2 }
 0x41d   :  { %9657 = vmatmul.f32.gmra.mxu3 %v12750_v36  ;;  %v10037_v31 = vand.u32 4294901760, %v10036_v43  ;;  %v9134_v55 = vadd.f32 %v9133_v34, %v9112_v24  ;;  %v9210_v59 = vadd.f32 %v9209_v4, %v9186_v23  ;;  %v9257_v25 = vpop.f32.mrf.mxu0  ;;  %v7452_v11 = vadd.f32 %v13123_v27, %v7430_v8  ;;  %v13127_v24 = vld [vmem:[#allocation13_spill] sm:$0xff]  ;;  %v13134_v4 = vld [vmem:[#allocation14_spill] sm:$0xff]  ;;  %v13136_v8 = vld [vmem:[#allocation15_spill] sm:$0xff] }
 0x41e   :  { %9615 = vmatmul.f32.gmra.mxu2 %v12736_v42  ;;  %v7504_v34 = vadd.f32 %v13127_v24, %v13126_v30 }
 0x41f   :  { %v10038_v57 = vsub.f32 %v10036_v43, %v10037_v31  ;;  %v9431_v49 = vadd.f32 %v9134_v55, %v8517_v7  ;;  %v7604_v35 = vadd.f32 %v7452_v11, %v13125_v5 }
 0x421   :  { %v10039_v39 = vand.u32 4294901760, %v10038_v57  ;;  %v9443_v22 = vadd.f32 %v12682_v50, %v9431_v49  ;;  %v13130_v49 = vld [vmem:[#allocation10_spill] sm:$0xff] }
 0x422   :  { %v9279_v48 = vpop.f32.mrf.mxu1 }
 0x423   :  { %v9449_v19 = vmax.f32 %v9443_v22, 0.0 }
 0x424   :  { %9576 = vmatmul.f32.gmra.mxu1 %v12726_v41  ;;  %9681 = vmatmul.f32.vlgmr.msrb.gmra.mxu0 %v12661_v15  ;;  %v9233_v47 = vpop.f32.mrf.mxu3  ;;  %v9305_v57 = vpop.f32.mrf.mxu2 }
 0x425   :  { %9803 = vmatmul.f32.vlgmr.msrb.gmra.mxu3 %v12661_v15  ;;  %9986 = vmatpush.msrb.mxu0 %v9985_v6  ;;  %v12788_v62 = vand.u32 4294901760, %v9449_v19  ;;  %v9234_v3 = vadd.f32 %v9233_v47, %v9210_v59  ;;  %v13135_v59 = vld [vmem:[#allocation22_spill] sm:$0xff] }
 0x426   :  { %10113 = vmatpush.msrb.mxu3 %v9985_v6  ;;  %9753 = vmatmul.f32.vlgmr.msrb.gmra.mxu2 %v12697_v17 }
 0x427   :  { %10075 = vmatpush.msrb.mxu2 %v10036_v43  ;;  %v10275_v54 = vsub.f32 %v9449_v19, %v12788_v62  ;;  %v9258_v2 = vadd.f32 %v9257_v25, %v9234_v3  ;;  %v9355_v19 = vpop.f32.mrf.mxu0 }
 0x429   :  { %v10276_v40 = vand.u32 4294901760, %v10275_v54  ;;  %v9280_v1 = vadd.f32 %v9279_v48, %v9258_v2  ;;  %v13138_v2 = vld [vmem:[#allocation7_spill] sm:$0xff] }
 0x42a   :  { %v9379_v14 = vpop.f32.mrf.mxu1 }
 0x42b   :  { %v10277_v18 = vsub.f32 %v10275_v54, %v10276_v40 }
 0x42c   :  { %9685 = vmatmul.f32.gmra.mxu0 %v12676_v16  ;;  %9715 = vmatmul.f32.vlgmr.msrb.gmra.mxu1 %v12661_v15  ;;  %v9331_v9 = vpop.f32.mrf.mxu3  ;;  %v9403_v32 = vpop.f32.mrf.mxu2 }
 0x42d   :  { %9807 = vmatmul.f32.gmra.mxu3 %v12676_v16  ;;  %10040 = vmatpush.msrb.mxu1 %v10039_v39  ;;  %v10278_v45 = vand.u32 4294901760, %v10277_v18  ;;  %v7528_v39 = vadd.f32 %v13130_v49, %v7504_v34  ;;  %v9332_v22 = vadd.f32 %v9331_v9, %v9305_v57  ;;  %v13132_v18 = vld [vmem:[#allocation12_spill] sm:$0xff] }
 0x42e   :  { %9761 = vmatmul.f32.gmra.mxu2 %v12721_v29 }
 0x42f   :  { %v9356_v63 = vadd.f32 %v9355_v19, %v9332_v22 }
 0x431   :  { %v9380_v38 = vadd.f32 %v9379_v14, %v9356_v63 }
 0x433   :  { %v9404_v25 = vadd.f32 %v9403_v32, %v9380_v38 }
 0x434   :  { %9689 = vmatmul.f32.gmra.mxu0 %v12702_v53  ;;  %9719 = vmatmul.f32.gmra.mxu1 %v12676_v16  ;;  %v9425_v33 = vpop.f32.mrf.mxu3 }
 0x435   :  { %9811 = vmatmul.f32.gmra.mxu3 %v12702_v53 }
 0x436   :  { %9769 = vmatmul.f32.gmra.mxu2 %v12747_v46 }
 0x43c   :  { %9693 = vmatmul.f32.gmra.mxu0 %v12726_v41  ;;  %9723 = vmatmul.f32.gmra.mxu1 %v12702_v53 }
 0x43d   :  { %9815 = vmatmul.f32.gmra.mxu3 %v12726_v41 }
 0x43e   :  { %9777 = vmatmul.f32.gmra.mxu2 %v12767_v58 }
 0x444   :  { %9727 = vmatmul.f32.gmra.mxu1 %v12726_v41  ;;  %9839 = vmatmul.f32.vlgmr.msra.gmra.mxu0 %v12667_v56 }
 0x445   :  { %9954 = vmatmul.f32.vlgmr.msra.gmra.mxu3 %v12661_v15  ;;  %10157 = vmatpush.msra.mxu0 %v10037_v31  ;;  %v13128_v31 = vld [vmem:[#allocation19_spill] sm:$0xff] }
 0x446   :  { %10279 = vmatpush.msra.mxu3 %v10278_v45  ;;  %9920 = vmatmul.f32.vlgmr.msra.gmra.mxu2 %v12661_v15  ;;  %v8418_v55 = vadd.f32 %v13129_v21, %v13128_v31  ;;  %v7552_v45 = vadd.f32 %v13132_v18, %v7528_v39 }
 0x447   :  { %10225 = vmatpush.msra.mxu2 %v12788_v62 }
 0x448   :  { %v7576_v61 = vadd.f32 %v13134_v4, %v7552_v45 }
 0x44a   :  { %v7598_v3 = vadd.f32 %v13136_v8, %v7576_v61 }
 0x44c   :  { %9844 = vmatmul.f32.gmra.mxu0 %v12689_v20  ;;  %9878 = vmatmul.f32.vlgmr.msra.gmra.mxu1 %v12674_v44  ;;  %v7605_v48 = vadd.f32 %v7598_v3, %v13138_v2 }
 0x44d   :  { %9958 = vmatmul.f32.gmra.mxu3 %v12676_v16  ;;  %10191 = vmatpush.msra.mxu1 %v9985_v6  ;;  %v8366_v6 = vadd.f32 %v13124_v28, %v8344_v10  ;;  %v13137_v10 = vld [vmem:[#allocation23_spill] sm:$0xff]  ;;  %v9426_v28 = vadd.f32 %v9425_v33, %v9404_v25 }
 0x44e   :  { %9924 = vmatmul.f32.gmra.mxu2 %v12676_v16 }
 0x44f   :  { %v8518_v13 = vadd.f32 %v8366_v6, %v7604_v35 }
 0x451   :  { %v9432_v43 = vadd.f32 %v9280_v1, %v8518_v13 }
 0x453   :  { %v9444_v7 = vadd.f32 %v12682_v50, %v9432_v43 }
 0x454   :  { %9849 = vmatmul.f32.gmra.mxu0 %v12716_v0  ;;  %9884 = vmatmul.f32.gmra.mxu1 %v12700_v12 }
 0x455   :  { %9962 = vmatmul.f32.gmra.mxu3 %v12702_v53 }
 0x456   :  { %9928 = vmatmul.f32.gmra.mxu2 %v12702_v53 }
 0x45c   :  { %9854 = vmatmul.f32.gmra.mxu0 %v12736_v42  ;;  %9890 = vmatmul.f32.gmra.mxu1 %v12724_v26 }
 0x45d   :  { %9966 = vmatmul.f32.gmra.mxu3 %v12726_v41 }
 0x45e   :  { %9932 = vmatmul.f32.gmra.mxu2 %v12726_v41 }
 0x464   :  { %9896 = vmatmul.f32.gmra.mxu1 %v12750_v36  ;;  %9992 = vmatmul.f32.vlgmr.msrb.gmra.mxu0 %v12697_v17  ;;  %v12899_v45 = vpop.permute.xlu2 %9467 }
 0x465   :  { %10117 = vmatmul.f32.vlgmr.msrb.gmra.mxu3 %v12674_v44  ;;  %10314 = vmatpush.msrb.mxu0 %v10275_v54 }
 0x466   :  { %10430 = vmatpush.msrb.mxu3 %v12788_v62  ;;  %10078 = vmatmul.f32.vlgmr.msrb.gmra.mxu2 %v12667_v56 }
 0x467   :  { %10396 = vmatpush.msrb.mxu2 %v10276_v40  ;;  %v9450_v40 = vmax.f32 %v9444_v7, 0.0 }
 0x469   :  { %v12852_v23 = vand.u32 4294901760, %v9450_v40 }
 0x46b   :  { %v12861_v37 = vsub.f32 %v9450_v40, %v12852_v23 }
 0x46c   :  { %10000 = vmatmul.f32.gmra.mxu0 %v12721_v29  ;;  %10042 = vmatmul.f32.vlgmr.msrb.gmra.mxu1 %v12661_v15 }
 0x46d   :  { %10123 = vmatmul.f32.gmra.mxu3 %v12700_v12  ;;  %10352 = vmatpush.msrb.mxu1 %v12788_v62  ;;  %v13131_v62 = vld [vmem:[#allocation18_spill] sm:$0xff]  ;;  %v10515_v11 = vand.u32 4294901760, %v12861_v37 }
 0x46e   :  { %10083 = vmatmul.f32.gmra.mxu2 %v12689_v20  ;;  %v8442_v54 = vadd.f32 %v13131_v62, %v8418_v55 }
 0x46f   :  { %v10516_v35 = vsub.f32 %v12861_v37, %v10515_v11 }
 0x470   :  { %v8466_v60 = vadd.f32 %v13133_v51, %v8442_v54 }
 0x471   :  { %v10517_v24 = vand.u32 4294901760, %v10516_v35 }
 0x472   :  { %v8490_v47 = vadd.f32 %v13135_v59, %v8466_v60 }
 0x474   :  { %10008 = vmatmul.f32.gmra.mxu0 %v12747_v46  ;;  %10046 = vmatmul.f32.gmra.mxu1 %v12676_v16  ;;  %v8512_v27 = vadd.f32 %v13137_v10, %v8490_v47 }
 0x475   :  { %10129 = vmatmul.f32.gmra.mxu3 %v12724_v26 }
 0x476   :  { %10088 = vmatmul.f32.gmra.mxu2 %v12716_v0  ;;  %v8519_v6 = vadd.f32 %v8512_v27, %v7605_v48  ;;  %v12914_v27 = vpop.permute.xlu0 %9472 }
 0x478   :  { %v9433_v1 = vadd.f32 %v9426_v28, %v8519_v6 }
 0x47a   :  { %v9445_v34 = vadd.f32 %v12682_v50, %v9433_v1  ;;  %v12886_v50 = vpop.permute.xlu1 %9462 }
 0x47c   :  { %10016 = vmatmul.f32.gmra.mxu0 %v12767_v58  ;;  %10050 = vmatmul.f32.gmra.mxu1 %v12702_v53  ;;  %v9451_v9 = vmax.f32 %v9445_v34, 0.0 }
 0x47d   :  { %10135 = vmatmul.f32.gmra.mxu3 %v12750_v36 }
 0x47e   :  { %10093 = vmatmul.f32.gmra.mxu2 %v12736_v42  ;;  %v12880_v57 = vand.u32 4294901760, %v9451_v9 }
 0x480   :  { %v12889_v49 = vsub.f32 %v9451_v9, %v12880_v57 }
 0x481   :  { %v9515_v52 = vpop.f32.mrf.mxu0 }
 0x482   :  { %v9516_v54 = vadd.f32 %v9515_v52, %v12886_v50  ;;  %v10754_v40 = vand.u32 4294901760, %v12889_v49  ;;  %v12925_v35 = vpop.permute.xlu1 %9477 }
 0x484   :  { %10054 = vmatmul.f32.gmra.mxu1 %v12726_v41  ;;  %10159 = vmatmul.f32.vlgmr.msra.gmra.mxu0 %v12661_v15  ;;  %v10755_v14 = vsub.f32 %v12889_v49, %v10754_v40 }
 0x485   :  { %10281 = vmatmul.f32.vlgmr.msra.gmra.mxu3 %v12661_v15  ;;  %10464 = vmatpush.msra.mxu0 %v12852_v23 }
 0x486   :  { %10591 = vmatpush.msra.mxu3 %v12852_v23  ;;  %10231 = vmatmul.f32.vlgmr.msra.gmra.mxu2 %v12697_v17  ;;  %v10756_v32 = vand.u32 4294901760, %v10755_v14 }
 0x487   :  { %10553 = vmatpush.msra.mxu2 %v12861_v37  ;;  %v9640_v5 = vpop.f32.mrf.mxu3 }
 0x489   :  { %v9523_v13 = vpop.f32.mrf.mxu0  ;;  %v9565_v43 = vpop.f32.mrf.mxu1 }
 0x48a   :  { %v9601_v30 = vpop.f32.mrf.mxu2  ;;  %v9566_v18 = vadd.f32 %v9565_v43, %v9516_v54  ;;  %v9524_v4 = vadd.f32 %v9523_v13, %v12899_v45 }
 0x48c   :  { %10163 = vmatmul.f32.gmra.mxu0 %v12676_v16  ;;  %10193 = vmatmul.f32.vlgmr.msra.gmra.mxu1 %v12661_v15  ;;  %v9602_v38 = vadd.f32 %v9601_v30, %v9566_v18 }
 0x48d   :  { %10285 = vmatmul.f32.gmra.mxu3 %v12676_v16  ;;  %10518 = vmatpush.msra.mxu1 %v10517_v24 }
 0x48e   :  { %10239 = vmatmul.f32.gmra.mxu2 %v12721_v29  ;;  %v9641_v59 = vadd.f32 %v9640_v5, %v9602_v38  ;;  %v11042_v38 = vld [vmem:[%s13094_s0 + $0x60] sm:$0xff] }
 0x490   :  { %v9646_v31 = vpop.f32.mrf.mxu3 }
 0x491   :  { %v9531_v21 = vpop.f32.mrf.mxu0  ;;  %v9569_v55 = vpop.f32.mrf.mxu1 }
 0x492   :  { %v9606_v7 = vpop.f32.mrf.mxu2  ;;  %v9570_v47 = vadd.f32 %v9569_v55, %v9524_v4  ;;  %v9532_v2 = vadd.f32 %v9531_v21, %v12914_v27 }
 0x494   :  { %10167 = vmatmul.f32.gmra.mxu0 %v12702_v53  ;;  %10197 = vmatmul.f32.gmra.mxu1 %v12676_v16  ;;  %v9607_v25 = vadd.f32 %v9606_v7, %v9570_v47 }
 0x495   :  { %10289 = vmatmul.f32.gmra.mxu3 %v12702_v53 }
 0x496   :  { %10247 = vmatmul.f32.gmra.mxu2 %v12747_v46  ;;  %v9647_v6 = vadd.f32 %v9646_v31, %v9607_v25 }
 0x498   :  { %v12891_v39 = vpop.f32.mrf.mxu3 }
 0x499   :  { %v9539_v22 = vpop.f32.mrf.mxu0  ;;  %v9573_v19 = vpop.f32.mrf.mxu1 }
 0x49a   :  { %v9611_v62 = vpop.f32.mrf.mxu2  ;;  %v9574_v28 = vadd.f32 %v9573_v19, %v9532_v2  ;;  %v9540_v34 = vadd.f32 %v9539_v22, %v12925_v35 }
 0x49c   :  { %10171 = vmatmul.f32.gmra.mxu0 %v12726_v41  ;;  %10201 = vmatmul.f32.gmra.mxu1 %v12702_v53  ;;  %v9612_v24 = vadd.f32 %v9611_v62, %v9574_v28 }
 0x49d   :  { %10293 = vmatmul.f32.gmra.mxu3 %v12726_v41 }
 0x49e   :  { %10255 = vmatmul.f32.gmra.mxu2 %v12767_v58  ;;  %v9653_v55 = vadd.f32 %v12891_v39, %v9612_v24  ;;  %v11044_v24 = vld [vmem:[%s13094_s0 + $0x8] sm:$0xff] }
 0x4a0   :  { %v12901_v63 = vpop.f32.mrf.mxu3 }
 0x4a1   :  { %v9577_v51 = vpop.f32.mrf.mxu1  ;;  %v9682_v60 = vpop.f32.mrf.mxu0 }
 0x4a2   :  { %v9616_v61 = vpop.f32.mrf.mxu2  ;;  %v9683_v33 = vadd.f32 %v9682_v60, %v9641_v59  ;;  %v9578_v19 = vadd.f32 %v9577_v51, %v9540_v34 }
 0x4a4   :  { %10205 = vmatmul.f32.gmra.mxu1 %v12726_v41  ;;  %10317 = vmatmul.f32.vlgmr.msrb.gmra.mxu0 %v12667_v56  ;;  %v9617_v14 = vadd.f32 %v9616_v61, %v9578_v19 }
 0x4a5   :  { %10432 = vmatmul.f32.vlgmr.msrb.gmra.mxu3 %v12661_v15  ;;  %10635 = vmatpush.msrb.mxu0 %v10515_v11  ;;  %v11040_v11 = vld [vmem:[%s13094_s0] sm:$0xff] }
 0x4a6   :  { %10757 = vmatpush.msrb.mxu3 %v10756_v32  ;;  %10398 = vmatmul.f32.vlgmr.msrb.gmra.mxu2 %v12661_v15  ;;  %v9659_v39 = vadd.f32 %v12901_v63, %v9617_v14 }
 0x4a7   :  { %10703 = vmatpush.msrb.mxu2 %v12880_v57 }
 0x4a8   :  { %v12912_v37 = vpop.f32.mrf.mxu3 }
 0x4a9   :  { %v9686_v8 = vpop.f32.mrf.mxu0  ;;  %v9716_v3 = vpop.f32.mrf.mxu1 }
 0x4aa   :  { %v9717_v52 = vadd.f32 %v9716_v3, %v9683_v33  ;;  %v9754_v10 = vpop.f32.mrf.mxu2  ;;  %v9687_v1 = vadd.f32 %v9686_v8, %v9647_v6 }
 0x4ab   :  { %v9755_v8 = vadd.f32 %v9754_v10, %v12886_v50 }
 0x4ac   :  { %v10926_v48 = vadd.f32 %v11040_v11, %v9717_v52  ;;  %10322 = vmatmul.f32.gmra.mxu0 %v12689_v20  ;;  %10356 = vmatmul.f32.vlgmr.msrb.gmra.mxu1 %v12674_v44  ;;  %v11043_v52 = vld [vmem:[%s13094_s0 + $0x90] sm:$0xff] }
 0x4ad   :  { %10436 = vmatmul.f32.gmra.mxu3 %v12676_v16  ;;  %10669 = vmatpush.msrb.mxu1 %v12852_v23  ;;  %v11041_v23 = vld [vmem:[%s13094_s0 + $0x30] sm:$0xff]  ;;  %v9805_v63 = vadd.f32 %v12912_v37, %v9755_v8 }
 0x4ae   :  { %v10950_v5 = vmax.f32 %v10926_v48, 0.0  ;;  %10402 = vmatmul.f32.gmra.mxu2 %v12676_v16 }
 0x4b0   :  { %10974 = vst [vmem:[#allocation3] sm:$0xff] %v10950_v5  ;;  %v12927_v13 = vpop.f32.mrf.mxu3 }
 0x4b1   :  { %v9690_v43 = vpop.f32.mrf.mxu0  ;;  %v9720_v30 = vpop.f32.mrf.mxu1 }
 0x4b2   :  { %v9721_v9 = vadd.f32 %v9720_v30, %v9687_v1  ;;  %v9762_v21 = vpop.f32.mrf.mxu2  ;;  %v9691_v22 = vadd.f32 %v9690_v43, %v9653_v55 }
 0x4b3   :  { %v9763_v5 = vadd.f32 %v9762_v21, %v12899_v45 }
 0x4b4   :  { %v10932_v31 = vadd.f32 %v11041_v23, %v9721_v9  ;;  %10327 = vmatmul.f32.gmra.mxu0 %v12716_v0  ;;  %10362 = vmatmul.f32.gmra.mxu1 %v12700_v12 }
 0x4b5   :  { %10440 = vmatmul.f32.gmra.mxu3 %v12702_v53 }
 0x4b6   :  { %v10956_v7 = vmax.f32 %v10932_v31, 0.0  ;;  %10406 = vmatmul.f32.gmra.mxu2 %v12702_v53 }
 0x4b8   :  { %10980 = vst [vmem:[#allocation3 + $0x30] sm:$0xff] %v10956_v7  ;;  %v12938_v62 = vpop.f32.mrf.mxu3 }
 0x4b9   :  { %v9694_v54 = vpop.f32.mrf.mxu0  ;;  %v9724_v18 = vpop.f32.mrf.mxu1 }
 0x4ba   :  { %v9725_v60 = vadd.f32 %v9724_v18, %v9691_v22  ;;  %v9770_v4 = vpop.f32.mrf.mxu2  ;;  %v9695_v59 = vadd.f32 %v9694_v54, %v9659_v39  ;;  %v11045_v18 = vld [vmem:[%s13094_s0 + $0x38] sm:$0xff] }
 0x4bb   :  { %v9771_v31 = vadd.f32 %v9770_v4, %v12914_v27 }
 0x4bc   :  { %v10938_v32 = vadd.f32 %v11042_v38, %v9725_v60  ;;  %10332 = vmatmul.f32.gmra.mxu0 %v12736_v42  ;;  %10368 = vmatmul.f32.gmra.mxu1 %v12724_v26 }
 0x4bd   :  { %10444 = vmatmul.f32.gmra.mxu3 %v12726_v41 }
 0x4be   :  { %v10962_v51 = vmax.f32 %v10938_v32, 0.0  ;;  %10410 = vmatmul.f32.gmra.mxu2 %v12726_v41 }
 0x4c0   :  { %10986 = vst [vmem:[#allocation3 + $0x60] sm:$0xff] %v10962_v51  ;;  %v12948_v61 = vpop.f32.mrf.mxu3 }
 0x4c1   :  { %v9728_v47 = vpop.f32.mrf.mxu1  ;;  %v9840_v33 = vpop.f32.mrf.mxu0 }
 0x4c2   :  { %v9729_v3 = vadd.f32 %v9728_v47, %v9695_v59  ;;  %v9778_v25 = vpop.f32.mrf.mxu2  ;;  %v9841_v10 = vadd.f32 %v9840_v33, %v9805_v63 }
 0x4c3   :  { %v9779_v32 = vadd.f32 %v9778_v25, %v12925_v35 }
 0x4c4   :  { %v10944_v2 = vadd.f32 %v11043_v52, %v9729_v3  ;;  %10374 = vmatmul.f32.gmra.mxu1 %v12750_v36  ;;  %10470 = vmatmul.f32.vlgmr.msra.gmra.mxu0 %v12697_v17  ;;  %v11046_v3 = vld [vmem:[%s13094_s0 + $0x68] sm:$0xff] }
 0x4c5   :  { %10595 = vmatmul.f32.vlgmr.msra.gmra.mxu3 %v12674_v44  ;;  %10792 = vmatpush.msra.mxu0 %v12889_v49  ;;  %v9809_v49 = vadd.f32 %v12927_v13, %v9763_v5  ;;  %v9813_v13 = vadd.f32 %v12938_v62, %v9771_v31  ;;  %v9817_v62 = vadd.f32 %v12948_v61, %v9779_v32 }
 0x4c6   :  { %v10968_v11 = vmax.f32 %v10944_v2, 0.0  ;;  %10908 = vmatpush.msra.mxu3 %v12880_v57  ;;  %10556 = vmatmul.f32.vlgmr.msra.gmra.mxu2 %v12667_v56 }
 0x4c7   :  { %10874 = vmatpush.msra.mxu2 %v10754_v40 }
 0x4c8   :  { %10992 = vst [vmem:[#allocation3 + $0x90] sm:$0xff] %v10968_v11  ;;  %v9955_v48 = vpop.f32.mrf.mxu3 }
 0x4c9   :  { %v9845_v28 = vpop.f32.mrf.mxu0  ;;  %v9879_v6 = vpop.f32.mrf.mxu1 }
 0x4ca   :  { %v9880_v1 = vadd.f32 %v9879_v6, %v9841_v10  ;;  %v9921_v43 = vpop.f32.mrf.mxu2  ;;  %v9846_v37 = vadd.f32 %v9845_v28, %v9809_v49  ;;  %v11047_v6 = vld [vmem:[%s13094_s0 + $0x98] sm:$0xff] }
 0x4cc   :  { %v9922_v30 = vadd.f32 %v9921_v43, %v9880_v1  ;;  %10478 = vmatmul.f32.gmra.mxu0 %v12721_v29  ;;  %10520 = vmatmul.f32.vlgmr.msra.gmra.mxu1 %v12661_v15 }
 0x4cd   :  { %10830 = vmatpush.msra.mxu1 %v12880_v57  ;;  %10601 = vmatmul.f32.gmra.mxu3 %v12700_v12 }
 0x4ce   :  { %v9956_v40 = vadd.f32 %v9955_v48, %v9922_v30  ;;  %10561 = vmatmul.f32.gmra.mxu2 %v12689_v20 }
 0x4d0   :  { %v10927_v34 = vadd.f32 %v11044_v24, %v9956_v40  ;;  %v9959_v9 = vpop.f32.mrf.mxu3 }
 0x4d1   :  { %v9850_v21 = vpop.f32.mrf.mxu0  ;;  %v9885_v23 = vpop.f32.mrf.mxu1 }
 0x4d2   :  { %v10951_v55 = vmax.f32 %v10927_v34, 0.0  ;;  %v9886_v57 = vadd.f32 %v9885_v23, %v9846_v37  ;;  %v9925_v7 = vpop.f32.mrf.mxu2  ;;  %v9851_v54 = vadd.f32 %v9850_v21, %v9813_v13 }
 0x4d4   :  { %10975 = vst [vmem:[#allocation3 + $0x8] sm:$0xff] %v10951_v55  ;;  %v9926_v19 = vadd.f32 %v9925_v7, %v9886_v57  ;;  %10486 = vmatmul.f32.gmra.mxu0 %v12747_v46  ;;  %10524 = vmatmul.f32.gmra.mxu1 %v12676_v16 }
 0x4d5   :  { %10607 = vmatmul.f32.gmra.mxu3 %v12724_v26 }
 0x4d6   :  { %v9960_v22 = vadd.f32 %v9959_v9, %v9926_v19  ;;  %10566 = vmatmul.f32.gmra.mxu2 %v12716_v0 }
 0x4d8   :  { %v10933_v14 = vadd.f32 %v11045_v18, %v9960_v22  ;;  %v9963_v60 = vpop.f32.mrf.mxu3 }
 0x4d9   :  { %v9855_v4 = vpop.f32.mrf.mxu0  ;;  %v9891_v38 = vpop.f32.mrf.mxu1 }
 0x4da   :  { %v10957_v39 = vmax.f32 %v10933_v14, 0.0  ;;  %v9892_v51 = vadd.f32 %v9891_v38, %v9851_v54  ;;  %v9929_v59 = vpop.f32.mrf.mxu2  ;;  %v9856_v8 = vadd.f32 %v9855_v4, %v9817_v62 }
 0x4dc   :  { %10981 = vst [vmem:[#allocation3 + $0x38] sm:$0xff] %v10957_v39  ;;  %v9930_v47 = vadd.f32 %v9929_v59, %v9892_v51  ;;  %10494 = vmatmul.f32.gmra.mxu0 %v12767_v58  ;;  %10528 = vmatmul.f32.gmra.mxu1 %v12702_v53  ;;  %v11048_v59 = vld [vmem:[%s13094_s0 + $0x10] sm:$0xff] }
 0x4dd   :  { %10613 = vmatmul.f32.gmra.mxu3 %v12750_v36 }
 0x4de   :  { %v9964_v33 = vadd.f32 %v9963_v60, %v9930_v47  ;;  %10571 = vmatmul.f32.gmra.mxu2 %v12736_v42 }
 0x4e0   :  { %v10939_v25 = vadd.f32 %v11046_v3, %v9964_v33  ;;  %v9967_v52 = vpop.f32.mrf.mxu3 }
 0x4e1   :  { %v9897_v2 = vpop.f32.mrf.mxu1  ;;  %v9993_v63 = vpop.f32.mrf.mxu0 }
 0x4e2   :  { %v10963_v11 = vmax.f32 %v10939_v25, 0.0  ;;  %v9898_v10 = vadd.f32 %v9897_v2, %v9856_v8  ;;  %v9933_v48 = vpop.f32.mrf.mxu2  ;;  %v9994_v31 = vadd.f32 %v9993_v63, %v12886_v50 }
 0x4e4   :  { %10987 = vst [vmem:[#allocation3 + $0x68] sm:$0xff] %v10963_v11  ;;  %v9934_v28 = vadd.f32 %v9933_v48, %v9898_v10  ;;  %10532 = vmatmul.f32.gmra.mxu1 %v12726_v41  ;;  %10637 = vmatmul.f32.vlgmr.msrb.gmra.mxu0 %v12661_v15 }
 0x4e5   :  { %10759 = vmatmul.f32.vlgmr.msrb.gmra.mxu3 %v12661_v15 }
 0x4e6   :  { %v9968_v61 = vadd.f32 %v9967_v52, %v9934_v28  ;;  %10709 = vmatmul.f32.vlgmr.msrb.gmra.mxu2 %v12697_v17 }
 0x4e8   :  { %v10945_v5 = vadd.f32 %v11047_v6, %v9968_v61  ;;  %v10118_v1 = vpop.f32.mrf.mxu3 }
 0x4e9   :  { %v10001_v43 = vpop.f32.mrf.mxu0  ;;  %v10043_v30 = vpop.f32.mrf.mxu1 }
 0x4ea   :  { %v10969_v49 = vmax.f32 %v10945_v5, 0.0  ;;  %v10079_v40 = vpop.f32.mrf.mxu2 }
 0x4ec   :  { %10993 = vst [vmem:[#allocation3 + $0x98] sm:$0xff] %v10969_v49  ;;  %10641 = vmatmul.f32.gmra.mxu0 %v12676_v16  ;;  %10671 = vmatmul.f32.vlgmr.msrb.gmra.mxu1 %v12661_v15 }
 0x4ed   :  { %10763 = vmatmul.f32.gmra.mxu3 %v12676_v16 }
 0x4ee   :  { %10717 = vmatmul.f32.gmra.mxu2 %v12721_v29  ;;  %v10044_v29 = vadd.f32 %v10043_v30, %v9994_v31 }
 0x4f0   :  { %v10124_v17 = vpop.f32.mrf.mxu3  ;;  %v10080_v13 = vadd.f32 %v10079_v40, %v10044_v29 }
 0x4f1   :  { %v10009_v37 = vpop.f32.mrf.mxu0  ;;  %v10047_v24 = vpop.f32.mrf.mxu1 }
 0x4f2   :  { %v10084_v34 = vpop.f32.mrf.mxu2  ;;  %v10119_v54 = vadd.f32 %v10118_v1, %v10080_v13  ;;  %v10010_v51 = vadd.f32 %v10009_v37, %v12914_v27 }
 0x4f4   :  { %10645 = vmatmul.f32.gmra.mxu0 %v12702_v53  ;;  %10675 = vmatmul.f32.gmra.mxu1 %v12676_v16 }
 0x4f5   :  { %10767 = vmatmul.f32.gmra.mxu3 %v12702_v53 }
 0x4f6   :  { %10725 = vmatmul.f32.gmra.mxu2 %v12747_v46  ;;  %v10002_v46 = vadd.f32 %v10001_v43, %v12899_v45 }
 0x4f8   :  { %v10130_v9 = vpop.f32.mrf.mxu3  ;;  %v10048_v18 = vadd.f32 %v10047_v24, %v10002_v46 }
 0x4f9   :  { %v10017_v21 = vpop.f32.mrf.mxu0  ;;  %v10051_v23 = vpop.f32.mrf.mxu1 }
 0x4fa   :  { %v10089_v55 = vpop.f32.mrf.mxu2  ;;  %v10085_v38 = vadd.f32 %v10084_v34, %v10048_v18  ;;  %v10052_v47 = vadd.f32 %v10051_v23, %v10010_v51  ;;  %v10018_v52 = vadd.f32 %v10017_v21, %v12925_v35 }
 0x4fc   :  { %10649 = vmatmul.f32.gmra.mxu0 %v12726_v41  ;;  %10679 = vmatmul.f32.gmra.mxu1 %v12702_v53  ;;  %v10090_v2 = vadd.f32 %v10089_v55, %v10052_v47 }
 0x4fd   :  { %10771 = vmatmul.f32.gmra.mxu3 %v12726_v41 }
 0x4fe   :  { %10733 = vmatmul.f32.gmra.mxu2 %v12767_v58 }
 0x500   :  { %v10136_v57 = vpop.f32.mrf.mxu3 }
 0x501   :  { %v10055_v7 = vpop.f32.mrf.mxu1  ;;  %v10160_v19 = vpop.f32.mrf.mxu0 }
 0x502   :  { %v10094_v22 = vpop.f32.mrf.mxu2  ;;  %v10161_v14 = vadd.f32 %v10160_v19, %v10119_v54  ;;  %v10056_v10 = vadd.f32 %v10055_v7, %v10018_v52 }
 0x504   :  { %10683 = vmatmul.f32.gmra.mxu1 %v12726_v41  ;;  %10795 = vmatmul.f32.vlgmr.msra.gmra.mxu0 %v12667_v56  ;;  %v10095_v1 = vadd.f32 %v10094_v22, %v10056_v10 }
 0x505   :  { %10910 = vmatmul.f32.vlgmr.msra.gmra.mxu3 %v12661_v15 }
 0x506   :  { %10876 = vmatmul.f32.vlgmr.msra.gmra.mxu2 %v12661_v15  ;;  %v10125_v15 = vadd.f32 %v10124_v17, %v10085_v38 }
 0x508   :  { %v10282_v60 = vpop.f32.mrf.mxu3 }
 0x509   :  { %v10164_v58 = vpop.f32.mrf.mxu0  ;;  %v10194_v4 = vpop.f32.mrf.mxu1 }
 0x50a   :  { %v10195_v32 = vadd.f32 %v10194_v4, %v10161_v14  ;;  %v10232_v39 = vpop.f32.mrf.mxu2  ;;  %v10165_v33 = vadd.f32 %v10164_v58, %v10125_v15  ;;  %v11052_v14 = vld [vmem:[%s13094_s0 + $0x18] sm:$0xff] }
 0x50b   :  { %v10233_v34 = vadd.f32 %v10232_v39, %v12886_v50 }
 0x50c   :  { %v10928_v56 = vadd.f32 %v11048_v59, %v10195_v32  ;;  %10800 = vmatmul.f32.gmra.mxu0 %v12689_v20  ;;  %10834 = vmatmul.f32.vlgmr.msra.gmra.mxu1 %v12674_v44  ;;  %v11049_v44 = vld [vmem:[%s13094_s0 + $0x40] sm:$0xff] }
 0x50d   :  { %10914 = vmatmul.f32.gmra.mxu3 %v12676_v16  ;;  %v10283_v23 = vadd.f32 %v10282_v60, %v10233_v34 }
 0x50e   :  { %v10952_v62 = vmax.f32 %v10928_v56, 0.0  ;;  %10880 = vmatmul.f32.gmra.mxu2 %v12676_v16  ;;  %v10131_v16 = vadd.f32 %v10130_v9, %v10090_v2 }
 0x510   :  { %10976 = vst [vmem:[#allocation3 + $0x10] sm:$0xff] %v10952_v62  ;;  %v10286_v8 = vpop.f32.mrf.mxu3  ;;  %v11053_v62 = vld [vmem:[%s13094_s0 + $0x48] sm:$0xff] }
 0x511   :  { %v10168_v3 = vpop.f32.mrf.mxu0  ;;  %v10198_v25 = vpop.f32.mrf.mxu1 }
 0x512   :  { %v10199_v63 = vadd.f32 %v10198_v25, %v10165_v33  ;;  %v10240_v11 = vpop.f32.mrf.mxu2  ;;  %v10169_v28 = vadd.f32 %v10168_v3, %v10131_v16 }
 0x513   :  { %v10241_v7 = vadd.f32 %v10240_v11, %v12899_v45 }
 0x514   :  { %v10934_v20 = vadd.f32 %v11049_v44, %v10199_v63  ;;  %10805 = vmatmul.f32.gmra.mxu0 %v12716_v0  ;;  %10840 = vmatmul.f32.gmra.mxu1 %v12700_v12  ;;  %v11050_v0 = vld [vmem:[%s13094_s0 + $0x70] sm:$0xff] }
 0x515   :  { %10918 = vmatmul.f32.gmra.mxu3 %v12702_v53  ;;  %v10287_v22 = vadd.f32 %v10286_v8, %v10241_v7 }
 0x516   :  { %v10958_v48 = vmax.f32 %v10934_v20, 0.0  ;;  %10884 = vmatmul.f32.gmra.mxu2 %v12702_v53  ;;  %v10137_v53 = vadd.f32 %v10136_v57, %v10095_v1 }
 0x518   :  { %10982 = vst [vmem:[#allocation3 + $0x40] sm:$0xff] %v10958_v48  ;;  %v10290_v61 = vpop.f32.mrf.mxu3  ;;  %v11054_v48 = vld [vmem:[%s13094_s0 + $0x78] sm:$0xff] }
 0x519   :  { %v10172_v6 = vpop.f32.mrf.mxu0  ;;  %v10202_v5 = vpop.f32.mrf.mxu1 }
 0x51a   :  { %v10203_v43 = vadd.f32 %v10202_v5, %v10169_v28  ;;  %v10248_v30 = vpop.f32.mrf.mxu2  ;;  %v10173_v40 = vadd.f32 %v10172_v6, %v10137_v53  ;;  %v11055_v53 = vld [vmem:[%s13094_s0 + $0xa8] sm:$0xff] }
 0x51b   :  { %v10249_v38 = vadd.f32 %v10248_v30, %v12914_v27 }
 0x51c   :  { %v10940_v12 = vadd.f32 %v11050_v0, %v10203_v43  ;;  %10810 = vmatmul.f32.gmra.mxu0 %v12736_v42  ;;  %10846 = vmatmul.f32.gmra.mxu1 %v12724_v26  ;;  %v11051_v42 = vld [vmem:[%s13094_s0 + $0xa0] sm:$0xff] }
 0x51d   :  { %10922 = vmatmul.f32.gmra.mxu3 %v12726_v41  ;;  %v10291_v56 = vadd.f32 %v10290_v61, %v10249_v38 }
 0x51e   :  { %v10964_v49 = vmax.f32 %v10940_v12, 0.0  ;;  %10888 = vmatmul.f32.gmra.mxu2 %v12726_v41 }
 0x520   :  { %10988 = vst [vmem:[#allocation3 + $0x70] sm:$0xff] %v10964_v49  ;;  %v10294_v17 = vpop.f32.mrf.mxu3 }
 0x521   :  { %v10206_v37 = vpop.f32.mrf.mxu1  ;;  %v10318_v24 = vpop.f32.mrf.mxu0 }
 0x522   :  { %v10207_v9 = vadd.f32 %v10206_v37, %v10173_v40  ;;  %v10256_v21 = vpop.f32.mrf.mxu2  ;;  %v10319_v41 = vadd.f32 %v10318_v24, %v10283_v23 }
 0x523   :  { %v10257_v52 = vadd.f32 %v10256_v21, %v12925_v35 }
 0x524   :  { %v10946_v26 = vadd.f32 %v11051_v42, %v10207_v9  ;;  %10852 = vmatmul.f32.gmra.mxu1 %v12750_v36 }
 0x525   :  { %v10295_v20 = vadd.f32 %v10294_v17, %v10257_v52 }
 0x526   :  { %v10970_v31 = vmax.f32 %v10946_v26, 0.0 }
 0x528   :  { %10994 = vst [vmem:[#allocation3 + $0xa0] sm:$0xff] %v10970_v31  ;;  %v10433_v55 = vpop.f32.mrf.mxu3 }
 0x529   :  { %v10323_v29 = vpop.f32.mrf.mxu0  ;;  %v10357_v57 = vpop.f32.mrf.mxu1 }
 0x52a   :  { %v10358_v19 = vadd.f32 %v10357_v57, %v10319_v41  ;;  %v10399_v46 = vpop.f32.mrf.mxu2  ;;  %v10324_v18 = vadd.f32 %v10323_v29, %v10287_v22 }
 0x52c   :  { %v10400_v13 = vadd.f32 %v10399_v46, %v10358_v19 }
 0x52e   :  { %v10434_v54 = vadd.f32 %v10433_v55, %v10400_v13 }
 0x530   :  { %v10929_v36 = vadd.f32 %v11052_v14, %v10434_v54  ;;  %v10437_v60 = vpop.f32.mrf.mxu3 }
 0x531   :  { %v10328_v58 = vpop.f32.mrf.mxu0  ;;  %v10363_v4 = vpop.f32.mrf.mxu1 }
 0x532   :  { %v10953_v32 = vmax.f32 %v10929_v36, 0.0  ;;  %v10364_v39 = vadd.f32 %v10363_v4, %v10324_v18  ;;  %v10403_v51 = vpop.f32.mrf.mxu2  ;;  %v10329_v47 = vadd.f32 %v10328_v58, %v10291_v56 }
 0x534   :  { %10977 = vst [vmem:[#allocation3 + $0x18] sm:$0xff] %v10953_v32  ;;  %v10404_v59 = vadd.f32 %v10403_v51, %v10364_v39 }
 0x536   :  { %v10438_v15 = vadd.f32 %v10437_v60, %v10404_v59  ;;  %v11056_v59 = vld [vmem:[%s13094_s0 + $0x20] sm:$0xff] }
 0x538   :  { %v10935_v33 = vadd.f32 %v11053_v62, %v10438_v15  ;;  %v10441_v8 = vpop.f32.mrf.mxu3 }
 0x539   :  { %v10333_v3 = vpop.f32.mrf.mxu0  ;;  %v10369_v25 = vpop.f32.mrf.mxu1 }
 0x53a   :  { %v10959_v2 = vmax.f32 %v10935_v33, 0.0  ;;  %v10370_v63 = vadd.f32 %v10369_v25, %v10329_v47  ;;  %v10407_v11 = vpop.f32.mrf.mxu2  ;;  %v10334_v10 = vadd.f32 %v10333_v3, %v10295_v20 }
 0x53c   :  { %10983 = vst [vmem:[#allocation3 + $0x48] sm:$0xff] %v10959_v2  ;;  %v10408_v44 = vadd.f32 %v10407_v11, %v10370_v63 }
 0x53e   :  { %v10442_v16 = vadd.f32 %v10441_v8, %v10408_v44  ;;  %v11057_v44 = vld [vmem:[%s13094_s0 + $0x50] sm:$0xff] }
 0x540   :  { %v10941_v28 = vadd.f32 %v11054_v48, %v10442_v16  ;;  %v10445_v61 = vpop.f32.mrf.mxu3 }
 0x541   :  { %v10375_v6 = vpop.f32.mrf.mxu1  ;;  %v10471_v5 = vpop.f32.mrf.mxu0 }
 0x542   :  { %v10965_v1 = vmax.f32 %v10941_v28, 0.0  ;;  %v10376_v43 = vadd.f32 %v10375_v6, %v10334_v10  ;;  %v10411_v30 = vpop.f32.mrf.mxu2  ;;  %v10472_v55 = vadd.f32 %v10471_v5, %v12886_v50 }
 0x544   :  { %10989 = vst [vmem:[#allocation3 + $0x78] sm:$0xff] %v10965_v1  ;;  %v10412_v0 = vadd.f32 %v10411_v30, %v10376_v43 }
 0x546   :  { %v10446_v12 = vadd.f32 %v10445_v61, %v10412_v0  ;;  %v11058_v0 = vld [vmem:[%s13094_s0 + $0x80] sm:$0xff] }
 0x548   :  { %v10947_v49 = vadd.f32 %v11055_v53, %v10446_v12  ;;  %v10596_v40 = vpop.f32.mrf.mxu3 }
 0x549   :  { %v10479_v17 = vpop.f32.mrf.mxu0  ;;  %v10521_v37 = vpop.f32.mrf.mxu1 }
 0x54a   :  { %v10971_v24 = vmax.f32 %v10947_v49, 0.0  ;;  %v10557_v34 = vpop.f32.mrf.mxu2  ;;  %v10522_v57 = vadd.f32 %v10521_v37, %v10472_v55  ;;  %v10480_v13 = vadd.f32 %v10479_v17, %v12899_v45 }
 0x54c   :  { %10995 = vst [vmem:[#allocation3 + $0xa8] sm:$0xff] %v10971_v24  ;;  %v10558_v22 = vadd.f32 %v10557_v34, %v10522_v57 }
 0x54e   :  { %v10597_v18 = vadd.f32 %v10596_v40, %v10558_v22 }
 0x550   :  { %v10602_v9 = vpop.f32.mrf.mxu3 }
 0x551   :  { %v10487_v21 = vpop.f32.mrf.mxu0  ;;  %v10525_v42 = vpop.f32.mrf.mxu1 }
 0x552   :  { %v10562_v26 = vpop.f32.mrf.mxu2  ;;  %v10526_v14 = vadd.f32 %v10525_v42, %v10480_v13  ;;  %v10488_v51 = vadd.f32 %v10487_v21, %v12914_v27  ;;  %v11059_v42 = vld [vmem:[%s13094_s0 + $0xb0] sm:$0xff] }
 0x554   :  { %v10563_v38 = vadd.f32 %v10562_v26, %v10526_v14 }
 0x556   :  { %v10603_v15 = vadd.f32 %v10602_v9, %v10563_v38 }
 0x558   :  { %v10608_v23 = vpop.f32.mrf.mxu3 }
 0x559   :  { %v10495_v31 = vpop.f32.mrf.mxu0  ;;  %v10529_v41 = vpop.f32.mrf.mxu1 }
 0x55a   :  { %v10567_v29 = vpop.f32.mrf.mxu2  ;;  %v10530_v47 = vadd.f32 %v10529_v41, %v10488_v51  ;;  %v10496_v52 = vadd.f32 %v10495_v31, %v12925_v35 }
 0x55c   :  { %v10568_v2 = vadd.f32 %v10567_v29, %v10530_v47 }
 0x55e   :  { %v10609_v16 = vadd.f32 %v10608_v23, %v10568_v2 }
 0x560   :  { %v10614_v7 = vpop.f32.mrf.mxu3 }
 0x561   :  { %v10533_v19 = vpop.f32.mrf.mxu1  ;;  %v10638_v46 = vpop.f32.mrf.mxu0 }
 0x562   :  { %v10572_v54 = vpop.f32.mrf.mxu2  ;;  %v10639_v36 = vadd.f32 %v10638_v46, %v10597_v18  ;;  %v10534_v10 = vadd.f32 %v10533_v19, %v10496_v52  ;;  %v11060_v18 = vld [vmem:[%s13094_s0 + $0x28] sm:$0xff] }
 0x564   :  { %v10573_v1 = vadd.f32 %v10572_v54, %v10534_v10 }
 0x566   :  { %v10615_v53 = vadd.f32 %v10614_v7, %v10573_v1  ;;  %v11063_v1 = vld [vmem:[%s13094_s0 + $0xb8] sm:$0xff] }
 0x568   :  { %v10760_v60 = vpop.f32.mrf.mxu3 }
 0x569   :  { %v10642_v58 = vpop.f32.mrf.mxu0  ;;  %v10672_v4 = vpop.f32.mrf.mxu1 }
 0x56a   :  { %v10673_v32 = vadd.f32 %v10672_v4, %v10639_v36  ;;  %v10710_v39 = vpop.f32.mrf.mxu2  ;;  %v10643_v33 = vadd.f32 %v10642_v58, %v10603_v15  ;;  %v11061_v15 = vld [vmem:[%s13094_s0 + $0x58] sm:$0xff] }
 0x56b   :  { %v10711_v34 = vadd.f32 %v10710_v39, %v12886_v50 }
 0x56c   :  { %v10930_v56 = vadd.f32 %v11056_v59, %v10673_v32 }
 0x56d   :  { %v10761_v23 = vadd.f32 %v10760_v60, %v10711_v34 }
 0x56e   :  { %v10954_v62 = vmax.f32 %v10930_v56, 0.0 }
 0x570   :  { %10978 = vst [vmem:[#allocation3 + $0x20] sm:$0xff] %v10954_v62  ;;  %v10764_v8 = vpop.f32.mrf.mxu3 }
 0x571   :  { %v10646_v3 = vpop.f32.mrf.mxu0  ;;  %v10676_v25 = vpop.f32.mrf.mxu1 }
 0x572   :  { %v10677_v63 = vadd.f32 %v10676_v25, %v10643_v33  ;;  %v10718_v11 = vpop.f32.mrf.mxu2  ;;  %v10647_v28 = vadd.f32 %v10646_v3, %v10609_v16 }
 0x573   :  { %v10719_v7 = vadd.f32 %v10718_v11, %v12899_v45 }
 0x574   :  { %v10936_v20 = vadd.f32 %v11057_v44, %v10677_v63 }
 0x575   :  { %v10765_v50 = vadd.f32 %v10764_v8, %v10719_v7 }
 0x576   :  { %v10960_v48 = vmax.f32 %v10936_v20, 0.0  ;;  %v11062_v20 = vld [vmem:[%s13094_s0 + $0x88] sm:$0xff] }
 0x578   :  { %10984 = vst [vmem:[#allocation3 + $0x50] sm:$0xff] %v10960_v48  ;;  %v10768_v61 = vpop.f32.mrf.mxu3 }
 0x579   :  { %v10650_v6 = vpop.f32.mrf.mxu0  ;;  %v10680_v5 = vpop.f32.mrf.mxu1 }
 0x57a   :  { %v10681_v43 = vadd.f32 %v10680_v5, %v10647_v28  ;;  %v10726_v30 = vpop.f32.mrf.mxu2  ;;  %v10651_v40 = vadd.f32 %v10650_v6, %v10615_v53 }
 0x57b   :  { %v10727_v58 = vadd.f32 %v10726_v30, %v12914_v27 }
 0x57c   :  { %v10942_v12 = vadd.f32 %v11058_v0, %v10681_v43 }
 0x57d   :  { %v10769_v51 = vadd.f32 %v10768_v61, %v10727_v58 }
 0x57e   :  { %v10966_v49 = vmax.f32 %v10942_v12, 0.0 }
 0x580   :  { %10990 = vst [vmem:[#allocation3 + $0x80] sm:$0xff] %v10966_v49  ;;  %v10772_v17 = vpop.f32.mrf.mxu3 }
 0x581   :  { %v10684_v37 = vpop.f32.mrf.mxu1  ;;  %v10796_v24 = vpop.f32.mrf.mxu0 }
 0x582   :  { %v10685_v9 = vadd.f32 %v10684_v37, %v10651_v40  ;;  %v10734_v21 = vpop.f32.mrf.mxu2  ;;  %v10797_v41 = vadd.f32 %v10796_v24, %v10761_v23 }
 0x583   :  { %v10735_v8 = vadd.f32 %v10734_v21, %v12925_v35 }
 0x584   :  { %v10948_v26 = vadd.f32 %v11059_v42, %v10685_v9 }
 0x585   :  { %v10773_v63 = vadd.f32 %v10772_v17, %v10735_v8 }
 0x586   :  { %v10972_v31 = vmax.f32 %v10948_v26, 0.0 }
 0x588   :  { %10996 = vst [vmem:[#allocation3 + $0xb0] sm:$0xff] %v10972_v31  ;;  %v10911_v55 = vpop.f32.mrf.mxu3 }
 0x589   :  { %v10801_v29 = vpop.f32.mrf.mxu0  ;;  %v10835_v57 = vpop.f32.mrf.mxu1 }
 0x58a   :  { %v10836_v19 = vadd.f32 %v10835_v57, %v10797_v41  ;;  %v10877_v46 = vpop.f32.mrf.mxu2  ;;  %v10802_v54 = vadd.f32 %v10801_v29, %v10765_v50 }
 0x58c   :  { %v10878_v13 = vadd.f32 %v10877_v46, %v10836_v19 }
 0x58e   :  { %v10912_v22 = vadd.f32 %v10911_v55, %v10878_v13 }
 0x590   :  { %v10931_v14 = vadd.f32 %v11060_v18, %v10912_v22  ;;  %v10915_v36 = vpop.f32.mrf.mxu3 }
 0x591   :  { %v10841_v60 = vpop.f32.mrf.mxu1  ;;  %v10806_v39 = vpop.f32.mrf.mxu0 }
 0x592   :  { %v10955_v4 = vmax.f32 %v10931_v14, 0.0  ;;  %v10842_v38 = vadd.f32 %v10841_v60, %v10802_v54  ;;  %v10881_v32 = vpop.f32.mrf.mxu2  ;;  %v10807_v56 = vadd.f32 %v10806_v39, %v10769_v51 }
 0x594   :  { %10979 = vst [vmem:[#allocation3 + $0x28] sm:$0xff] %v10955_v4  ;;  %v10882_v45 = vadd.f32 %v10881_v32, %v10842_v38 }
 0x596   :  { %v10916_v59 = vadd.f32 %v10915_v36, %v10882_v45 }
 0x598   :  { %v10937_v47 = vadd.f32 %v11061_v15, %v10916_v59  ;;  %v10919_v33 = vpop.f32.mrf.mxu3 }
 0x599   :  { %v10847_v62 = vpop.f32.mrf.mxu1  ;;  %v10811_v2 = vpop.f32.mrf.mxu0 }
 0x59a   :  { %v10961_v3 = vmax.f32 %v10937_v47, 0.0  ;;  %v10848_v27 = vadd.f32 %v10847_v62, %v10807_v56  ;;  %v10885_v25 = vpop.f32.mrf.mxu2  ;;  %v10812_v44 = vadd.f32 %v10811_v2, %v10773_v63 }
 0x59c   :  { %10985 = vst [vmem:[#allocation3 + $0x58] sm:$0xff] %v10961_v3  ;;  %v10886_v52 = vadd.f32 %v10885_v25, %v10848_v27 }
 0x59e   :  { %v10920_v11 = vadd.f32 %v10919_v33, %v10886_v52 }
 0x5a0   :  { %v10943_v16 = vadd.f32 %v11062_v20, %v10920_v11  ;;  %v10923_v6 = vpop.f32.mrf.mxu3 }
 0x5a1   :  { %v10853_v10 = vpop.f32.mrf.mxu1 }
 0x5a2   :  { %v10967_v48 = vmax.f32 %v10943_v16, 0.0  ;;  %v10854_v28 = vadd.f32 %v10853_v10, %v10812_v44  ;;  %v10889_v61 = vpop.f32.mrf.mxu2 }
 0x5a4   :  { %10991 = vst [vmem:[#allocation3 + $0x88] sm:$0xff] %v10967_v48  ;;  %v10890_v35 = vadd.f32 %v10889_v61, %v10854_v28 }
 0x5a6   :  { %v10924_v5 = vadd.f32 %v10923_v6, %v10890_v35 }
 0x5a8   :  { %v10949_v43 = vadd.f32 %v11063_v1, %v10924_v5 }
 0x5aa   :  { %v10973_v30 = vmax.f32 %v10949_v43, 0.0 }
 0x5ac   :  { %10997 = vst [vmem:[#allocation3 + $0xb8] sm:$0xff] %v10973_v30 }
 0x5ad   :  { %11010 = dma.vmem_to_hbm [thread:$0]  %s11003_s16, 3072, %s11005_s19, [#allocation4], %s11101_s21, %s11101_s21, %s11102_s6  }
 0x5ae   :  { %11088 = dma.done.wait [#allocation4], 3072  }
 0x5af   :  { %11089 = vsyncadd [#allocation4], 4294964224 }
 0x5b0   :  { %11015 = vsyncpa [#allocation4], 1 }

</bundles_post_ra>
